<compile_context>
chip_gen: v7x
topology: tpu7x:2x2x1
jax: 0.10.0
libtpu: 0.0.40
codegen_flags: <defaults>
</compile_context>

<pallas_src>
import jax
import jax.numpy as jnp
from jax.experimental import pallas as pl
from jax.experimental.pallas import tpu as pltpu

EPS = 1e-5
VMEM_LIMIT = 32 * 1024 * 1024


# ---------------------------------------------------------------------------
# Pass A: conv1 (no bias) + per-image BN1 partial statistics
# ---------------------------------------------------------------------------
def conv1_stats_kernel(xp_ref, w_ref, c1_ref, ps_ref):
    # xp_ref: (H+2, W+2, Cin)  zero-padded input image (f32)
    # w_ref : (9, Cin, Cout)   bf16 conv1 weights, tap-major (kh*3+kw)
    # c1_ref: (H, W, Cout)     raw conv1 output (pre-BN, no bias)
    # ps_ref: (2, Cout)        per-image [sum, sum_of_squares]
    Hp, Wp, Cin = xp_ref.shape
    H, W = Hp - 2, Wp - 2
    Cout = c1_ref.shape[-1]
    M = H * W

    acc = jnp.zeros((M, Cout), jnp.float32)
    for kh in range(3):
        for kw in range(3):
            k = kh * 3 + kw
            slab = xp_ref[kh:kh + H, kw:kw + W, :].reshape(M, Cin)
            acc = acc + jnp.dot(slab.astype(jnp.bfloat16), w_ref[k],
                                preferred_element_type=jnp.float32)

    c1_ref[...] = acc.reshape(H, W, Cout)
    ps_ref[0:1, :] = jnp.sum(acc, axis=0, keepdims=True)
    ps_ref[1:2, :] = jnp.sum(acc * acc, axis=0, keepdims=True)


# ---------------------------------------------------------------------------
# Pass B: bn1 (folded scale/shift) + relu -> conv2 (no bias) + BN2 stats
# ---------------------------------------------------------------------------
def conv2_stats_kernel(c1_ref, bn1_ref, w_ref, c2_ref, ps_ref, padres_ref):
    # c1_ref    : (H, W, C)      raw conv1 output
    # bn1_ref   : (2, C)         [scale1, shift1] (mean/var/gamma/beta folded)
    # w_ref     : (9, C, C)      bf16 conv2 weights, tap-major
    # c2_ref    : (H, W, C)      raw conv2 output (pre-BN, no bias)
    # ps_ref    : (2, C)         per-image [sum, sum_of_squares] of conv2
    # padres_ref: (H+2, W+2, C)  zero-padded "res" scratch (f32)
    H, W, C = c1_ref.shape
    M = H * W

    scale1 = bn1_ref[0:1, :]
    shift1 = bn1_ref[1:2, :]
    res = jnp.maximum(c1_ref[...].reshape(M, C) * scale1 + shift1, 0.0)

    # zero only the 1-pixel border, then write the interior
    padres_ref[0:1, :, :] = jnp.zeros((1, W + 2, C), jnp.float32)
    padres_ref[H + 1:H + 2, :, :] = jnp.zeros((1, W + 2, C), jnp.float32)
    padres_ref[:, 0:1, :] = jnp.zeros((H + 2, 1, C), jnp.float32)
    padres_ref[:, W + 1:W + 2, :] = jnp.zeros((H + 2, 1, C), jnp.float32)
    padres_ref[1:H + 1, 1:W + 1, :] = res.reshape(H, W, C)

    acc = jnp.zeros((M, C), jnp.float32)
    for kh in range(3):
        for kw in range(3):
            k = kh * 3 + kw
            slab = padres_ref[kh:kh + H, kw:kw + W, :].reshape(M, C)
            acc = acc + jnp.dot(slab.astype(jnp.bfloat16), w_ref[k],
                                preferred_element_type=jnp.float32)

    c2_ref[...] = acc.reshape(H, W, C)
    ps_ref[0:1, :] = jnp.sum(acc, axis=0, keepdims=True)
    ps_ref[1:2, :] = jnp.sum(acc * acc, axis=0, keepdims=True)


# ---------------------------------------------------------------------------
# Pass C: bn2 + residual + relu, with the 2x2 stride-2 max-pool fused in
# ---------------------------------------------------------------------------
def bn_add_relu_pool_kernel(c1_ref, c2_ref, bn_ref, y_ref, p_ref):
    # c1_ref: (H, W, C) raw conv1 ; c2_ref: (H, W, C) raw conv2
    # bn_ref: (4, C) [scale1, shift1, scale2, shift2]
    # y_ref : (H, W, C) ; p_ref : (H//2, W//2, C)
    H, W, C = c1_ref.shape
    M = H * W

    scale1 = bn_ref[0:1, :]
    shift1 = bn_ref[1:2, :]
    scale2 = bn_ref[2:3, :]
    shift2 = bn_ref[3:4, :]

    c1 = c1_ref[...].reshape(M, C)
    c2 = c2_ref[...].reshape(M, C)
    res = jnp.maximum(c1 * scale1 + shift1, 0.0)
    y = jnp.maximum(c2 * scale2 + shift2 + res, 0.0)
    y_ref[...] = y.reshape(H, W, C)

    # fused 2x2 max-pool (stride 2):
    #  - horizontal pairs: two sublane-strided loads of the freshly written y
    #  - vertical pairs: outer-dim split (layout-safe) + max
    even = y_ref[:, pl.ds(0, W // 2, stride=2), :]          # (H, W//2, C)
    odd = y_ref[:, pl.ds(1, W // 2, stride=2), :]           # (H, W//2, C)
    hm = jnp.maximum(even, odd)
    hr = hm.reshape(H // 2, 2, W // 2, C)                    # outer split only
    p_ref[...] = jnp.maximum(hr[:, 0, :, :], hr[:, 1, :, :])


# ---------------------------------------------------------------------------
# Wrapper
# ---------------------------------------------------------------------------
def _fold_bn(ps, count, gamma, beta):
    # ps: (N, 2, C) per-image [sum, sum_sq].  Training-mode BN: batch mean,
    # biased variance.  Returns per-channel (scale, shift).
    s = jnp.sum(ps[:, 0, :], axis=0)
    sq = jnp.sum(ps[:, 1, :], axis=0)
    mean = s / count
    var = jnp.maximum(sq / count - mean * mean, 0.0)
    scale = gamma * jax.lax.rsqrt(var + EPS)
    shift = beta - mean * scale
    return scale, shift


def down_sample_forward(x_nchw, params):
    (w1, b1, g1, be1, w2, b2, g2, be2) = params   # w*: (3,3,Cin,Cout) HWIO
    # b1, b2 unused: a per-channel constant added before training-mode BN
    # cancels exactly when the batch mean is subtracted.
    del b1, b2
    N, Cin, H, W = x_nchw.shape
    Cout = w1.shape[-1]
    assert H % 2 == 0 and W % 2 == 0 and W % 8 == 0
    H2, W2 = H // 2, W // 2
    count = N * H * W

    x = jnp.transpose(x_nchw, (0, 2, 3, 1)).astype(jnp.float32)       # NHWC
    xp = jnp.pad(x, ((0, 0), (1, 1), (1, 1), (0, 0)))
    w1t = w1.reshape(9, Cin, Cout).astype(jnp.bfloat16)
    w2t = w2.reshape(9, Cout, Cout).astype(jnp.bfloat16)

    cparams = pltpu.CompilerParams(
        dimension_semantics=("parallel",),
        vmem_limit_bytes=VMEM_LIMIT)

    # ---- pass A: conv1 + BN1 partial stats -------------------------------
    c1, ps1 = pl.pallas_call(
        conv1_stats_kernel,
        grid=(N,),
        in_specs=[
            pl.BlockSpec((None, H + 2, W + 2, Cin), lambda n: (n, 0, 0, 0)),
            pl.BlockSpec((9, Cin, Cout), lambda n: (0, 0, 0)),
        ],
        out_specs=[
            pl.BlockSpec((None, H, W, Cout), lambda n: (n, 0, 0, 0)),
            pl.BlockSpec((None, 2, Cout), lambda n: (n, 0, 0)),
        ],
        out_shape=[
            jax.ShapeDtypeStruct((N, H, W, Cout), jnp.float32),
            jax.ShapeDtypeStruct((N, 2, Cout), jnp.float32),
        ],
        compiler_params=cparams,
        cost_estimate=pl.CostEstimate(
            flops=2 * count * 9 * Cin * Cout,
            transcendentals=0,
            bytes_accessed=4 * (N * (H + 2) * (W + 2) * Cin
                                + count * Cout + 2 * N * Cout)),
    )(xp, w1t)

    scale1, shift1 = _fold_bn(ps1, count, g1, be1)

    # ---- pass B: bn1+relu, conv2 + BN2 partial stats ----------------------
    bn1p = jnp.stack([scale1, shift1], axis=0)                    # (2, Cout)
    c2, ps2 = pl.pallas_call(
        conv2_stats_kernel,
        grid=(N,),
        in_specs=[
            pl.BlockSpec((None, H, W, Cout), lambda n: (n, 0, 0, 0)),
            pl.BlockSpec((2, Cout), lambda n: (0, 0)),
            pl.BlockSpec((9, Cout, Cout), lambda n: (0, 0, 0)),
        ],
        out_specs=[
            pl.BlockSpec((None, H, W, Cout), lambda n: (n, 0, 0, 0)),
            pl.BlockSpec((None, 2, Cout), lambda n: (n, 0, 0)),
        ],
        out_shape=[
            jax.ShapeDtypeStruct((N, H, W, Cout), jnp.float32),
            jax.ShapeDtypeStruct((N, 2, Cout), jnp.float32),
        ],
        scratch_shapes=[pltpu.VMEM((H + 2, W + 2, Cout), jnp.float32)],
        compiler_params=cparams,
        cost_estimate=pl.CostEstimate(
            flops=2 * count * 9 * Cout * Cout,
            transcendentals=0,
            bytes_accessed=4 * (2 * count * Cout + 2 * N * Cout)),
    )(c1, bn1p, w2t)

    scale2, shift2 = _fold_bn(ps2, count, g2, be2)

    # ---- pass C: bn2 + residual + relu + fused 2x2 maxpool ----------------
    bnp = jnp.stack([scale1, shift1, scale2, shift2], axis=0)     # (4, Cout)
    y, p = pl.pallas_call(
        bn_add_relu_pool_kernel,
        grid=(N,),
        in_specs=[
            pl.BlockSpec((None, H, W, Cout), lambda n: (n, 0, 0, 0)),
            pl.BlockSpec((None, H, W, Cout), lambda n: (n, 0, 0, 0)),
            pl.BlockSpec((4, Cout), lambda n: (0, 0)),
        ],
        out_specs=[
            pl.BlockSpec((None, H, W, Cout), lambda n: (n, 0, 0, 0)),
            pl.BlockSpec((None, H2, W2, Cout), lambda n: (n, 0, 0, 0)),
        ],
        out_shape=[
            jax.ShapeDtypeStruct((N, H, W, Cout), jnp.float32),
            jax.ShapeDtypeStruct((N, H2, W2, Cout), jnp.float32),
        ],
        compiler_params=cparams,
        cost_estimate=pl.CostEstimate(
            flops=8 * count * Cout,
            transcendentals=0,
            bytes_accessed=4 * (3 * count * Cout + N * H2 * W2 * Cout)),
    )(c1, c2, bnp)

    # back to NCHW to match the PyTorch module
    return jnp.transpose(y, (0, 3, 1, 2)), jnp.transpose(p, (0, 3, 1, 2))


# ---------------------------------------------------------------------------
# Pure-JAX reference (training-mode BN; conv in bf16/f32-acc like the MXU path)
# ---------------------------------------------------------------------------
def ref_forward(x_nchw, params):
    (w1, b1, g1, be1, w2, b2, g2, be2) = params
    x = jnp.transpose(x_nchw, (0, 2, 3, 1))

    def conv(x, w, b):
        y = jax.lax.conv_general_dilated(
            x.astype(jnp.bfloat16), w.astype(jnp.bfloat16), (1, 1), 'SAME',
            dimension_numbers=('NHWC', 'HWIO', 'NHWC'),
            preferred_element_type=jnp.float32)
        return y + b

    def bn(h, g, be):
        mean = jnp.mean(h, axis=(0, 1, 2), keepdims=True)
        var = jnp.mean((h - mean) ** 2, axis=(0, 1, 2), keepdims=True)
        return (h - mean) * jax.lax.rsqrt(var + EPS) * g + be

    h = jax.nn.relu(bn(conv(x, w1, b1), g1, be1))
    y = jax.nn.relu(bn(conv(h, w2, b2), g2, be2) + h)
    N, H, W, C = y.shape
    p = jnp.max(y.reshape(N, H // 2, 2, W // 2, 2, C), axis=(2, 4))
    return jnp.transpose(y, (0, 3, 1, 2)), jnp.transpose(p, (0, 3, 1, 2))


if __name__ == "__main__":
    key = jax.random.PRNGKey(0)
    ks = jax.random.split(key, 9)
    N, Cin, Cout, H, W = 2, 4, 8, 16, 16
    H2, W2 = H // 2, W // 2

    x = jax.random.normal(ks[0], (N, Cin, H, W), jnp.float32)
    w1 = 0.2 * jax.random.normal(ks[1], (3, 3, Cin, Cout), jnp.float32)
    b1 = 0.1 * jax.random.normal(ks[2], (Cout,), jnp.float32)
    g1 = 1.0 + 0.1 * jax.random.normal(ks[3], (Cout,), jnp.float32)
    be1 = 0.1 * jax.random.normal(ks[4], (Cout,), jnp.float32)
    w2 = 0.2 * jax.random.normal(ks[5], (3, 3, Cout, Cout), jnp.float32)
    b2 = 0.1 * jax.random.normal(ks[6], (Cout,), jnp.float32)
    g2 = 1.0 + 0.1 * jax.random.normal(ks[7], (Cout,), jnp.float32)
    be2 = 0.1 * jax.random.normal(ks[8], (Cout,), jnp.float32)
    params = (w1, b1, g1, be1, w2, b2, g2, be2)

    y, p = jax.jit(down_sample_forward)(x, params)
    jax.block_until_ready((y, p))

    y_ref, p_ref = ref_forward(x, params)
    assert y.shape == (N, Cout, H, W) and p.shape == (N, Cout, H2, W2)
    # Tolerance covers bf16-MXU rounding-order differences between the
    # per-tap kernel path and XLA's conv path.
    assert jnp.allclose(y, y_ref, atol=1e-2, rtol=1e-2)
    assert jnp.allclose(p, p_ref, atol=1e-2, rtol=1e-2)
    print("KERNEL_OK")
</pallas_src>

<mosaic_0001>
module attributes {stable_mosaic.version = 11 : i64} {
  func.func @conv1_stats_kernel(%arg0: i32, %arg1: memref<1x18x18x4xf32, #tpu.memory_space<vmem>>, %arg2: memref<9x4x8xbf16, #tpu.memory_space<vmem>>, %arg3: memref<1x16x16x8xf32, #tpu.memory_space<vmem>>, %arg4: memref<1x2x8xf32, #tpu.memory_space<vmem>>) attributes {dimension_semantics = [#tpu.dimension_semantics<parallel>], iteration_bounds = array<i64: 2>, scalar_prefetch = 0 : i64, scratch_operands = 0 : i64, tpu.core_type = #tpu.core_type<tc>, window_params = [{transform_indices = @transform_0, window_bounds = array<i64: 1, 18, 18, 4>}, {pipeline_mode = #tpu.pipeline_mode<synchronous>, transform_indices = @transform_1, window_bounds = array<i64: 9, 4, 8>}, {transform_indices = @transform_2, window_bounds = array<i64: 1, 16, 16, 8>}, {transform_indices = @transform_3, window_bounds = array<i64: 1, 2, 8>}]} {
    %cst = arith.constant 0.000000e+00 : f32
    %0 = vector.broadcast %cst : f32 to vector<256x8xf32>
    %c0 = arith.constant 0 : index
    %c0_0 = arith.constant 0 : index
    %c0_1 = arith.constant 0 : index
    %c0_2 = arith.constant 0 : index
    %1 = vector.load %arg1[%c0, %c0_0, %c0_1, %c0_2] : memref<1x18x18x4xf32, #tpu.memory_space<vmem>>, vector<1x16x16x4xf32>
    %2 = vector.shape_cast %1 : vector<1x16x16x4xf32> to vector<16x16x4xf32>
    %3 = vector.shape_cast %2 : vector<16x16x4xf32> to vector<256x4xf32>
    %4 = arith.truncf %3 : vector<256x4xf32> to vector<256x4xbf16>
    %c0_3 = arith.constant 0 : index
    %c0_4 = arith.constant 0 : index
    %c0_5 = arith.constant 0 : index
    %5 = vector.load %arg2[%c0_3, %c0_4, %c0_5] : memref<9x4x8xbf16, #tpu.memory_space<vmem>>, vector<1x4x8xbf16>
    %6 = vector.shape_cast %5 : vector<1x4x8xbf16> to vector<4x8xbf16>
    %cst_6 = arith.constant dense<0.000000e+00> : vector<256x8xf32>
    %7 = tpu.matmul %4, %6, %cst_6 {dimension_numbers = #tpu.dot_dimension_numbers<[1], [0], [0], [1], [0, 0, 1, 1], [], []>} : vector<256x4xbf16>, vector<4x8xbf16>, vector<256x8xf32> -> vector<256x8xf32>
    %8 = arith.addf %0, %7 : vector<256x8xf32>
    %c0_7 = arith.constant 0 : index
    %c0_8 = arith.constant 0 : index
    %c1 = arith.constant 1 : index
    %c0_9 = arith.constant 0 : index
    %9 = vector.load %arg1[%c0_7, %c0_8, %c1, %c0_9] : memref<1x18x18x4xf32, #tpu.memory_space<vmem>>, vector<1x16x16x4xf32>
    %10 = vector.shape_cast %9 : vector<1x16x16x4xf32> to vector<16x16x4xf32>
    %11 = vector.shape_cast %10 : vector<16x16x4xf32> to vector<256x4xf32>
    %12 = arith.truncf %11 : vector<256x4xf32> to vector<256x4xbf16>
    %c1_10 = arith.constant 1 : index
    %c0_11 = arith.constant 0 : index
    %c0_12 = arith.constant 0 : index
    %13 = vector.load %arg2[%c1_10, %c0_11, %c0_12] : memref<9x4x8xbf16, #tpu.memory_space<vmem>>, vector<1x4x8xbf16>
    %14 = vector.shape_cast %13 : vector<1x4x8xbf16> to vector<4x8xbf16>
    %cst_13 = arith.constant dense<0.000000e+00> : vector<256x8xf32>
    %15 = tpu.matmul %12, %14, %cst_13 {dimension_numbers = #tpu.dot_dimension_numbers<[1], [0], [0], [1], [0, 0, 1, 1], [], []>} : vector<256x4xbf16>, vector<4x8xbf16>, vector<256x8xf32> -> vector<256x8xf32>
    %16 = arith.addf %8, %15 : vector<256x8xf32>
    %c0_14 = arith.constant 0 : index
    %c0_15 = arith.constant 0 : index
    %c2 = arith.constant 2 : index
    %c0_16 = arith.constant 0 : index
    %17 = vector.load %arg1[%c0_14, %c0_15, %c2, %c0_16] : memref<1x18x18x4xf32, #tpu.memory_space<vmem>>, vector<1x16x16x4xf32>
    %18 = vector.shape_cast %17 : vector<1x16x16x4xf32> to vector<16x16x4xf32>
    %19 = vector.shape_cast %18 : vector<16x16x4xf32> to vector<256x4xf32>
    %20 = arith.truncf %19 : vector<256x4xf32> to vector<256x4xbf16>
    %c2_17 = arith.constant 2 : index
    %c0_18 = arith.constant 0 : index
    %c0_19 = arith.constant 0 : index
    %21 = vector.load %arg2[%c2_17, %c0_18, %c0_19] : memref<9x4x8xbf16, #tpu.memory_space<vmem>>, vector<1x4x8xbf16>
    %22 = vector.shape_cast %21 : vector<1x4x8xbf16> to vector<4x8xbf16>
    %cst_20 = arith.constant dense<0.000000e+00> : vector<256x8xf32>
    %23 = tpu.matmul %20, %22, %cst_20 {dimension_numbers = #tpu.dot_dimension_numbers<[1], [0], [0], [1], [0, 0, 1, 1], [], []>} : vector<256x4xbf16>, vector<4x8xbf16>, vector<256x8xf32> -> vector<256x8xf32>
    %24 = arith.addf %16, %23 : vector<256x8xf32>
    %c0_21 = arith.constant 0 : index
    %c1_22 = arith.constant 1 : index
    %c0_23 = arith.constant 0 : index
    %c0_24 = arith.constant 0 : index
    %25 = vector.load %arg1[%c0_21, %c1_22, %c0_23, %c0_24] : memref<1x18x18x4xf32, #tpu.memory_space<vmem>>, vector<1x16x16x4xf32>
    %26 = vector.shape_cast %25 : vector<1x16x16x4xf32> to vector<16x16x4xf32>
    %27 = vector.shape_cast %26 : vector<16x16x4xf32> to vector<256x4xf32>
    %28 = arith.truncf %27 : vector<256x4xf32> to vector<256x4xbf16>
    %c3 = arith.constant 3 : index
    %c0_25 = arith.constant 0 : index
    %c0_26 = arith.constant 0 : index
    %29 = vector.load %arg2[%c3, %c0_25, %c0_26] : memref<9x4x8xbf16, #tpu.memory_space<vmem>>, vector<1x4x8xbf16>
    %30 = vector.shape_cast %29 : vector<1x4x8xbf16> to vector<4x8xbf16>
    %cst_27 = arith.constant dense<0.000000e+00> : vector<256x8xf32>
    %31 = tpu.matmul %28, %30, %cst_27 {dimension_numbers = #tpu.dot_dimension_numbers<[1], [0], [0], [1], [0, 0, 1, 1], [], []>} : vector<256x4xbf16>, vector<4x8xbf16>, vector<256x8xf32> -> vector<256x8xf32>
    %32 = arith.addf %24, %31 : vector<256x8xf32>
    %c0_28 = arith.constant 0 : index
    %c1_29 = arith.constant 1 : index
    %c1_30 = arith.constant 1 : index
    %c0_31 = arith.constant 0 : index
    %33 = vector.load %arg1[%c0_28, %c1_29, %c1_30, %c0_31] : memref<1x18x18x4xf32, #tpu.memory_space<vmem>>, vector<1x16x16x4xf32>
    %34 = vector.shape_cast %33 : vector<1x16x16x4xf32> to vector<16x16x4xf32>
    %35 = vector.shape_cast %34 : vector<16x16x4xf32> to vector<256x4xf32>
    %36 = arith.truncf %35 : vector<256x4xf32> to vector<256x4xbf16>
    %c4 = arith.constant 4 : index
    %c0_32 = arith.constant 0 : index
    %c0_33 = arith.constant 0 : index
    %37 = vector.load %arg2[%c4, %c0_32, %c0_33] : memref<9x4x8xbf16, #tpu.memory_space<vmem>>, vector<1x4x8xbf16>
    %38 = vector.shape_cast %37 : vector<1x4x8xbf16> to vector<4x8xbf16>
    %cst_34 = arith.constant dense<0.000000e+00> : vector<256x8xf32>
    %39 = tpu.matmul %36, %38, %cst_34 {dimension_numbers = #tpu.dot_dimension_numbers<[1], [0], [0], [1], [0, 0, 1, 1], [], []>} : vector<256x4xbf16>, vector<4x8xbf16>, vector<256x8xf32> -> vector<256x8xf32>
    %40 = arith.addf %32, %39 : vector<256x8xf32>
    %c0_35 = arith.constant 0 : index
    %c1_36 = arith.constant 1 : index
    %c2_37 = arith.constant 2 : index
    %c0_38 = arith.constant 0 : index
    %41 = vector.load %arg1[%c0_35, %c1_36, %c2_37, %c0_38] : memref<1x18x18x4xf32, #tpu.memory_space<vmem>>, vector<1x16x16x4xf32>
    %42 = vector.shape_cast %41 : vector<1x16x16x4xf32> to vector<16x16x4xf32>
    %43 = vector.shape_cast %42 : vector<16x16x4xf32> to vector<256x4xf32>
    %44 = arith.truncf %43 : vector<256x4xf32> to vector<256x4xbf16>
    %c5 = arith.constant 5 : index
    %c0_39 = arith.constant 0 : index
    %c0_40 = arith.constant 0 : index
    %45 = vector.load %arg2[%c5, %c0_39, %c0_40] : memref<9x4x8xbf16, #tpu.memory_space<vmem>>, vector<1x4x8xbf16>
    %46 = vector.shape_cast %45 : vector<1x4x8xbf16> to vector<4x8xbf16>
    %cst_41 = arith.constant dense<0.000000e+00> : vector<256x8xf32>
    %47 = tpu.matmul %44, %46, %cst_41 {dimension_numbers = #tpu.dot_dimension_numbers<[1], [0], [0], [1], [0, 0, 1, 1], [], []>} : vector<256x4xbf16>, vector<4x8xbf16>, vector<256x8xf32> -> vector<256x8xf32>
    %48 = arith.addf %40, %47 : vector<256x8xf32>
    %c0_42 = arith.constant 0 : index
    %c2_43 = arith.constant 2 : index
    %c0_44 = arith.constant 0 : index
    %c0_45 = arith.constant 0 : index
    %49 = vector.load %arg1[%c0_42, %c2_43, %c0_44, %c0_45] : memref<1x18x18x4xf32, #tpu.memory_space<vmem>>, vector<1x16x16x4xf32>
    %50 = vector.shape_cast %49 : vector<1x16x16x4xf32> to vector<16x16x4xf32>
    %51 = vector.shape_cast %50 : vector<16x16x4xf32> to vector<256x4xf32>
    %52 = arith.truncf %51 : vector<256x4xf32> to vector<256x4xbf16>
    %c6 = arith.constant 6 : index
    %c0_46 = arith.constant 0 : index
    %c0_47 = arith.constant 0 : index
    %53 = vector.load %arg2[%c6, %c0_46, %c0_47] : memref<9x4x8xbf16, #tpu.memory_space<vmem>>, vector<1x4x8xbf16>
    %54 = vector.shape_cast %53 : vector<1x4x8xbf16> to vector<4x8xbf16>
    %cst_48 = arith.constant dense<0.000000e+00> : vector<256x8xf32>
    %55 = tpu.matmul %52, %54, %cst_48 {dimension_numbers = #tpu.dot_dimension_numbers<[1], [0], [0], [1], [0, 0, 1, 1], [], []>} : vector<256x4xbf16>, vector<4x8xbf16>, vector<256x8xf32> -> vector<256x8xf32>
    %56 = arith.addf %48, %55 : vector<256x8xf32>
    %c0_49 = arith.constant 0 : index
    %c2_50 = arith.constant 2 : index
    %c1_51 = arith.constant 1 : index
    %c0_52 = arith.constant 0 : index
    %57 = vector.load %arg1[%c0_49, %c2_50, %c1_51, %c0_52] : memref<1x18x18x4xf32, #tpu.memory_space<vmem>>, vector<1x16x16x4xf32>
    %58 = vector.shape_cast %57 : vector<1x16x16x4xf32> to vector<16x16x4xf32>
    %59 = vector.shape_cast %58 : vector<16x16x4xf32> to vector<256x4xf32>
    %60 = arith.truncf %59 : vector<256x4xf32> to vector<256x4xbf16>
    %c7 = arith.constant 7 : index
    %c0_53 = arith.constant 0 : index
    %c0_54 = arith.constant 0 : index
    %61 = vector.load %arg2[%c7, %c0_53, %c0_54] : memref<9x4x8xbf16, #tpu.memory_space<vmem>>, vector<1x4x8xbf16>
    %62 = vector.shape_cast %61 : vector<1x4x8xbf16> to vector<4x8xbf16>
    %cst_55 = arith.constant dense<0.000000e+00> : vector<256x8xf32>
    %63 = tpu.matmul %60, %62, %cst_55 {dimension_numbers = #tpu.dot_dimension_numbers<[1], [0], [0], [1], [0, 0, 1, 1], [], []>} : vector<256x4xbf16>, vector<4x8xbf16>, vector<256x8xf32> -> vector<256x8xf32>
    %64 = arith.addf %56, %63 : vector<256x8xf32>
    %c0_56 = arith.constant 0 : index
    %c2_57 = arith.constant 2 : index
    %c2_58 = arith.constant 2 : index
    %c0_59 = arith.constant 0 : index
    %65 = vector.load %arg1[%c0_56, %c2_57, %c2_58, %c0_59] : memref<1x18x18x4xf32, #tpu.memory_space<vmem>>, vector<1x16x16x4xf32>
    %66 = vector.shape_cast %65 : vector<1x16x16x4xf32> to vector<16x16x4xf32>
    %67 = vector.shape_cast %66 : vector<16x16x4xf32> to vector<256x4xf32>
    %68 = arith.truncf %67 : vector<256x4xf32> to vector<256x4xbf16>
    %c8 = arith.constant 8 : index
    %c0_60 = arith.constant 0 : index
    %c0_61 = arith.constant 0 : index
    %69 = vector.load %arg2[%c8, %c0_60, %c0_61] : memref<9x4x8xbf16, #tpu.memory_space<vmem>>, vector<1x4x8xbf16>
    %70 = vector.shape_cast %69 : vector<1x4x8xbf16> to vector<4x8xbf16>
    %cst_62 = arith.constant dense<0.000000e+00> : vector<256x8xf32>
    %71 = tpu.matmul %68, %70, %cst_62 {dimension_numbers = #tpu.dot_dimension_numbers<[1], [0], [0], [1], [0, 0, 1, 1], [], []>} : vector<256x4xbf16>, vector<4x8xbf16>, vector<256x8xf32> -> vector<256x8xf32>
    %72 = arith.addf %64, %71 : vector<256x8xf32>
    %73 = vector.shape_cast %72 : vector<256x8xf32> to vector<16x16x8xf32>
    %c0_63 = arith.constant 0 : index
    %c0_64 = arith.constant 0 : index
    %c0_65 = arith.constant 0 : index
    %c0_66 = arith.constant 0 : index
    %74 = vector.load %arg3[%c0_63, %c0_64, %c0_65, %c0_66] : memref<1x16x16x8xf32, #tpu.memory_space<vmem>>, vector<1x16x16x8xf32>
    %75 = vector.shape_cast %74 : vector<1x16x16x8xf32> to vector<16x16x8xf32>
    %76 = vector.shape_cast %73 : vector<16x16x8xf32> to vector<1x16x16x8xf32>
    tpu.vector_store %arg3[%c0_63, %c0_64, %c0_65, %c0_66], %76 {strides = array<i32>} : memref<1x16x16x8xf32, #tpu.memory_space<vmem>>, vector<1x16x16x8xf32>,
    %cst_67 = arith.constant dense<0.000000e+00> : vector<8xf32>
    %77 = vector.multi_reduction <add>, %72, %cst_67 [0] : vector<256x8xf32> to vector<8xf32>
    %78 = vector.shape_cast %77 : vector<8xf32> to vector<1x8xf32>
    %c0_68 = arith.constant 0 : index
    %c0_69 = arith.constant 0 : index
    %c0_70 = arith.constant 0 : index
    %79 = vector.load %arg4[%c0_68, %c0_69, %c0_70] : memref<1x2x8xf32, #tpu.memory_space<vmem>>, vector<1x1x8xf32>
    %80 = vector.shape_cast %79 : vector<1x1x8xf32> to vector<1x8xf32>
    %81 = vector.shape_cast %78 : vector<1x8xf32> to vector<1x1x8xf32>
    tpu.vector_store %arg4[%c0_68, %c0_69, %c0_70], %81 {strides = array<i32>} : memref<1x2x8xf32, #tpu.memory_space<vmem>>, vector<1x1x8xf32>,
    %82 = arith.mulf %72, %72 : vector<256x8xf32>
    %cst_71 = arith.constant dense<0.000000e+00> : vector<8xf32>
    %83 = vector.multi_reduction <add>, %82, %cst_71 [0] : vector<256x8xf32> to vector<8xf32>
    %84 = vector.shape_cast %83 : vector<8xf32> to vector<1x8xf32>
    %c0_72 = arith.constant 0 : index
    %c1_73 = arith.constant 1 : index
    %c0_74 = arith.constant 0 : index
    %85 = vector.load %arg4[%c0_72, %c1_73, %c0_74] : memref<1x2x8xf32, #tpu.memory_space<vmem>>, vector<1x1x8xf32>
    %86 = vector.shape_cast %85 : vector<1x1x8xf32> to vector<1x8xf32>
    %87 = vector.shape_cast %84 : vector<1x8xf32> to vector<1x1x8xf32>
    tpu.vector_store %arg4[%c0_72, %c1_73, %c0_74], %87 {strides = array<i32>} : memref<1x2x8xf32, #tpu.memory_space<vmem>>, vector<1x1x8xf32>,
    return
  }
  func.func @transform_0(%arg0: i32) -> (i32, i32, i32, i32) {
    %c0_i32 = arith.constant 0 : i32
    %c0_i32_0 = arith.constant 0 : i32
    %c0_i32_1 = arith.constant 0 : i32
    %c0_i32_2 = arith.constant 0 : i32
    return %arg0, %c0_i32, %c0_i32_0, %c0_i32_1 : i32, i32, i32, i32
  }
  func.func @transform_1(%arg0: i32) -> (i32, i32, i32) {
    %c0_i32 = arith.constant 0 : i32
    %c0_i32_0 = arith.constant 0 : i32
    %c0_i32_1 = arith.constant 0 : i32
    %c0_i32_2 = arith.constant 0 : i32
    return %c0_i32, %c0_i32_0, %c0_i32_1 : i32, i32, i32
  }
  func.func @transform_2(%arg0: i32) -> (i32, i32, i32, i32) {
    %c0_i32 = arith.constant 0 : i32
    %c0_i32_0 = arith.constant 0 : i32
    %c0_i32_1 = arith.constant 0 : i32
    %c0_i32_2 = arith.constant 0 : i32
    return %arg0, %c0_i32, %c0_i32_0, %c0_i32_1 : i32, i32, i32, i32
  }
  func.func @transform_3(%arg0: i32) -> (i32, i32, i32) {
    %c0_i32 = arith.constant 0 : i32
    %c0_i32_0 = arith.constant 0 : i32
    %c0_i32_1 = arith.constant 0 : i32
    return %arg0, %c0_i32, %c0_i32_0 : i32, i32, i32
  }
}

module attributes {stable_mosaic.version = 11 : i64} {
  func.func @conv2_stats_kernel(%arg0: i32, %arg1: memref<1x16x16x8xf32, #tpu.memory_space<vmem>>, %arg2: memref<2x8xf32, #tpu.memory_space<vmem>>, %arg3: memref<9x8x8xbf16, #tpu.memory_space<vmem>>, %arg4: memref<1x16x16x8xf32, #tpu.memory_space<vmem>>, %arg5: memref<1x2x8xf32, #tpu.memory_space<vmem>>, %arg6: memref<18x18x8xf32, #tpu.memory_space<vmem>>) attributes {dimension_semantics = [#tpu.dimension_semantics<parallel>], iteration_bounds = array<i64: 2>, scalar_prefetch = 0 : i64, scratch_operands = 1 : i64, tpu.core_type = #tpu.core_type<tc>, window_params = [{transform_indices = @transform_0, window_bounds = array<i64: 1, 16, 16, 8>}, {pipeline_mode = #tpu.pipeline_mode<synchronous>, transform_indices = @transform_1, window_bounds = array<i64: 2, 8>}, {pipeline_mode = #tpu.pipeline_mode<synchronous>, transform_indices = @transform_2, window_bounds = array<i64: 9, 8, 8>}, {transform_indices = @transform_3, window_bounds = array<i64: 1, 16, 16, 8>}, {transform_indices = @transform_4, window_bounds = array<i64: 1, 2, 8>}]} {
    %c0 = arith.constant 0 : index
    %c0_0 = arith.constant 0 : index
    %0 = vector.load %arg2[%c0, %c0_0] : memref<2x8xf32, #tpu.memory_space<vmem>>, vector<1x8xf32>
    %c1 = arith.constant 1 : index
    %c0_1 = arith.constant 0 : index
    %1 = vector.load %arg2[%c1, %c0_1] : memref<2x8xf32, #tpu.memory_space<vmem>>, vector<1x8xf32>
    %c0_2 = arith.constant 0 : index
    %c0_3 = arith.constant 0 : index
    %c0_4 = arith.constant 0 : index
    %c0_5 = arith.constant 0 : index
    %2 = vector.load %arg1[%c0_2, %c0_3, %c0_4, %c0_5] : memref<1x16x16x8xf32, #tpu.memory_space<vmem>>, vector<1x16x16x8xf32>
    %3 = vector.shape_cast %2 : vector<1x16x16x8xf32> to vector<16x16x8xf32>
    %4 = vector.shape_cast %3 : vector<16x16x8xf32> to vector<256x8xf32>
    %5 = vector.broadcast %0 : vector<1x8xf32> to vector<256x8xf32>
    %6 = arith.mulf %4, %5 : vector<256x8xf32>
    %7 = vector.broadcast %1 : vector<1x8xf32> to vector<256x8xf32>
    %8 = arith.addf %6, %7 : vector<256x8xf32>
    %cst = arith.constant 0.000000e+00 : f32
    %9 = vector.broadcast %cst : f32 to vector<256x8xf32>
    %10 = arith.maximumf %8, %9 : vector<256x8xf32>
    %cst_6 = arith.constant 0.000000e+00 : f32
    %11 = vector.broadcast %cst_6 : f32 to vector<1x18x8xf32>
    %c0_7 = arith.constant 0 : index
    %c0_8 = arith.constant 0 : index
    %c0_9 = arith.constant 0 : index
    %12 = vector.load %arg6[%c0_7, %c0_8, %c0_9] : memref<18x18x8xf32, #tpu.memory_space<vmem>>, vector<1x18x8xf32>
    tpu.vector_store %arg6[%c0_7, %c0_8, %c0_9], %11 {strides = array<i32>} : memref<18x18x8xf32, #tpu.memory_space<vmem>>, vector<1x18x8xf32>,
    %cst_10 = arith.constant 0.000000e+00 : f32
    %13 = vector.broadcast %cst_10 : f32 to vector<1x18x8xf32>
    %c17 = arith.constant 17 : index
    %c0_11 = arith.constant 0 : index
    %c0_12 = arith.constant 0 : index
    %14 = vector.load %arg6[%c17, %c0_11, %c0_12] : memref<18x18x8xf32, #tpu.memory_space<vmem>>, vector<1x18x8xf32>
    tpu.vector_store %arg6[%c17, %c0_11, %c0_12], %13 {strides = array<i32>} : memref<18x18x8xf32, #tpu.memory_space<vmem>>, vector<1x18x8xf32>,
    %cst_13 = arith.constant 0.000000e+00 : f32
    %15 = vector.broadcast %cst_13 : f32 to vector<18x1x8xf32>
    %c0_14 = arith.constant 0 : index
    %c0_15 = arith.constant 0 : index
    %c0_16 = arith.constant 0 : index
    %16 = vector.load %arg6[%c0_14, %c0_15, %c0_16] : memref<18x18x8xf32, #tpu.memory_space<vmem>>, vector<18x1x8xf32>
    tpu.vector_store %arg6[%c0_14, %c0_15, %c0_16], %15 {strides = array<i32>} : memref<18x18x8xf32, #tpu.memory_space<vmem>>, vector<18x1x8xf32>,
    %cst_17 = arith.constant 0.000000e+00 : f32
    %17 = vector.broadcast %cst_17 : f32 to vector<18x1x8xf32>
    %c0_18 = arith.constant 0 : index
    %c17_19 = arith.constant 17 : index
    %c0_20 = arith.constant 0 : index
    %18 = vector.load %arg6[%c0_18, %c17_19, %c0_20] : memref<18x18x8xf32, #tpu.memory_space<vmem>>, vector<18x1x8xf32>
    tpu.vector_store %arg6[%c0_18, %c17_19, %c0_20], %17 {strides = array<i32>} : memref<18x18x8xf32, #tpu.memory_space<vmem>>, vector<18x1x8xf32>,
    %19 = vector.shape_cast %10 : vector<256x8xf32> to vector<16x16x8xf32>
    %c1_21 = arith.constant 1 : index
    %c1_22 = arith.constant 1 : index
    %c0_23 = arith.constant 0 : index
    %20 = vector.load %arg6[%c1_21, %c1_22, %c0_23] : memref<18x18x8xf32, #tpu.memory_space<vmem>>, vector<16x16x8xf32>
    tpu.vector_store %arg6[%c1_21, %c1_22, %c0_23], %19 {strides = array<i32>} : memref<18x18x8xf32, #tpu.memory_space<vmem>>, vector<16x16x8xf32>,
    %cst_24 = arith.constant 0.000000e+00 : f32
    %21 = vector.broadcast %cst_24 : f32 to vector<256x8xf32>
    %c0_25 = arith.constant 0 : index
    %c0_26 = arith.constant 0 : index
    %c0_27 = arith.constant 0 : index
    %22 = vector.load %arg6[%c0_25, %c0_26, %c0_27] : memref<18x18x8xf32, #tpu.memory_space<vmem>>, vector<16x16x8xf32>
    %23 = vector.shape_cast %22 : vector<16x16x8xf32> to vector<256x8xf32>
    %24 = arith.truncf %23 : vector<256x8xf32> to vector<256x8xbf16>
    %c0_28 = arith.constant 0 : index
    %c0_29 = arith.constant 0 : index
    %c0_30 = arith.constant 0 : index
    %25 = vector.load %arg3[%c0_28, %c0_29, %c0_30] : memref<9x8x8xbf16, #tpu.memory_space<vmem>>, vector<1x8x8xbf16>
    %26 = vector.shape_cast %25 : vector<1x8x8xbf16> to vector<8x8xbf16>
    %cst_31 = arith.constant dense<0.000000e+00> : vector<256x8xf32>
    %27 = tpu.matmul %24, %26, %cst_31 {dimension_numbers = #tpu.dot_dimension_numbers<[1], [0], [0], [1], [0, 0, 1, 1], [], []>} : vector<256x8xbf16>, vector<8x8xbf16>, vector<256x8xf32> -> vector<256x8xf32>
    %28 = arith.addf %21, %27 : vector<256x8xf32>
    %c0_32 = arith.constant 0 : index
    %c1_33 = arith.constant 1 : index
    %c0_34 = arith.constant 0 : index
    %29 = vector.load %arg6[%c0_32, %c1_33, %c0_34] : memref<18x18x8xf32, #tpu.memory_space<vmem>>, vector<16x16x8xf32>
    %30 = vector.shape_cast %29 : vector<16x16x8xf32> to vector<256x8xf32>
    %31 = arith.truncf %30 : vector<256x8xf32> to vector<256x8xbf16>
    %c1_35 = arith.constant 1 : index
    %c0_36 = arith.constant 0 : index
    %c0_37 = arith.constant 0 : index
    %32 = vector.load %arg3[%c1_35, %c0_36, %c0_37] : memref<9x8x8xbf16, #tpu.memory_space<vmem>>, vector<1x8x8xbf16>
    %33 = vector.shape_cast %32 : vector<1x8x8xbf16> to vector<8x8xbf16>
    %cst_38 = arith.constant dense<0.000000e+00> : vector<256x8xf32>
    %34 = tpu.matmul %31, %33, %cst_38 {dimension_numbers = #tpu.dot_dimension_numbers<[1], [0], [0], [1], [0, 0, 1, 1], [], []>} : vector<256x8xbf16>, vector<8x8xbf16>, vector<256x8xf32> -> vector<256x8xf32>
    %35 = arith.addf %28, %34 : vector<256x8xf32>
    %c0_39 = arith.constant 0 : index
    %c2 = arith.constant 2 : index
    %c0_40 = arith.constant 0 : index
    %36 = vector.load %arg6[%c0_39, %c2, %c0_40] : memref<18x18x8xf32, #tpu.memory_space<vmem>>, vector<16x16x8xf32>
    %37 = vector.shape_cast %36 : vector<16x16x8xf32> to vector<256x8xf32>
    %38 = arith.truncf %37 : vector<256x8xf32> to vector<256x8xbf16>
    %c2_41 = arith.constant 2 : index
    %c0_42 = arith.constant 0 : index
    %c0_43 = arith.constant 0 : index
    %39 = vector.load %arg3[%c2_41, %c0_42, %c0_43] : memref<9x8x8xbf16, #tpu.memory_space<vmem>>, vector<1x8x8xbf16>
    %40 = vector.shape_cast %39 : vector<1x8x8xbf16> to vector<8x8xbf16>
    %cst_44 = arith.constant dense<0.000000e+00> : vector<256x8xf32>
    %41 = tpu.matmul %38, %40, %cst_44 {dimension_numbers = #tpu.dot_dimension_numbers<[1], [0], [0], [1], [0, 0, 1, 1], [], []>} : vector<256x8xbf16>, vector<8x8xbf16>, vector<256x8xf32> -> vector<256x8xf32>
    %42 = arith.addf %35, %41 : vector<256x8xf32>
    %c1_45 = arith.constant 1 : index
    %c0_46 = arith.constant 0 : index
    %c0_47 = arith.constant 0 : index
    %43 = vector.load %arg6[%c1_45, %c0_46, %c0_47] : memref<18x18x8xf32, #tpu.memory_space<vmem>>, vector<16x16x8xf32>
    %44 = vector.shape_cast %43 : vector<16x16x8xf32> to vector<256x8xf32>
    %45 = arith.truncf %44 : vector<256x8xf32> to vector<256x8xbf16>
    %c3 = arith.constant 3 : index
    %c0_48 = arith.constant 0 : index
    %c0_49 = arith.constant 0 : index
    %46 = vector.load %arg3[%c3, %c0_48, %c0_49] : memref<9x8x8xbf16, #tpu.memory_space<vmem>>, vector<1x8x8xbf16>
    %47 = vector.shape_cast %46 : vector<1x8x8xbf16> to vector<8x8xbf16>
    %cst_50 = arith.constant dense<0.000000e+00> : vector<256x8xf32>
    %48 = tpu.matmul %45, %47, %cst_50 {dimension_numbers = #tpu.dot_dimension_numbers<[1], [0], [0], [1], [0, 0, 1, 1], [], []>} : vector<256x8xbf16>, vector<8x8xbf16>, vector<256x8xf32> -> vector<256x8xf32>
    %49 = arith.addf %42, %48 : vector<256x8xf32>
    %c1_51 = arith.constant 1 : index
    %c1_52 = arith.constant 1 : index
    %c0_53 = arith.constant 0 : index
    %50 = vector.load %arg6[%c1_51, %c1_52, %c0_53] : memref<18x18x8xf32, #tpu.memory_space<vmem>>, vector<16x16x8xf32>
    %51 = vector.shape_cast %50 : vector<16x16x8xf32> to vector<256x8xf32>
    %52 = arith.truncf %51 : vector<256x8xf32> to vector<256x8xbf16>
    %c4 = arith.constant 4 : index
    %c0_54 = arith.constant 0 : index
    %c0_55 = arith.constant 0 : index
    %53 = vector.load %arg3[%c4, %c0_54, %c0_55] : memref<9x8x8xbf16, #tpu.memory_space<vmem>>, vector<1x8x8xbf16>
    %54 = vector.shape_cast %53 : vector<1x8x8xbf16> to vector<8x8xbf16>
    %cst_56 = arith.constant dense<0.000000e+00> : vector<256x8xf32>
    %55 = tpu.matmul %52, %54, %cst_56 {dimension_numbers = #tpu.dot_dimension_numbers<[1], [0], [0], [1], [0, 0, 1, 1], [], []>} : vector<256x8xbf16>, vector<8x8xbf16>, vector<256x8xf32> -> vector<256x8xf32>
    %56 = arith.addf %49, %55 : vector<256x8xf32>
    %c1_57 = arith.constant 1 : index
    %c2_58 = arith.constant 2 : index
    %c0_59 = arith.constant 0 : index
    %57 = vector.load %arg6[%c1_57, %c2_58, %c0_59] : memref<18x18x8xf32, #tpu.memory_space<vmem>>, vector<16x16x8xf32>
    %58 = vector.shape_cast %57 : vector<16x16x8xf32> to vector<256x8xf32>
    %59 = arith.truncf %58 : vector<256x8xf32> to vector<256x8xbf16>
    %c5 = arith.constant 5 : index
    %c0_60 = arith.constant 0 : index
    %c0_61 = arith.constant 0 : index
    %60 = vector.load %arg3[%c5, %c0_60, %c0_61] : memref<9x8x8xbf16, #tpu.memory_space<vmem>>, vector<1x8x8xbf16>
    %61 = vector.shape_cast %60 : vector<1x8x8xbf16> to vector<8x8xbf16>
    %cst_62 = arith.constant dense<0.000000e+00> : vector<256x8xf32>
    %62 = tpu.matmul %59, %61, %cst_62 {dimension_numbers = #tpu.dot_dimension_numbers<[1], [0], [0], [1], [0, 0, 1, 1], [], []>} : vector<256x8xbf16>, vector<8x8xbf16>, vector<256x8xf32> -> vector<256x8xf32>
    %63 = arith.addf %56, %62 : vector<256x8xf32>
    %c2_63 = arith.constant 2 : index
    %c0_64 = arith.constant 0 : index
    %c0_65 = arith.constant 0 : index
    %64 = vector.load %arg6[%c2_63, %c0_64, %c0_65] : memref<18x18x8xf32, #tpu.memory_space<vmem>>, vector<16x16x8xf32>
    %65 = vector.shape_cast %64 : vector<16x16x8xf32> to vector<256x8xf32>
    %66 = arith.truncf %65 : vector<256x8xf32> to vector<256x8xbf16>
    %c6 = arith.constant 6 : index
    %c0_66 = arith.constant 0 : index
    %c0_67 = arith.constant 0 : index
    %67 = vector.load %arg3[%c6, %c0_66, %c0_67] : memref<9x8x8xbf16, #tpu.memory_space<vmem>>, vector<1x8x8xbf16>
    %68 = vector.shape_cast %67 : vector<1x8x8xbf16> to vector<8x8xbf16>
    %cst_68 = arith.constant dense<0.000000e+00> : vector<256x8xf32>
    %69 = tpu.matmul %66, %68, %cst_68 {dimension_numbers = #tpu.dot_dimension_numbers<[1], [0], [0], [1], [0, 0, 1, 1], [], []>} : vector<256x8xbf16>, vector<8x8xbf16>, vector<256x8xf32> -> vector<256x8xf32>
    %70 = arith.addf %63, %69 : vector<256x8xf32>
    %c2_69 = arith.constant 2 : index
    %c1_70 = arith.constant 1 : index
    %c0_71 = arith.constant 0 : index
    %71 = vector.load %arg6[%c2_69, %c1_70, %c0_71] : memref<18x18x8xf32, #tpu.memory_space<vmem>>, vector<16x16x8xf32>
    %72 = vector.shape_cast %71 : vector<16x16x8xf32> to vector<256x8xf32>
    %73 = arith.truncf %72 : vector<256x8xf32> to vector<256x8xbf16>
    %c7 = arith.constant 7 : index
    %c0_72 = arith.constant 0 : index
    %c0_73 = arith.constant 0 : index
    %74 = vector.load %arg3[%c7, %c0_72, %c0_73] : memref<9x8x8xbf16, #tpu.memory_space<vmem>>, vector<1x8x8xbf16>
    %75 = vector.shape_cast %74 : vector<1x8x8xbf16> to vector<8x8xbf16>
    %cst_74 = arith.constant dense<0.000000e+00> : vector<256x8xf32>
    %76 = tpu.matmul %73, %75, %cst_74 {dimension_numbers = #tpu.dot_dimension_numbers<[1], [0], [0], [1], [0, 0, 1, 1], [], []>} : vector<256x8xbf16>, vector<8x8xbf16>, vector<256x8xf32> -> vector<256x8xf32>
    %77 = arith.addf %70, %76 : vector<256x8xf32>
    %c2_75 = arith.constant 2 : index
    %c2_76 = arith.constant 2 : index
    %c0_77 = arith.constant 0 : index
    %78 = vector.load %arg6[%c2_75, %c2_76, %c0_77] : memref<18x18x8xf32, #tpu.memory_space<vmem>>, vector<16x16x8xf32>
    %79 = vector.shape_cast %78 : vector<16x16x8xf32> to vector<256x8xf32>
    %80 = arith.truncf %79 : vector<256x8xf32> to vector<256x8xbf16>
    %c8 = arith.constant 8 : index
    %c0_78 = arith.constant 0 : index
    %c0_79 = arith.constant 0 : index
    %81 = vector.load %arg3[%c8, %c0_78, %c0_79] : memref<9x8x8xbf16, #tpu.memory_space<vmem>>, vector<1x8x8xbf16>
    %82 = vector.shape_cast %81 : vector<1x8x8xbf16> to vector<8x8xbf16>
    %cst_80 = arith.constant dense<0.000000e+00> : vector<256x8xf32>
    %83 = tpu.matmul %80, %82, %cst_80 {dimension_numbers = #tpu.dot_dimension_numbers<[1], [0], [0], [1], [0, 0, 1, 1], [], []>} : vector<256x8xbf16>, vector<8x8xbf16>, vector<256x8xf32> -> vector<256x8xf32>
    %84 = arith.addf %77, %83 : vector<256x8xf32>
    %85 = vector.shape_cast %84 : vector<256x8xf32> to vector<16x16x8xf32>
    %c0_81 = arith.constant 0 : index
    %c0_82 = arith.constant 0 : index
    %c0_83 = arith.constant 0 : index
    %c0_84 = arith.constant 0 : index
    %86 = vector.load %arg4[%c0_81, %c0_82, %c0_83, %c0_84] : memref<1x16x16x8xf32, #tpu.memory_space<vmem>>, vector<1x16x16x8xf32>
    %87 = vector.shape_cast %86 : vector<1x16x16x8xf32> to vector<16x16x8xf32>
    %88 = vector.shape_cast %85 : vector<16x16x8xf32> to vector<1x16x16x8xf32>
    tpu.vector_store %arg4[%c0_81, %c0_82, %c0_83, %c0_84], %88 {strides = array<i32>} : memref<1x16x16x8xf32, #tpu.memory_space<vmem>>, vector<1x16x16x8xf32>,
    %cst_85 = arith.constant dense<0.000000e+00> : vector<8xf32>
    %89 = vector.multi_reduction <add>, %84, %cst_85 [0] : vector<256x8xf32> to vector<8xf32>
    %90 = vector.shape_cast %89 : vector<8xf32> to vector<1x8xf32>
    %c0_86 = arith.constant 0 : index
    %c0_87 = arith.constant 0 : index
    %c0_88 = arith.constant 0 : index
    %91 = vector.load %arg5[%c0_86, %c0_87, %c0_88] : memref<1x2x8xf32, #tpu.memory_space<vmem>>, vector<1x1x8xf32>
    %92 = vector.shape_cast %91 : vector<1x1x8xf32> to vector<1x8xf32>
    %93 = vector.shape_cast %90 : vector<1x8xf32> to vector<1x1x8xf32>
    tpu.vector_store %arg5[%c0_86, %c0_87, %c0_88], %93 {strides = array<i32>} : memref<1x2x8xf32, #tpu.memory_space<vmem>>, vector<1x1x8xf32>,
    %94 = arith.mulf %84, %84 : vector<256x8xf32>
    %cst_89 = arith.constant dense<0.000000e+00> : vector<8xf32>
    %95 = vector.multi_reduction <add>, %94, %cst_89 [0] : vector<256x8xf32> to vector<8xf32>
    %96 = vector.shape_cast %95 : vector<8xf32> to vector<1x8xf32>
    %c0_90 = arith.constant 0 : index
    %c1_91 = arith.constant 1 : index
    %c0_92 = arith.constant 0 : index
    %97 = vector.load %arg5[%c0_90, %c1_91, %c0_92] : memref<1x2x8xf32, #tpu.memory_space<vmem>>, vector<1x1x8xf32>
    %98 = vector.shape_cast %97 : vector<1x1x8xf32> to vector<1x8xf32>
    %99 = vector.shape_cast %96 : vector<1x8xf32> to vector<1x1x8xf32>
    tpu.vector_store %arg5[%c0_90, %c1_91, %c0_92], %99 {strides = array<i32>} : memref<1x2x8xf32, #tpu.memory_space<vmem>>, vector<1x1x8xf32>,
    return
  }
  func.func @transform_0(%arg0: i32) -> (i32, i32, i32, i32) {
    %c0_i32 = arith.constant 0 : i32
    %c0_i32_0 = arith.constant 0 : i32
    %c0_i32_1 = arith.constant 0 : i32
    %c0_i32_2 = arith.constant 0 : i32
    return %arg0, %c0_i32, %c0_i32_0, %c0_i32_1 : i32, i32, i32, i32
  }
  func.func @transform_1(%arg0: i32) -> (i32, i32) {
    %c0_i32 = arith.constant 0 : i32
    %c0_i32_0 = arith.constant 0 : i32
    %c0_i32_1 = arith.constant 0 : i32
    return %c0_i32, %c0_i32_0 : i32, i32
  }
  func.func @transform_2(%arg0: i32) -> (i32, i32, i32) {
    %c0_i32 = arith.constant 0 : i32
    %c0_i32_0 = arith.constant 0 : i32
    %c0_i32_1 = arith.constant 0 : i32
    %c0_i32_2 = arith.constant 0 : i32
    return %c0_i32, %c0_i32_0, %c0_i32_1 : i32, i32, i32
  }
  func.func @transform_3(%arg0: i32) -> (i32, i32, i32, i32) {
    %c0_i32 = arith.constant 0 : i32
    %c0_i32_0 = arith.constant 0 : i32
    %c0_i32_1 = arith.constant 0 : i32
    %c0_i32_2 = arith.constant 0 : i32
    return %arg0, %c0_i32, %c0_i32_0, %c0_i32_1 : i32, i32, i32, i32
  }
  func.func @transform_4(%arg0: i32) -> (i32, i32, i32) {
    %c0_i32 = arith.constant 0 : i32
    %c0_i32_0 = arith.constant 0 : i32
    %c0_i32_1 = arith.constant 0 : i32
    return %arg0, %c0_i32, %c0_i32_0 : i32, i32, i32
  }
}

module attributes {stable_mosaic.version = 11 : i64} {
  func.func @bn_add_relu_pool_kernel(%arg0: i32, %arg1: memref<1x16x16x8xf32, #tpu.memory_space<vmem>>, %arg2: memref<1x16x16x8xf32, #tpu.memory_space<vmem>>, %arg3: memref<4x8xf32, #tpu.memory_space<vmem>>, %arg4: memref<1x16x16x8xf32, #tpu.memory_space<vmem>>, %arg5: memref<1x8x8x8xf32, #tpu.memory_space<vmem>>) attributes {dimension_semantics = [#tpu.dimension_semantics<parallel>], iteration_bounds = array<i64: 2>, scalar_prefetch = 0 : i64, scratch_operands = 0 : i64, tpu.core_type = #tpu.core_type<tc>, window_params = [{transform_indices = @transform_0, window_bounds = array<i64: 1, 16, 16, 8>}, {transform_indices = @transform_1, window_bounds = array<i64: 1, 16, 16, 8>}, {pipeline_mode = #tpu.pipeline_mode<synchronous>, transform_indices = @transform_2, window_bounds = array<i64: 4, 8>}, {transform_indices = @transform_3, window_bounds = array<i64: 1, 16, 16, 8>}, {transform_indices = @transform_4, window_bounds = array<i64: 1, 8, 8, 8>}]} {
    %c0 = arith.constant 0 : index
    %c0_0 = arith.constant 0 : index
    %0 = vector.load %arg3[%c0, %c0_0] : memref<4x8xf32, #tpu.memory_space<vmem>>, vector<1x8xf32>
    %c1 = arith.constant 1 : index
    %c0_1 = arith.constant 0 : index
    %1 = vector.load %arg3[%c1, %c0_1] : memref<4x8xf32, #tpu.memory_space<vmem>>, vector<1x8xf32>
    %c2 = arith.constant 2 : index
    %c0_2 = arith.constant 0 : index
    %2 = vector.load %arg3[%c2, %c0_2] : memref<4x8xf32, #tpu.memory_space<vmem>>, vector<1x8xf32>
    %c3 = arith.constant 3 : index
    %c0_3 = arith.constant 0 : index
    %3 = vector.load %arg3[%c3, %c0_3] : memref<4x8xf32, #tpu.memory_space<vmem>>, vector<1x8xf32>
    %c0_4 = arith.constant 0 : index
    %c0_5 = arith.constant 0 : index
    %c0_6 = arith.constant 0 : index
    %c0_7 = arith.constant 0 : index
    %4 = vector.load %arg1[%c0_4, %c0_5, %c0_6, %c0_7] : memref<1x16x16x8xf32, #tpu.memory_space<vmem>>, vector<1x16x16x8xf32>
    %5 = vector.shape_cast %4 : vector<1x16x16x8xf32> to vector<16x16x8xf32>
    %6 = vector.shape_cast %5 : vector<16x16x8xf32> to vector<256x8xf32>
    %c0_8 = arith.constant 0 : index
    %c0_9 = arith.constant 0 : index
    %c0_10 = arith.constant 0 : index
    %c0_11 = arith.constant 0 : index
    %7 = vector.load %arg2[%c0_8, %c0_9, %c0_10, %c0_11] : memref<1x16x16x8xf32, #tpu.memory_space<vmem>>, vector<1x16x16x8xf32>
    %8 = vector.shape_cast %7 : vector<1x16x16x8xf32> to vector<16x16x8xf32>
    %9 = vector.shape_cast %8 : vector<16x16x8xf32> to vector<256x8xf32>
    %10 = vector.broadcast %0 : vector<1x8xf32> to vector<256x8xf32>
    %11 = arith.mulf %6, %10 : vector<256x8xf32>
    %12 = vector.broadcast %1 : vector<1x8xf32> to vector<256x8xf32>
    %13 = arith.addf %11, %12 : vector<256x8xf32>
    %cst = arith.constant 0.000000e+00 : f32
    %14 = vector.broadcast %cst : f32 to vector<256x8xf32>
    %15 = arith.maximumf %13, %14 : vector<256x8xf32>
    %16 = vector.broadcast %2 : vector<1x8xf32> to vector<256x8xf32>
    %17 = arith.mulf %9, %16 : vector<256x8xf32>
    %18 = vector.broadcast %3 : vector<1x8xf32> to vector<256x8xf32>
    %19 = arith.addf %17, %18 : vector<256x8xf32>
    %20 = arith.addf %19, %15 : vector<256x8xf32>
    %cst_12 = arith.constant 0.000000e+00 : f32
    %21 = vector.broadcast %cst_12 : f32 to vector<256x8xf32>
    %22 = arith.maximumf %20, %21 : vector<256x8xf32>
    %23 = vector.shape_cast %22 : vector<256x8xf32> to vector<16x16x8xf32>
    %c0_13 = arith.constant 0 : index
    %c0_14 = arith.constant 0 : index
    %c0_15 = arith.constant 0 : index
    %c0_16 = arith.constant 0 : index
    %24 = vector.load %arg4[%c0_13, %c0_14, %c0_15, %c0_16] : memref<1x16x16x8xf32, #tpu.memory_space<vmem>>, vector<1x16x16x8xf32>
    %25 = vector.shape_cast %24 : vector<1x16x16x8xf32> to vector<16x16x8xf32>
    %26 = vector.shape_cast %23 : vector<16x16x8xf32> to vector<1x16x16x8xf32>
    tpu.vector_store %arg4[%c0_13, %c0_14, %c0_15, %c0_16], %26 {strides = array<i32>} : memref<1x16x16x8xf32, #tpu.memory_space<vmem>>, vector<1x16x16x8xf32>,
    %c0_17 = arith.constant 0 : index
    %c0_18 = arith.constant 0 : index
    %c0_19 = arith.constant 0 : index
    %c0_20 = arith.constant 0 : index
    %27 = tpu.strided_load %arg4[%c0_17, %c0_18, %c0_19, %c0_20] {strides = array<i32: 1, 1, 2, 1>} : memref<1x16x16x8xf32, #tpu.memory_space<vmem>>, vector<1x16x8x8xf32>
    %28 = vector.shape_cast %27 : vector<1x16x8x8xf32> to vector<16x8x8xf32>
    %c0_21 = arith.constant 0 : index
    %c0_22 = arith.constant 0 : index
    %c1_23 = arith.constant 1 : index
    %c0_24 = arith.constant 0 : index
    %29 = tpu.strided_load %arg4[%c0_21, %c0_22, %c1_23, %c0_24] {strides = array<i32: 1, 1, 2, 1>} : memref<1x16x16x8xf32, #tpu.memory_space<vmem>>, vector<1x16x8x8xf32>
    %30 = vector.shape_cast %29 : vector<1x16x8x8xf32> to vector<16x8x8xf32>
    %31 = arith.maximumf %28, %30 : vector<16x8x8xf32>
    %32 = vector.shape_cast %31 : vector<16x8x8xf32> to vector<8x2x8x8xf32>
    %33 = vector.extract_strided_slice %32 {offsets = [0, 0, 0, 0], sizes = [8, 1, 8, 8], strides = [1, 1, 1, 1]} : vector<8x2x8x8xf32> to vector<8x1x8x8xf32>
    %34 = vector.shape_cast %33 : vector<8x1x8x8xf32> to vector<8x8x8xf32>
    %35 = vector.extract_strided_slice %32 {offsets = [0, 1, 0, 0], sizes = [8, 1, 8, 8], strides = [1, 1, 1, 1]} : vector<8x2x8x8xf32> to vector<8x1x8x8xf32>
    %36 = vector.shape_cast %35 : vector<8x1x8x8xf32> to vector<8x8x8xf32>
    %37 = arith.maximumf %34, %36 : vector<8x8x8xf32>
    %c0_25 = arith.constant 0 : index
    %c0_26 = arith.constant 0 : index
    %c0_27 = arith.constant 0 : index
    %c0_28 = arith.constant 0 : index
    %38 = vector.load %arg5[%c0_25, %c0_26, %c0_27, %c0_28] : memref<1x8x8x8xf32, #tpu.memory_space<vmem>>, vector<1x8x8x8xf32>
    %39 = vector.shape_cast %38 : vector<1x8x8x8xf32> to vector<8x8x8xf32>
    %40 = vector.shape_cast %37 : vector<8x8x8xf32> to vector<1x8x8x8xf32>
    tpu.vector_store %arg5[%c0_25, %c0_26, %c0_27, %c0_28], %40 {strides = array<i32>} : memref<1x8x8x8xf32, #tpu.memory_space<vmem>>, vector<1x8x8x8xf32>,
    return
  }
  func.func @transform_0(%arg0: i32) -> (i32, i32, i32, i32) {
    %c0_i32 = arith.constant 0 : i32
    %c0_i32_0 = arith.constant 0 : i32
    %c0_i32_1 = arith.constant 0 : i32
    %c0_i32_2 = arith.constant 0 : i32
    return %arg0, %c0_i32, %c0_i32_0, %c0_i32_1 : i32, i32, i32, i32
  }
  func.func @transform_1(%arg0: i32) -> (i32, i32, i32, i32) {
    %c0_i32 = arith.constant 0 : i32
    %c0_i32_0 = arith.constant 0 : i32
    %c0_i32_1 = arith.constant 0 : i32
    %c0_i32_2 = arith.constant 0 : i32
    return %arg0, %c0_i32, %c0_i32_0, %c0_i32_1 : i32, i32, i32, i32
  }
  func.func @transform_2(%arg0: i32) -> (i32, i32) {
    %c0_i32 = arith.constant 0 : i32
    %c0_i32_0 = arith.constant 0 : i32
    %c0_i32_1 = arith.constant 0 : i32
    return %c0_i32, %c0_i32_0 : i32, i32
  }
  func.func @transform_3(%arg0: i32) -> (i32, i32, i32, i32) {
    %c0_i32 = arith.constant 0 : i32
    %c0_i32_0 = arith.constant 0 : i32
    %c0_i32_1 = arith.constant 0 : i32
    %c0_i32_2 = arith.constant 0 : i32
    return %arg0, %c0_i32, %c0_i32_0, %c0_i32_1 : i32, i32, i32, i32
  }
  func.func @transform_4(%arg0: i32) -> (i32, i32, i32, i32) {
    %c0_i32 = arith.constant 0 : i32
    %c0_i32_0 = arith.constant 0 : i32
    %c0_i32_1 = arith.constant 0 : i32
    %c0_i32_2 = arith.constant 0 : i32
    return %arg0, %c0_i32, %c0_i32_0, %c0_i32_1 : i32, i32, i32, i32
  }
}

</mosaic_0001>

<bundles_post_ra>
// kernel: down_sample_forward.5
= control target key start
LH: loop header
LB: loop body
LE: loop exit
PB: predicated region body
PF: predicated region fallthrough
CT: control target
= control target key end

     0   :  { %s862_s15 = smov 0   ;;  %s1228_s0 = inlined_call_operand.vmem [shape: f32[2,16,16,8], index: 0, kind: input, shape index: {}]   ;;  %s1229_s1 = inlined_call_operand.vmem [shape: f32[2,16,16,8], index: 1, kind: input, shape index: {}]   ;;  %s1230_s2 = inlined_call_operand.vmem [shape: f32[4,8], index: 2, kind: input, shape index: {}]   ;;  %s1231_s3 = inlined_call_operand.vmem [shape: f32[2,16,16,8], index: 3, kind: output, shape index: {0}]   ;;  %s1232_s4 = inlined_call_operand.vmem [shape: f32[2,8,8,8], index: 4, kind: output, shape index: {1}]  }
   0x1 LB: > { %s767_s16 = sadd.s32 4294967295, %s835_s15   ;;  %p771_p0 = scmp.ge.s32.totalorder %s835_s15, 1  ;;  %s835_s15 = sphi %s862_s15, %s15_s15  }
   0x2   : > { %p175_p1 = scmp.lt.s32.totalorder %s835_s15, 3 }
   0x4   : > { %p176_p2 = pnand %p771_p0, %p175_p1 }
   0x5   : > { %p211_p3 = scmp.lt.s32.totalorder (!%p176_p2), %s767_s16, 1  ;;  %v878_v0 = vld [vmem:[%s1230_s2] ss:$0 sm:$0xff] (!%p176_p2)  ;;  %v883_v1 = vld [vmem:[%s1230_s2 + $0x2] ss:$0 sm:$0xff] (!%p176_p2)  ;;  %vm539_vm0 = vcmask (!%p176_p2), 64512  }
   0x6   : > { %179 = sbr.rel (%p176_p2) target bundleno = 92 (0x5c), region = 32  ;;  %v900_v2 = vld [vmem:[%s1230_s2 + $0x1] ss:$0 sm:$0xff] (!%p176_p2)  ;;  %v905_v3 = vld [vmem:[%s1230_s2 + $0x3] ss:$0 sm:$0xff] (!%p176_p2) }
   0xd   : > { %s1234_s16 = smov (!%p211_p3, %s767_s16), 1 }
   0xe   : > { %s873_s17 = sshll.u32 %s1234_s16, 8  ;;  %s820_s9 = sshll.u32 %s1234_s16, 6 }
   0xf   : > { %s889_s24 = scalar_lea.vmem %s1228_s0, %s873_s17  ;;  %s895_s27 = scalar_lea.vmem %s1229_s1, %s873_s17 }
  0x10   : > { %v235_v4 = vld [vmem:[%s889_s24] sm:$0xff]  ;;  %v236_v6 = vld [vmem:[%s889_s24 + $0x8] sm:$0xff]  ;;  %v237_v11 = vld [vmem:[%s889_s24 + $0x10] sm:$0xff]  ;;  %s944_s8 = scalar_lea.vmem %s1231_s3, %s873_s17  ;;  %s1187_s12 = scalar_lea.vmem %s1232_s4, %s820_s9 }
  0x11   : > { %v267_v5 = vld [vmem:[%s895_s27] sm:$0xff]  ;;  %v303_v7 = vmul.f32 %v878_v0, %v235_v4  ;;  %v268_v9 = vld [vmem:[%s895_s27 + $0x8] sm:$0xff]  ;;  %v304_v10 = vmul.f32 %v878_v0, %v236_v6  ;;  %v269_v12 = vld [vmem:[%s895_s27 + $0x10] sm:$0xff]  ;;  %v305_v14 = vmul.f32 %v878_v0, %v237_v11 }
  0x12   : > { %v407_v8 = vmul.f32 %v883_v1, %v267_v5  ;;  %v408_v13 = vmul.f32 %v883_v1, %v268_v9  ;;  %v409_v15 = vmul.f32 %v883_v1, %v269_v12  ;;  %v238_v16 = vld [vmem:[%s889_s24 + $0x18] sm:$0xff]  ;;  %v239_v18 = vld [vmem:[%s889_s24 + $0x20] sm:$0xff]  ;;  %v240_v24 = vld [vmem:[%s889_s24 + $0x28] sm:$0xff] }
  0x13   : > { %v270_v17 = vld [vmem:[%s895_s27 + $0x18] sm:$0xff]  ;;  %v339_v19 = vadd.f32 %v900_v2, %v303_v7  ;;  %v340_v21 = vadd.f32 %v900_v2, %v304_v10  ;;  %v306_v22 = vmul.f32 %v878_v0, %v238_v16  ;;  %v271_v23 = vld [vmem:[%s895_s27 + $0x20] sm:$0xff]  ;;  %v341_v26 = vadd.f32 %v900_v2, %v305_v14  ;;  %v272_v33 = vld [vmem:[%s895_s27 + $0x28] sm:$0xff] }
  0x14   : > { %v443_v20 = vadd.f32 %v905_v3, %v407_v8  ;;  %v444_v25 = vadd.f32 %v905_v3, %v408_v13  ;;  %v445_v27 = vadd.f32 %v905_v3, %v409_v15  ;;  %v410_v28 = vmul.f32 %v883_v1, %v270_v17  ;;  %v241_v42 = vld [vmem:[%s889_s24 + $0x30] sm:$0xff]  ;;  %v242_v48 = vld [vmem:[%s889_s24 + $0x38] sm:$0xff]  ;;  %v243_v54 = vld [vmem:[%s889_s24 + $0x40] sm:$0xff] }
  0x15   : > { %v371_v29 = vmax.f32 %v339_v19, 0.0  ;;  %v372_v30 = vmax.f32 %v340_v21, 0.0  ;;  %v342_v31 = vadd.f32 %v900_v2, %v306_v22  ;;  %v307_v32 = vmul.f32 %v878_v0, %v239_v18  ;;  %v273_v47 = vld [vmem:[%s895_s27 + $0x30] sm:$0xff]  ;;  %v274_v53 = vld [vmem:[%s895_s27 + $0x38] sm:$0xff]  ;;  %v275_v59 = vld [vmem:[%s895_s27 + $0x40] sm:$0xff] }
  0x16   : > { %v373_v34 = vmax.f32 %v341_v26, 0.0  ;;  %v446_v35 = vadd.f32 %v905_v3, %v410_v28  ;;  %v411_v36 = vmul.f32 %v883_v1, %v271_v23  ;;  %v308_v37 = vmul.f32 %v878_v0, %v240_v24  ;;  %v244_v8 = vld [vmem:[%s889_s24 + $0x48] sm:$0xff]  ;;  %v245_v14 = vld [vmem:[%s889_s24 + $0x50] sm:$0xff] }
  0x17   : > { %v475_v38 = vadd.f32 %v443_v20, %v371_v29  ;;  %v476_v39 = vadd.f32 %v444_v25, %v372_v30  ;;  %v374_v40 = vmax.f32 %v342_v31, 0.0  ;;  %v343_v41 = vadd.f32 %v900_v2, %v307_v32  ;;  %v276_v9 = vld [vmem:[%s895_s27 + $0x48] sm:$0xff]  ;;  %v277_v15 = vld [vmem:[%s895_s27 + $0x50] sm:$0xff]  ;;  %v246_v20 = vld [vmem:[%s889_s24 + $0x58] sm:$0xff] }
  0x18   : > { %v477_v43 = vadd.f32 %v445_v27, %v373_v34  ;;  %v447_v44 = vadd.f32 %v905_v3, %v411_v36  ;;  %v344_v45 = vadd.f32 %v900_v2, %v308_v37  ;;  %v412_v46 = vmul.f32 %v883_v1, %v272_v33  ;;  %v278_v29 = vld [vmem:[%s895_s27 + $0x58] sm:$0xff]  ;;  %v247_v34 = vld [vmem:[%s889_s24 + $0x60] sm:$0xff] }
  0x19   : > { %v507_v49 = vmax.f32 %v475_v38, 0.0  ;;  %v508_v50 = vmax.f32 %v476_v39, 0.0  ;;  %v478_v51 = vadd.f32 %v446_v35, %v374_v40  ;;  %v375_v52 = vmax.f32 %v343_v41, 0.0  ;;  %v279_v35 = vld [vmem:[%s895_s27 + $0x60] sm:$0xff]  ;;  %v248_v40 = vld [vmem:[%s889_s24 + $0x68] sm:$0xff] }
  0x1a   : > { %v509_v55 = vmax.f32 %v477_v43, 0.0  ;;  %v376_v56 = vmax.f32 %v344_v45, 0.0  ;;  %v448_v57 = vadd.f32 %v905_v3, %v412_v46  ;;  %v309_v58 = vmul.f32 %v878_v0, %v241_v42  ;;  %v280_v45 = vld [vmem:[%s895_s27 + $0x68] sm:$0xff] }
  0x1b   : > { %540 = vst.msk [vmem:[%s944_s8] sm:$0xff] %vm539_vm0, %v507_v49  ;;  %541 = vst.msk [vmem:[%s944_s8 + $0x8] sm:$0xff] %vm539_vm0, %v508_v50  ;;  %v510_v60 = vmax.f32 %v478_v51, 0.0  ;;  %v479_v61 = vadd.f32 %v447_v44, %v375_v52  ;;  %v413_v62 = vmul.f32 %v883_v1, %v273_v47  ;;  %v310_v63 = vmul.f32 %v878_v0, %v242_v48  ;;  %v249_v50 = vld [vmem:[%s889_s24 + $0x70] sm:$0xff] }
  0x1c   : > { %542 = vst.msk [vmem:[%s944_s8 + $0x10] sm:$0xff] %vm539_vm0, %v509_v55  ;;  %v480_v4 = vadd.f32 %v448_v57, %v376_v56  ;;  %v345_v5 = vadd.f32 %v900_v2, %v309_v58  ;;  %v414_v6 = vmul.f32 %v883_v1, %v274_v53  ;;  %v311_v7 = vmul.f32 %v878_v0, %v243_v54  ;;  %v281_v55 = vld [vmem:[%s895_s27 + $0x70] sm:$0xff] }
  0x1d   : > { %543 = vst.msk [vmem:[%s944_s8 + $0x18] sm:$0xff] %vm539_vm0, %v510_v60  ;;  %v511_v10 = vmax.f32 %v479_v61, 0.0  ;;  %v449_v11 = vadd.f32 %v905_v3, %v413_v62  ;;  %v346_v12 = vadd.f32 %v900_v2, %v310_v63  ;;  %v415_v13 = vmul.f32 %v883_v1, %v275_v59  ;;  %v250_v60 = vld [vmem:[%s889_s24 + $0x78] sm:$0xff] }
  0x1e   : > { %v512_v16 = vmax.f32 %v480_v4, 0.0  ;;  %v377_v17 = vmax.f32 %v345_v5, 0.0  ;;  %v450_v18 = vadd.f32 %v905_v3, %v414_v6  ;;  %v347_v19 = vadd.f32 %v900_v2, %v311_v7  ;;  %v282_v5 = vld [vmem:[%s895_s27 + $0x78] sm:$0xff]  ;;  %v251_v6 = vld [vmem:[%s889_s24 + $0x80] sm:$0xff] }
  0x1f   : > { %544 = vst.msk [vmem:[%s944_s8 + $0x20] sm:$0xff] %vm539_vm0, %v511_v10  ;;  %v378_v21 = vmax.f32 %v346_v12, 0.0  ;;  %v451_v22 = vadd.f32 %v905_v3, %v415_v13  ;;  %v312_v23 = vmul.f32 %v878_v0, %v244_v8  ;;  %v416_v24 = vmul.f32 %v883_v1, %v276_v9 }
  0x20   : > { %545 = vst.msk [vmem:[%s944_s8 + $0x28] sm:$0xff] %vm539_vm0, %v512_v16  ;;  %v481_v25 = vadd.f32 %v449_v11, %v377_v17  ;;  %v379_v26 = vmax.f32 %v347_v19, 0.0  ;;  %v313_v27 = vmul.f32 %v878_v0, %v245_v14  ;;  %v417_v28 = vmul.f32 %v883_v1, %v277_v15  ;;  %v283_v11 = vld [vmem:[%s895_s27 + $0x80] sm:$0xff]  ;;  %v252_v16 = vld [vmem:[%s889_s24 + $0x88] sm:$0xff] }
  0x21   : > { %v482_v30 = vadd.f32 %v450_v18, %v378_v21  ;;  %v348_v31 = vadd.f32 %v900_v2, %v312_v23  ;;  %v452_v32 = vadd.f32 %v905_v3, %v416_v24  ;;  %v314_v33 = vmul.f32 %v878_v0, %v246_v20 }
  0x22   : > { %v513_v36 = vmax.f32 %v481_v25, 0.0  ;;  %v483_v37 = vadd.f32 %v451_v22, %v379_v26  ;;  %v349_v38 = vadd.f32 %v900_v2, %v313_v27  ;;  %v453_v39 = vadd.f32 %v905_v3, %v417_v28  ;;  %v284_v25 = vld [vmem:[%s895_s27 + $0x88] sm:$0xff]  ;;  %v253_v26 = vld [vmem:[%s889_s24 + $0x90] sm:$0xff] }
  0x23   : > { %v514_v41 = vmax.f32 %v482_v30, 0.0  ;;  %v380_v42 = vmax.f32 %v348_v31, 0.0  ;;  %v350_v43 = vadd.f32 %v900_v2, %v314_v33  ;;  %v418_v44 = vmul.f32 %v883_v1, %v278_v29  ;;  %v285_v31 = vld [vmem:[%s895_s27 + $0x90] sm:$0xff] }
  0x24   : > { %546 = vst.msk [vmem:[%s944_s8 + $0x30] sm:$0xff] %vm539_vm0, %v513_v36  ;;  %v515_v46 = vmax.f32 %v483_v37, 0.0  ;;  %v381_v47 = vmax.f32 %v349_v38, 0.0  ;;  %v315_v48 = vmul.f32 %v878_v0, %v247_v34  ;;  %v419_v49 = vmul.f32 %v883_v1, %v279_v35 }
  0x25   : > { %547 = vst.msk [vmem:[%s944_s8 + $0x38] sm:$0xff] %vm539_vm0, %v514_v41  ;;  %v484_v51 = vadd.f32 %v452_v32, %v380_v42  ;;  %v382_v52 = vmax.f32 %v350_v43, 0.0  ;;  %v454_v53 = vadd.f32 %v905_v3, %v418_v44  ;;  %v316_v54 = vmul.f32 %v878_v0, %v248_v40  ;;  %v254_v32 = vld [vmem:[%s889_s24 + $0x98] sm:$0xff] }
  0x26   : > { %548 = vst.msk [vmem:[%s944_s8 + $0x40] sm:$0xff] %vm539_vm0, %v515_v46  ;;  %v485_v56 = vadd.f32 %v453_v39, %v381_v47  ;;  %v351_v57 = vadd.f32 %v900_v2, %v315_v48  ;;  %v455_v58 = vadd.f32 %v905_v3, %v419_v49  ;;  %v420_v59 = vmul.f32 %v883_v1, %v280_v45  ;;  %v286_v41 = vld [vmem:[%s895_s27 + $0x98] sm:$0xff]  ;;  %v255_v46 = vld [vmem:[%s889_s24 + $0xa0] sm:$0xff] }
  0x27   : > { %v516_v61 = vmax.f32 %v484_v51, 0.0  ;;  %v486_v62 = vadd.f32 %v454_v53, %v382_v52  ;;  %v352_v63 = vadd.f32 %v900_v2, %v316_v54  ;;  %v317_v4 = vmul.f32 %v878_v0, %v249_v50  ;;  %v287_v51 = vld [vmem:[%s895_s27 + $0xa0] sm:$0xff]  ;;  %v256_v52 = vld [vmem:[%s889_s24 + $0xa8] sm:$0xff] }
  0x28   : > { %v517_v7 = vmax.f32 %v485_v56, 0.0  ;;  %v383_v8 = vmax.f32 %v351_v57, 0.0  ;;  %v456_v9 = vadd.f32 %v905_v3, %v420_v59  ;;  %v421_v10 = vmul.f32 %v883_v1, %v281_v55  ;;  %v288_v57 = vld [vmem:[%s895_s27 + $0xa8] sm:$0xff] }
  0x29   : > { %549 = vst.msk [vmem:[%s944_s8 + $0x48] sm:$0xff] %vm539_vm0, %v516_v61  ;;  %v518_v12 = vmax.f32 %v486_v62, 0.0  ;;  %v384_v13 = vmax.f32 %v352_v63, 0.0  ;;  %v353_v14 = vadd.f32 %v900_v2, %v317_v4  ;;  %v318_v15 = vmul.f32 %v878_v0, %v250_v60  ;;  %v257_v62 = vld [vmem:[%s889_s24 + $0xb0] sm:$0xff] }
  0x2a   : > { %550 = vst.msk [vmem:[%s944_s8 + $0x50] sm:$0xff] %vm539_vm0, %v517_v7  ;;  %v487_v17 = vadd.f32 %v455_v58, %v383_v8  ;;  %v457_v18 = vadd.f32 %v905_v3, %v421_v10  ;;  %v422_v19 = vmul.f32 %v883_v1, %v282_v5  ;;  %v319_v20 = vmul.f32 %v878_v0, %v251_v6  ;;  %v289_v7 = vld [vmem:[%s895_s27 + $0xb0] sm:$0xff] }
  0x2b   : > { %551 = vst.msk [vmem:[%s944_s8 + $0x58] sm:$0xff] %vm539_vm0, %v518_v12  ;;  %v488_v21 = vadd.f32 %v456_v9, %v384_v13  ;;  %v385_v22 = vmax.f32 %v353_v14, 0.0  ;;  %v354_v23 = vadd.f32 %v900_v2, %v318_v15  ;;  %v423_v24 = vmul.f32 %v883_v1, %v283_v11  ;;  %v258_v12 = vld [vmem:[%s889_s24 + $0xb8] sm:$0xff] }
  0x2c   : > { %v519_v27 = vmax.f32 %v487_v17, 0.0  ;;  %v458_v28 = vadd.f32 %v905_v3, %v422_v19  ;;  %v355_v29 = vadd.f32 %v900_v2, %v319_v20  ;;  %v320_v30 = vmul.f32 %v878_v0, %v252_v16  ;;  %v290_v17 = vld [vmem:[%s895_s27 + $0xb8] sm:$0xff] }
  0x2d   : > { %v520_v33 = vmax.f32 %v488_v21, 0.0  ;;  %v489_v34 = vadd.f32 %v457_v18, %v385_v22  ;;  %v386_v35 = vmax.f32 %v354_v23, 0.0  ;;  %v459_v36 = vadd.f32 %v905_v3, %v423_v24  ;;  %v259_v18 = vld [vmem:[%s889_s24 + $0xc0] sm:$0xff] }
  0x2e   : > { %552 = vst.msk [vmem:[%s944_s8 + $0x60] sm:$0xff] %vm539_vm0, %v519_v27  ;;  %v387_v37 = vmax.f32 %v355_v29, 0.0  ;;  %v356_v38 = vadd.f32 %v900_v2, %v320_v30  ;;  %v424_v39 = vmul.f32 %v883_v1, %v284_v25  ;;  %v321_v40 = vmul.f32 %v878_v0, %v253_v26  ;;  %v291_v23 = vld [vmem:[%s895_s27 + $0xc0] sm:$0xff] }
  0x2f   : > { %553 = vst.msk [vmem:[%s944_s8 + $0x68] sm:$0xff] %vm539_vm0, %v520_v33  ;;  %v521_v42 = vmax.f32 %v489_v34, 0.0  ;;  %v490_v43 = vadd.f32 %v458_v28, %v386_v35  ;;  %v425_v44 = vmul.f32 %v883_v1, %v285_v31  ;;  %v322_v45 = vmul.f32 %v878_v0, %v254_v32  ;;  %v260_v28 = vld [vmem:[%s889_s24 + $0xc8] sm:$0xff] }
  0x30   : > { %v491_v47 = vadd.f32 %v459_v36, %v387_v37  ;;  %v388_v48 = vmax.f32 %v356_v38, 0.0  ;;  %v460_v49 = vadd.f32 %v905_v3, %v424_v39  ;;  %v357_v50 = vadd.f32 %v900_v2, %v321_v40  ;;  %v292_v37 = vld [vmem:[%s895_s27 + $0xc8] sm:$0xff]  ;;  %v261_v38 = vld [vmem:[%s889_s24 + $0xd0] sm:$0xff] }
  0x31   : > { %554 = vst.msk [vmem:[%s944_s8 + $0x70] sm:$0xff] %vm539_vm0, %v521_v42  ;;  %v522_v53 = vmax.f32 %v490_v43, 0.0  ;;  %v461_v54 = vadd.f32 %v905_v3, %v425_v44  ;;  %v358_v55 = vadd.f32 %v900_v2, %v322_v45  ;;  %v426_v56 = vmul.f32 %v883_v1, %v286_v41  ;;  %v293_v43 = vld [vmem:[%s895_s27 + $0xd0] sm:$0xff]  ;;  %v262_v44 = vld [vmem:[%s889_s24 + $0xd8] sm:$0xff] }
  0x32   : > { %v523_v58 = vmax.f32 %v491_v47, 0.0  ;;  %v492_v59 = vadd.f32 %v460_v49, %v388_v48  ;;  %v389_v60 = vmax.f32 %v357_v50, 0.0  ;;  %v323_v61 = vmul.f32 %v878_v0, %v255_v46 }
  0x33   : > { %555 = vst.msk [vmem:[%s944_s8 + $0x78] sm:$0xff] %vm539_vm0, %v522_v53  ;;  %v390_v63 = vmax.f32 %v358_v55, 0.0  ;;  %v462_v4 = vadd.f32 %v905_v3, %v426_v56  ;;  %v427_v5 = vmul.f32 %v883_v1, %v287_v51  ;;  %v324_v6 = vmul.f32 %v878_v0, %v256_v52  ;;  %v294_v53 = vld [vmem:[%s895_s27 + $0xd8] sm:$0xff] }
  0x34   : > { %556 = vst.msk [vmem:[%s944_s8 + $0x80] sm:$0xff] %vm539_vm0, %v523_v58  ;;  %v524_v8 = vmax.f32 %v492_v59, 0.0  ;;  %v493_v9 = vadd.f32 %v461_v54, %v389_v60  ;;  %v359_v10 = vadd.f32 %v900_v2, %v323_v61  ;;  %v428_v11 = vmul.f32 %v883_v1, %v288_v57  ;;  %v263_v58 = vld [vmem:[%s889_s24 + $0xe0] sm:$0xff] }
  0x35   : > { %v494_v13 = vadd.f32 %v462_v4, %v390_v63  ;;  %v463_v14 = vadd.f32 %v905_v3, %v427_v5  ;;  %v360_v15 = vadd.f32 %v900_v2, %v324_v6  ;;  %v325_v16 = vmul.f32 %v878_v0, %v257_v62  ;;  %v295_v63 = vld [vmem:[%s895_s27 + $0xe0] sm:$0xff]  ;;  %v264_v4 = vld [vmem:[%s889_s24 + $0xe8] sm:$0xff] }
  0x36   : > { %557 = vst.msk [vmem:[%s944_s8 + $0x88] sm:$0xff] %vm539_vm0, %v524_v8  ;;  %v525_v19 = vmax.f32 %v493_v9, 0.0  ;;  %v391_v20 = vmax.f32 %v359_v10, 0.0  ;;  %v464_v21 = vadd.f32 %v905_v3, %v428_v11  ;;  %v429_v22 = vmul.f32 %v883_v1, %v289_v7  ;;  %v296_v9 = vld [vmem:[%s895_s27 + $0xe8] sm:$0xff] }
  0x37   : > { %v526_v24 = vmax.f32 %v494_v13, 0.0  ;;  %v392_v25 = vmax.f32 %v360_v15, 0.0  ;;  %v361_v26 = vadd.f32 %v900_v2, %v325_v16  ;;  %v326_v27 = vmul.f32 %v878_v0, %v258_v12 }
  0x38   : > { %558 = vst.msk [vmem:[%s944_s8 + $0x90] sm:$0xff] %vm539_vm0, %v525_v19  ;;  %v495_v29 = vadd.f32 %v463_v14, %v391_v20  ;;  %v465_v30 = vadd.f32 %v905_v3, %v429_v22  ;;  %v430_v31 = vmul.f32 %v883_v1, %v290_v17  ;;  %v327_v32 = vmul.f32 %v878_v0, %v259_v18  ;;  %v265_v14 = vld [vmem:[%s889_s24 + $0xf0] sm:$0xff]  ;;  %v266_v20 = vld [vmem:[%s889_s24 + $0xf8] sm:$0xff] }
  0x39   : > { %559 = vst.msk [vmem:[%s944_s8 + $0x98] sm:$0xff] %vm539_vm0, %v526_v24  ;;  %v496_v33 = vadd.f32 %v464_v21, %v392_v25  ;;  %v393_v34 = vmax.f32 %v361_v26, 0.0  ;;  %v362_v35 = vadd.f32 %v900_v2, %v326_v27  ;;  %v431_v36 = vmul.f32 %v883_v1, %v291_v23  ;;  %v297_v19 = vld [vmem:[%s895_s27 + $0xf0] sm:$0xff]  ;;  %v572_v21 = vld [vmem:[%s944_s8] ss:$2 sm:$0xff]  ;;  %v298_v26 = vld [vmem:[%s895_s27 + $0xf8] sm:$0xff] }
  0x3a   : > { %v527_v39 = vmax.f32 %v495_v29, 0.0  ;;  %v466_v40 = vadd.f32 %v905_v3, %v430_v31  ;;  %v363_v41 = vadd.f32 %v900_v2, %v327_v32  ;;  %v328_v42 = vmul.f32 %v878_v0, %v260_v28  ;;  %v784_v27 = vld [vmem:[%s944_s8 + $0x10] ss:$2 sm:$0xff]  ;;  %v799_v28 = vld [vmem:[%s944_s8 + $0x1] ss:$2 sm:$0xff] }
  0x3b   : > { %v528_v45 = vmax.f32 %v496_v33, 0.0  ;;  %v497_v46 = vadd.f32 %v465_v30, %v393_v34  ;;  %v394_v47 = vmax.f32 %v362_v35, 0.0  ;;  %v467_v48 = vadd.f32 %v905_v3, %v431_v36  ;;  %v800_v33 = vld [vmem:[%s944_s8 + $0x11] ss:$2 sm:$0xff]  ;;  %v785_v34 = vld [vmem:[%s944_s8 + $0x20] ss:$2 sm:$0xff] }
  0x3c   : > { %560 = vst.msk [vmem:[%s944_s8 + $0xa0] sm:$0xff] %vm539_vm0, %v527_v39  ;;  %v395_v49 = vmax.f32 %v363_v41, 0.0  ;;  %v364_v50 = vadd.f32 %v900_v2, %v328_v42  ;;  %v432_v51 = vmul.f32 %v883_v1, %v292_v37  ;;  %v329_v52 = vmul.f32 %v878_v0, %v261_v38  ;;  %v801_v35 = vld [vmem:[%s944_s8 + $0x21] ss:$2 sm:$0xff]  ;;  %v802_v41 = vld [vmem:[%s944_s8 + $0x31] ss:$2 sm:$0xff] }
  0x3d   : > { %561 = vst.msk [vmem:[%s944_s8 + $0xa8] sm:$0xff] %vm539_vm0, %v528_v45  ;;  %v529_v54 = vmax.f32 %v497_v46, 0.0  ;;  %v498_v55 = vadd.f32 %v466_v40, %v394_v47  ;;  %v433_v56 = vmul.f32 %v883_v1, %v293_v43  ;;  %v330_v57 = vmul.f32 %v878_v0, %v262_v44  ;;  %v786_v40 = vld [vmem:[%s944_s8 + $0x30] ss:$2 sm:$0xff]  ;;  %v787_v46 = vld [vmem:[%s944_s8 + $0x40] ss:$2 sm:$0xff] }
  0x3e   : > { %v499_v59 = vadd.f32 %v467_v48, %v395_v49  ;;  %v396_v60 = vmax.f32 %v364_v50, 0.0  ;;  %v468_v61 = vadd.f32 %v905_v3, %v432_v51  ;;  %v365_v62 = vadd.f32 %v900_v2, %v329_v52  ;;  %v788_v47 = vld [vmem:[%s944_s8 + $0x50] ss:$2 sm:$0xff]  ;;  %v803_v48 = vld [vmem:[%s944_s8 + $0x41] ss:$2 sm:$0xff] }
  0x3f   : > { %562 = vst.msk [vmem:[%s944_s8 + $0xb0] sm:$0xff] %vm539_vm0, %v529_v54  ;;  %v530_v5 = vmax.f32 %v498_v55, 0.0  ;;  %v469_v6 = vadd.f32 %v905_v3, %v433_v56  ;;  %v366_v7 = vadd.f32 %v900_v2, %v330_v57  ;;  %v434_v8 = vmul.f32 %v883_v1, %v294_v53  ;;  %v804_v49 = vld [vmem:[%s944_s8 + $0x51] ss:$2 sm:$0xff]  ;;  %v789_v50 = vld [vmem:[%s944_s8 + $0x60] ss:$2 sm:$0xff] }
  0x40   : > { %v531_v10 = vmax.f32 %v499_v59, 0.0  ;;  %v500_v11 = vadd.f32 %v468_v61, %v396_v60  ;;  %v397_v12 = vmax.f32 %v365_v62, 0.0  ;;  %v331_v13 = vmul.f32 %v878_v0, %v263_v58  ;;  %v805_v51 = vld [vmem:[%s944_s8 + $0x61] ss:$2 sm:$0xff]  ;;  %v790_v56 = vld [vmem:[%s944_s8 + $0x70] ss:$2 sm:$0xff] }
  0x41   : > { %563 = vst.msk [vmem:[%s944_s8 + $0xb8] sm:$0xff] %vm539_vm0, %v530_v5  ;;  %v398_v15 = vmax.f32 %v366_v7, 0.0  ;;  %v470_v16 = vadd.f32 %v905_v3, %v434_v8  ;;  %v435_v17 = vmul.f32 %v883_v1, %v295_v63  ;;  %v332_v18 = vmul.f32 %v878_v0, %v264_v4  ;;  %v791_v57 = vld [vmem:[%s944_s8 + $0x80] ss:$2 sm:$0xff]  ;;  %v807_v58 = vld [vmem:[%s944_s8 + $0x81] ss:$2 sm:$0xff] }
  0x42   : > { %564 = vst.msk [vmem:[%s944_s8 + $0xc0] sm:$0xff] %vm539_vm0, %v531_v10  ;;  %v532_v22 = vmax.f32 %v500_v11, 0.0  ;;  %v501_v23 = vadd.f32 %v469_v6, %v397_v12  ;;  %v367_v24 = vadd.f32 %v900_v2, %v331_v13  ;;  %v436_v25 = vmul.f32 %v883_v1, %v296_v9  ;;  %v792_v63 = vld [vmem:[%s944_s8 + $0x90] ss:$2 sm:$0xff]  ;;  %v808_v4 = vld [vmem:[%s944_s8 + $0x91] ss:$2 sm:$0xff] }
  0x43   : > { %v502_v29 = vadd.f32 %v470_v16, %v398_v15  ;;  %v471_v30 = vadd.f32 %v905_v3, %v435_v17  ;;  %v368_v31 = vadd.f32 %v900_v2, %v332_v18  ;;  %v333_v32 = vmul.f32 %v878_v0, %v265_v14 }
  0x44   : > { %565 = vst.msk [vmem:[%s944_s8 + $0xc8] sm:$0xff] %vm539_vm0, %v532_v22  ;;  %v533_v36 = vmax.f32 %v501_v23, 0.0  ;;  %v399_v37 = vmax.f32 %v367_v24, 0.0  ;;  %v472_v38 = vadd.f32 %v905_v3, %v436_v25  ;;  %v437_v39 = vmul.f32 %v883_v1, %v297_v19  ;;  %v793_v8 = vld [vmem:[%s944_s8 + $0xa0] ss:$2 sm:$0xff] }
  0x45   : > { %v534_v42 = vmax.f32 %v502_v29, 0.0  ;;  %v400_v43 = vmax.f32 %v368_v31, 0.0  ;;  %v369_v44 = vadd.f32 %v900_v2, %v333_v32  ;;  %v334_v45 = vmul.f32 %v878_v0, %v266_v20  ;;  %v806_v0 = vld [vmem:[%s944_s8 + $0x71] ss:$2 sm:$0xff] }
  0x46   : > { %566 = vst.msk [vmem:[%s944_s8 + $0xd0] sm:$0xff] %vm539_vm0, %v533_v36  ;;  %v503_v52 = vadd.f32 %v471_v30, %v399_v37  ;;  %v473_v53 = vadd.f32 %v905_v3, %v437_v39  ;;  %v438_v54 = vmul.f32 %v883_v1, %v298_v26  ;;  %v635_v55 = vmax.f32 %v572_v21, %v799_v28 }
  0x47   : > { %567 = vst.msk [vmem:[%s944_s8 + $0xd8] sm:$0xff] %vm539_vm0, %v534_v42  ;;  %v504_v59 = vadd.f32 %v472_v38, %v400_v43  ;;  %v401_v60 = vmax.f32 %v369_v44, 0.0  ;;  %v370_v61 = vadd.f32 %v900_v2, %v334_v45  ;;  %v636_v62 = vmax.f32 %v784_v27, %v800_v33  ;;  %v809_v2 = vld [vmem:[%s944_s8 + $0xa1] ss:$2 sm:$0xff] }
  0x48   : > { %v535_v1 = vmax.f32 %v503_v52, 0.0  ;;  %v474_v5 = vadd.f32 %v905_v3, %v438_v54  ;;  %v637_v6 = vmax.f32 %v785_v34, %v801_v35  ;;  %v638_v7 = vmax.f32 %v786_v40, %v802_v41  ;;  %v794_v3 = vld [vmem:[%s944_s8 + $0xb0] ss:$2 sm:$0xff]  ;;  %v810_v13 = vld [vmem:[%s944_s8 + $0xb1] ss:$2 sm:$0xff] }
  0x49   : > { %v536_v9 = vmax.f32 %v504_v59, 0.0  ;;  %v505_v10 = vadd.f32 %v473_v53, %v401_v60  ;;  %v402_v11 = vmax.f32 %v370_v61, 0.0  ;;  %v651_v12 = vmax.f32 %v635_v55, %v636_v62 }
  0x4a   : > { %568 = vst.msk [vmem:[%s944_s8 + $0xe0] sm:$0xff] %vm539_vm0, %v535_v1  ;;  %v652_v14 = vmax.f32 %v637_v6, %v638_v7  ;;  %v639_v15 = vmax.f32 %v787_v46, %v803_v48  ;;  %v640_v16 = vmax.f32 %v788_v47, %v804_v49  ;;  %v641_v17 = vmax.f32 %v789_v50, %v805_v51 }
  0x4b   : > { %569 = vst.msk [vmem:[%s944_s8 + $0xe8] sm:$0xff] %vm539_vm0, %v536_v9  ;;  %v537_v18 = vmax.f32 %v505_v10, 0.0  ;;  %v506_v19 = vadd.f32 %v474_v5, %v402_v11  ;;  %659 = vst.msk [vmem:[%s1187_s12] sm:$0xff] %vm539_vm0, %v651_v12  ;;  %v642_v20 = vmax.f32 %v790_v56, %v806_v0  ;;  %v643_v21 = vmax.f32 %v791_v57, %v807_v58  ;;  %v795_v22 = vld [vmem:[%s944_s8 + $0xc0] ss:$2 sm:$0xff] }
  0x4c   : > { %v811_v23 = vld [vmem:[%s944_s8 + $0xc1] ss:$2 sm:$0xff]  ;;  %660 = vst.msk [vmem:[%s1187_s12 + $0x8] sm:$0xff] %vm539_vm0, %v652_v14  ;;  %v653_v24 = vmax.f32 %v639_v15, %v640_v16  ;;  %v644_v25 = vmax.f32 %v792_v63, %v808_v4  ;;  %v645_v26 = vmax.f32 %v793_v8, %v809_v2  ;;  %v646_v27 = vmax.f32 %v794_v3, %v810_v13 }
  0x4d   : > { %570 = vst.msk [vmem:[%s944_s8 + $0xf0] sm:$0xff] %vm539_vm0, %v537_v18  ;;  %v538_v28 = vmax.f32 %v506_v19, 0.0  ;;  %v654_v29 = vmax.f32 %v641_v17, %v642_v20  ;;  %v647_v30 = vmax.f32 %v795_v22, %v811_v23 }
  0x4e   : > { %661 = vst.msk [vmem:[%s1187_s12 + $0x10] sm:$0xff] %vm539_vm0, %v653_v24  ;;  %v655_v31 = vmax.f32 %v643_v21, %v644_v25  ;;  %v656_v32 = vmax.f32 %v645_v26, %v646_v27  ;;  %v796_v33 = vld [vmem:[%s944_s8 + $0xd0] ss:$2 sm:$0xff]  ;;  %v812_v34 = vld [vmem:[%s944_s8 + $0xd1] ss:$2 sm:$0xff] }
  0x4f   : > { %571 = vst.msk [vmem:[%s944_s8 + $0xf8] sm:$0xff] %vm539_vm0, %v538_v28  ;;  %662 = vst.msk [vmem:[%s1187_s12 + $0x18] sm:$0xff] %vm539_vm0, %v654_v29  ;;  %v648_v35 = vmax.f32 %v796_v33, %v812_v34 }
  0x50   : > { %663 = vst.msk [vmem:[%s1187_s12 + $0x20] sm:$0xff] %vm539_vm0, %v655_v31  ;;  %664 = vst.msk [vmem:[%s1187_s12 + $0x28] sm:$0xff] %vm539_vm0, %v656_v32 }
  0x51   : > { %v657_v36 = vmax.f32 %v647_v30, %v648_v35 }
  0x52   : > { %v797_v37 = vld [vmem:[%s944_s8 + $0xe0] ss:$2 sm:$0xff]  ;;  %v813_v38 = vld [vmem:[%s944_s8 + $0xe1] ss:$2 sm:$0xff] }
  0x53   : > { %665 = vst.msk [vmem:[%s1187_s12 + $0x30] sm:$0xff] %vm539_vm0, %v657_v36  ;;  %v649_v39 = vmax.f32 %v797_v37, %v813_v38 }
  0x56   : > { %v798_v40 = vld [vmem:[%s944_s8 + $0xf0] ss:$2 sm:$0xff]  ;;  %v814_v41 = vld [vmem:[%s944_s8 + $0xf1] ss:$2 sm:$0xff] }
  0x57   : > { %v650_v42 = vmax.f32 %v798_v40, %v814_v41 }
  0x59   : > { %v658_v43 = vmax.f32 %v649_v39, %v650_v42 }
  0x5b   : > { %666 = vst.msk [vmem:[%s1187_s12 + $0x38] sm:$0xff] %vm539_vm0, %v658_v43 }
  0x5c PF: > { %s15_s15 = sadd.s32 1, %s835_s15  }
  0x5d   : > { %p12_p4 = scmp.ge.s32.totalorder %s15_s15, 4  }
  0x5f   :  { %14 = sbr.rel (!%p12_p4) target bundleno = 1 (0x1), region = 108 }

// kernel: down_sample_forward.3
= control target key start
LH: loop header
LB: loop body
LE: loop exit
PB: predicated region body
PF: predicated region fallthrough
CT: control target
= control target key end

     0   :  { %s4180_s12 = smov 0   ;;  %s4906_s0 = inlined_call_operand.vmem [shape: f32[2,18,18,4], index: 0, kind: input, shape index: {}]   ;;  %s4907_s1 = inlined_call_operand.vmem [shape: bf16[9,4,8], index: 1, kind: input, shape index: {}]   ;;  %s4908_s2 = inlined_call_operand.vmem [shape: f32[2,16,16,8], index: 2, kind: output, shape index: {0}]   ;;  %s4909_s3 = inlined_call_operand.vmem [shape: f32[2,2,8], index: 3, kind: output, shape index: {1}]  }
   0x1 LB: > { %s3060_s13 = sadd.s32 4294967295, %s4158_s12   ;;  %p3064_p0 = scmp.ge.s32.totalorder %s4158_s12, 1  ;;  %s4158_s12 = sphi %s4180_s12, %s14_s12  }
   0x2   : > { %p140_p1 = scmp.lt.s32.totalorder %s4158_s12, 3 }
   0x4   : > { %p141_p2 = pnand %p3064_p0, %p140_p1 }
   0x5   : > { %v3069_v0 = vld [vmem:[%s4907_s1 + $0x2] sm:$0x3] (!%p141_p2)  ;;  %vm331_vm0 = vcmask (!%p141_p2), 1041408   ;;  %v4194_v1 = vld [vmem:[%s4907_s1 + $0x8] sm:$0x3] (!%p141_p2)  ;;  %p168_p3 = scmp.lt.s32.totalorder (!%p141_p2), %s3060_s13, 1 }
   0x6   : > { %144 = sbr.rel (%p141_p2) target bundleno = 541 (0x21d), region = 28  ;;  %4133 = vmatprep.subr.msk.bf16.mxu1 (!%p141_p2), %vm331_vm0, %v3069_v0  ;;  %4137 = vmatprep.subr.msk.bf16.mxu0 (!%p141_p2), %vm331_vm0, %v4194_v1  ;;  %v333_v2 = vsel (!%p141_p2), %vm331_vm0, %v3069_v0, 0  ;;  %v4202_v3 = vsel (!%p141_p2), %vm331_vm0, %v4194_v1, 0  ;;  %v231_v4 = vld [vmem:[%s4907_s1] sm:$0x3] (!%p141_p2)  ;;  %vm282_vm1 = vcmask (!%p141_p2), 31744  }
   0x7   : > { %3570 = vmatpush3.bf16.msra.mxu1 (!%p141_p2), %v333_v2  ;;  %3706 = vmatpush3.bf16.msra.mxu0 (!%p141_p2), %v4202_v3  ;;  %v3249_v5 = vld [vmem:[%s4907_s1 + $0xa] sm:$0x3] (!%p141_p2)  ;;  %v545_v14 = vsel (!%p141_p2), %vm331_vm0, %v231_v4, 0  ;;  %v3298_v20 = vld [vmem:[%s4907_s1 + $0xc] sm:$0x3] (!%p141_p2)  ;;  %vm2768_vm2 = vcmask (!%p141_p2), 64512  }
   0x8   : > { %4134 = vmatprep.subr.msk.bf16.mxu1 (!%p141_p2), %vm331_vm0, %v231_v4  ;;  %4139 = vmatprep.subr.msk.bf16.mxu0 (!%p141_p2), %vm331_vm0, %v3249_v5  ;;  %v1690_v18 = vsel (!%p141_p2), %vm331_vm0, %v3249_v5, 0  ;;  %v4246_v21 = vld [vmem:[%s4907_s1 + $0x4] sm:$0x3] (!%p141_p2)  ;;  %v1985_v52 = vsel (!%p141_p2), %vm331_vm0, %v3298_v20, 0  ;;  %v4325_v53 = vld [vmem:[%s4907_s1 + $0xe] sm:$0x3] (!%p141_p2) }
   0x9   : > { %vm2870_vm3 = vcmask (!%p141_p2), 57344  }
   0xd   : > { %s4911_s13 = smov (!%p168_p3, %s3060_s13), 1 }
   0xe   : > { %s4143_s22 = smul.u32 432, %s4911_s13  ;;  %s3415_s9 = sshll.u32 %s4911_s13, 8 }
   0xf   : > { %s4761_s14 = scalar_lea.vmem %s4908_s2, %s3415_s9  ;;  %s3068_s15 = sshll.u32 %s4911_s13, 1 }
  0x10   : > { %s4219_s25 = scalar_lea.vmem %s4906_s0, %s4143_s22  ;;  %s181_s18 = scalar_lea.vmem %s4909_s3, %s3068_s15 }
  0x11   : > { %v232_v6 = vld [vmem:[%s4219_s25 + $0x1] sm:$0xff]  ;;  %v233_v7 = vld [vmem:[%s4219_s25 + $0x9] sm:$0xff]  ;;  %v3168_v8 = vld [vmem:[%s4219_s25 + $0x19] sm:$0xff] }
  0x12   : > { %v264_v9 = vpack.c.bf16 %v233_v7, %v232_v6  ;;  %v3169_v10 = vld [vmem:[%s4219_s25 + $0x21] sm:$0xff]  ;;  %v3170_v11 = vld [vmem:[%s4219_s25 + $0x31] sm:$0xff]  ;;  %v3171_v12 = vld [vmem:[%s4219_s25 + $0x39] sm:$0xff] }
  0x13   : > { %v1329_v13 = vpack.c.bf16 %v3169_v10, %v3168_v8  ;;  %v4228_v15 = vpack.c.bf16 %v3171_v12, %v3170_v11  ;;  %v3172_v16 = vld [vmem:[%s4219_s25 + $0x49] sm:$0xff]  ;;  %v3173_v17 = vld [vmem:[%s4219_s25 + $0x51] sm:$0xff]  ;;  %v3174_v22 = vld [vmem:[%s4219_s25 + $0x61] sm:$0xff] }
  0x14   : > { %3571 = vmatprep.mubr.msk.bf16.mxu1 %vm282_vm1, %v264_v9  ;;  %v4234_v19 = vpack.c.bf16 %v3173_v17, %v3172_v16  ;;  %v3175_v23 = vld [vmem:[%s4219_s25 + $0x69] sm:$0xff]  ;;  %v3176_v24 = vld [vmem:[%s4219_s25 + $0x79] sm:$0xff]  ;;  %v3177_v25 = vld [vmem:[%s4219_s25 + $0x81] sm:$0xff] }
  0x15   : > { %3707 = vmatprep.mubr.msk.bf16.mxu0 %vm282_vm1, %v1329_v13  ;;  %3572 = vmatmul.mubr.msk.bf16.vlgmr.msra.gmra.mrb[0].mxu1 %vm282_vm1, %v1329_v13  ;;  %v4259_v26 = vpack.c.bf16 %v3175_v23, %v3174_v22  ;;  %v4261_v27 = vpack.c.bf16 %v3177_v25, %v3176_v24  ;;  %v3178_v28 = vld [vmem:[%s4219_s25 + $0x91] sm:$0xff]  ;;  %v3179_v29 = vld [vmem:[%s4219_s25 + $0x99] sm:$0xff]  ;;  %v3180_v30 = vld [vmem:[%s4219_s25 + $0xa9] sm:$0xff] }
  0x16   : > { %3604 = vmatpush3.bf16.msra.mxu1 %v545_v14  ;;  %3708 = vmatmul.mubr.msk.bf16.vlgmr.msra.gmra.mrb[0].mxu0 %vm282_vm1, %v4228_v15  ;;  %v3181_v31 = vld [vmem:[%s4219_s25 + $0xb1] sm:$0xff]  ;;  %v4275_v32 = vpack.c.bf16 %v3179_v29, %v3178_v28  ;;  %v3182_v34 = vld [vmem:[%s4219_s25 + $0xc1] sm:$0xff]  ;;  %v3183_v35 = vld [vmem:[%s4219_s25 + $0xc9] sm:$0xff] }
  0x17   : > { %3740 = vmatpush3.bf16.msra.mxu0 %v1690_v18  ;;  %3575 = vmatprep.mubr.msk.bf16.mxu1 %vm282_vm1, %v4228_v15  ;;  %v4277_v33 = vpack.c.bf16 %v3181_v31, %v3180_v30  ;;  %v3217_v36 = vld [vmem:[%s4219_s25 + $0x1a] sm:$0xff]  ;;  %v3218_v37 = vld [vmem:[%s4219_s25 + $0x22] sm:$0xff]  ;;  %v4291_v38 = vpack.c.bf16 %v3183_v35, %v3182_v34  ;;  %v3219_v42 = vld [vmem:[%s4219_s25 + $0x32] sm:$0xff] }
  0x18   : > { %3711 = vmatprep.mubr.msk.bf16.mxu0 %vm282_vm1, %v4234_v19  ;;  %4140 = vmatprep.subr.msk.bf16.mxu0 %vm331_vm0, %v3298_v20  ;;  %v4293_v39 = vpack.c.bf16 %v3218_v37, %v3217_v36  ;;  %v250_v40 = vld [vmem:[%s4219_s25 + $0xd9] sm:$0xff]  ;;  %v251_v41 = vld [vmem:[%s4219_s25 + $0xe1] sm:$0xff]  ;;  %v252_v44 = vld [vmem:[%s4219_s25 + $0xf1] sm:$0xff] }
  0x19   : > { %4135 = vmatprep.subr.msk.bf16.mxu1 %vm331_vm0, %v4246_v21  ;;  %v3220_v43 = vld [vmem:[%s4219_s25 + $0x3a] sm:$0xff]  ;;  %v3221_v46 = vld [vmem:[%s4219_s25 + $0x4a] sm:$0xff]  ;;  %v3222_v47 = vld [vmem:[%s4219_s25 + $0x52] sm:$0xff]  ;;  %v4311_v48 = vpack.c.bf16 %v251_v41, %v250_v40 }
  0x1a   : > { %v253_v45 = vld [vmem:[%s4219_s25 + $0xf9] sm:$0xff]  ;;  %v4313_v49 = vpack.c.bf16 %v3220_v43, %v3219_v42  ;;  %v4317_v51 = vpack.c.bf16 %v3222_v47, %v3221_v46  ;;  %v254_v54 = vld [vmem:[%s4219_s25 + $0x109] sm:$0xff]  ;;  %v255_v55 = vld [vmem:[%s4219_s25 + $0x111] sm:$0xff]  ;;  %v807_v47 = vsel %vm331_vm0, %v4246_v21, 0 }
  0x1b   : > { %v4315_v50 = vpack.c.bf16 %v253_v45, %v252_v44  ;;  %v3223_v56 = vld [vmem:[%s4219_s25 + $0x62] sm:$0xff]  ;;  %v3224_v57 = vld [vmem:[%s4219_s25 + $0x6a] sm:$0xff]  ;;  %v3225_v60 = vld [vmem:[%s4219_s25 + $0x7a] sm:$0xff]  ;;  %v4343_v62 = vpack.c.bf16 %v255_v55, %v254_v54 }
  0x1c   : > { %v256_v58 = vld [vmem:[%s4219_s25 + $0x121] sm:$0xff]  ;;  %v257_v59 = vld [vmem:[%s4219_s25 + $0x129] sm:$0xff]  ;;  %v4345_v63 = vpack.c.bf16 %v3224_v57, %v3223_v56  ;;  %v258_v4 = vld [vmem:[%s4219_s25 + $0x139] sm:$0xff] }
  0x1d   : > { %3576 = vmatmul.mubr.msk.bf16.gmra.mrb[4].mxu1 %vm282_vm1, %v4234_v19  ;;  %v3226_v61 = vld [vmem:[%s4219_s25 + $0x82] sm:$0xff]  ;;  %v4347_v0 = vpack.c.bf16 %v257_v59, %v256_v58  ;;  %v3227_v6 = vld [vmem:[%s4219_s25 + $0x92] sm:$0xff]  ;;  %v3228_v7 = vld [vmem:[%s4219_s25 + $0x9a] sm:$0xff] }
  0x1e   : > { %3712 = vmatmul.mubr.msk.bf16.gmra.mrb[4].mxu0 %vm282_vm1, %v4259_v26  ;;  %3579 = vmatprep.mubr.msk.bf16.mxu1 %vm282_vm1, %v4259_v26  ;;  %v4349_v2 = vpack.c.bf16 %v3226_v61, %v3225_v60  ;;  %v259_v5 = vld [vmem:[%s4219_s25 + $0x141] sm:$0xff]  ;;  %v260_v8 = vld [vmem:[%s4219_s25 + $0x151] sm:$0xff]  ;;  %v261_v9 = vld [vmem:[%s4219_s25 + $0x159] sm:$0xff]  ;;  %v4369_v13 = vpack.c.bf16 %v3228_v7, %v3227_v6 }
  0x1f   : > { %3715 = vmatprep.mubr.msk.bf16.mxu0 %vm282_vm1, %v4261_v27  ;;  %v3229_v10 = vld [vmem:[%s4219_s25 + $0xaa] sm:$0xff]  ;;  %v3230_v11 = vld [vmem:[%s4219_s25 + $0xb2] sm:$0xff]  ;;  %v4367_v12 = vpack.c.bf16 %v259_v5, %v258_v4  ;;  %v4371_v14 = vpack.c.bf16 %v261_v9, %v260_v8  ;;  %v3231_v20 = vld [vmem:[%s4219_s25 + $0xc2] sm:$0xff] }
  0x20   : > { %v4373_v16 = vpack.c.bf16 %v3230_v11, %v3229_v10  ;;  %v262_v17 = vld [vmem:[%s4219_s25 + $0x169] sm:$0xff]  ;;  %v263_v18 = vld [vmem:[%s4219_s25 + $0x171] sm:$0xff]  ;;  %v183_v23 = vld [vmem:[%s4219_s25] sm:$0xff] }
  0x21   : > { %v3232_v22 = vld [vmem:[%s4219_s25 + $0xca] sm:$0xff]  ;;  %v3233_v25 = vld [vmem:[%s4219_s25 + $0xda] sm:$0xff]  ;;  %v3234_v28 = vld [vmem:[%s4219_s25 + $0xe2] sm:$0xff]  ;;  %v4391_v29 = vpack.c.bf16 %v263_v18, %v262_v17 }
  0x22   : > { %v184_v24 = vld [vmem:[%s4219_s25 + $0x8] sm:$0xff]  ;;  %v4393_v30 = vpack.c.bf16 %v3232_v22, %v3231_v20  ;;  %v4395_v34 = vpack.c.bf16 %v3234_v28, %v3233_v25  ;;  %v185_v35 = vld [vmem:[%s4219_s25 + $0x18] sm:$0xff]  ;;  %v186_v36 = vld [vmem:[%s4219_s25 + $0x20] sm:$0xff] }
  0x23   : > { %v215_v31 = vpack.c.bf16 %v184_v24, %v183_v23  ;;  %v3235_v37 = vld [vmem:[%s4219_s25 + $0xf2] sm:$0xff]  ;;  %v3236_v40 = vld [vmem:[%s4219_s25 + $0xfa] sm:$0xff]  ;;  %v3237_v43 = vld [vmem:[%s4219_s25 + $0x10a] sm:$0xff]  ;;  %v4412_v45 = vpack.c.bf16 %v186_v36, %v185_v35 }
  0x24   : > { %v187_v41 = vld [vmem:[%s4219_s25 + $0x30] sm:$0xff]  ;;  %v188_v42 = vld [vmem:[%s4219_s25 + $0x38] sm:$0xff]  ;;  %v4414_v46 = vpack.c.bf16 %v3236_v40, %v3235_v37  ;;  %v4427_v55 = vld [vmem:[%s4907_s1 + $0x6] sm:$0x3] }
  0x25   : > { %3580 = vmatmul.mubr.msk.bf16.gmra.mrb[8].mxu1 %vm282_vm1, %v4261_v27  ;;  %v3238_v44 = vld [vmem:[%s4219_s25 + $0x112] sm:$0xff]  ;;  %v189_v56 = vld [vmem:[%s4219_s25 + $0x48] sm:$0xff]  ;;  %v191_v59 = vld [vmem:[%s4219_s25 + $0x60] sm:$0xff] }
  0x26   : > { %3716 = vmatmul.mubr.msk.bf16.gmra.mrb[8].mxu0 %vm282_vm1, %v4275_v32  ;;  %3583 = vmatprep.mubr.msk.bf16.mxu1 %vm282_vm1, %v4275_v32  ;;  %v4420_v54 = vpack.c.bf16 %v3238_v44, %v3237_v43  ;;  %v190_v57 = vld [vmem:[%s4219_s25 + $0x50] sm:$0xff]  ;;  %v3239_v21 = vld [vmem:[%s4219_s25 + $0x122] sm:$0xff]  ;;  %v3241_v61 = vld [vmem:[%s4219_s25 + $0x13a] sm:$0xff] }
  0x27   : > { %3719 = vmatprep.mubr.msk.bf16.mxu0 %vm282_vm1, %v4277_v33  ;;  %v3240_v58 = vld [vmem:[%s4219_s25 + $0x12a] sm:$0xff]  ;;  %v3242_v4 = vld [vmem:[%s4219_s25 + $0x142] sm:$0xff]  ;;  %v4445_v5 = vpack.c.bf16 %v190_v57, %v189_v56  ;;  %v193_v9 = vld [vmem:[%s4219_s25 + $0x78] sm:$0xff] }
  0x28   : > { %v192_v60 = vld [vmem:[%s4219_s25 + $0x68] sm:$0xff]  ;;  %v4447_v6 = vpack.c.bf16 %v3240_v58, %v3239_v21  ;;  %v4451_v8 = vpack.c.bf16 %v3242_v4, %v3241_v61  ;;  %v194_v10 = vld [vmem:[%s4219_s25 + $0x80] sm:$0xff]  ;;  %v3243_v11 = vld [vmem:[%s4219_s25 + $0x152] sm:$0xff]  ;;  %v2279_v61 = vsel %vm331_vm0, %v4325_v53, 0 }
  0x29   : > { %v4449_v7 = vpack.c.bf16 %v192_v60, %v191_v59  ;;  %v3244_v17 = vld [vmem:[%s4219_s25 + $0x15a] sm:$0xff]  ;;  %v195_v18 = vld [vmem:[%s4219_s25 + $0x90] sm:$0xff]  ;;  %v4469_v24 = vpack.c.bf16 %v194_v10, %v193_v9  ;;  %v197_v35 = vld [vmem:[%s4219_s25 + $0xa8] sm:$0xff] }
  0x2a   : > { %v196_v20 = vld [vmem:[%s4219_s25 + $0x98] sm:$0xff]  ;;  %v3245_v22 = vld [vmem:[%s4219_s25 + $0x16a] sm:$0xff]  ;;  %v4471_v25 = vpack.c.bf16 %v3244_v17, %v3243_v11  ;;  %v3247_v37 = vld [vmem:[%s4219_s25 + $0x182] sm:$0xff] }
  0x2b   : > { %v3246_v23 = vld [vmem:[%s4219_s25 + $0x172] sm:$0xff]  ;;  %v4473_v28 = vpack.c.bf16 %v196_v20, %v195_v18  ;;  %v3248_v40 = vld [vmem:[%s4219_s25 + $0x18a] sm:$0xff]  ;;  %v202_v57 = vld [vmem:[%s4219_s25 + $0xe0] sm:$0xff] }
  0x2c   : > { %v198_v36 = vld [vmem:[%s4219_s25 + $0xb0] sm:$0xff]  ;;  %v4493_v44 = vpack.c.bf16 %v3248_v40, %v3247_v37  ;;  %v201_v56 = vld [vmem:[%s4219_s25 + $0xd8] sm:$0xff]  ;;  %v205_v9 = vld [vmem:[%s4219_s25 + $0x108] sm:$0xff] }
  0x2d   : > { %3584 = vmatmul.mubr.msk.bf16.gmra.mrb[12].mxu1 %vm282_vm1, %v4277_v33  ;;  %v4491_v43 = vpack.c.bf16 %v198_v36, %v197_v35  ;;  %v203_v21 = vld [vmem:[%s4219_s25 + $0xf0] sm:$0xff]  ;;  %v204_v58 = vld [vmem:[%s4219_s25 + $0xf8] sm:$0xff]  ;;  %v4509_v59 = vpack.c.bf16 %v202_v57, %v201_v56  ;;  %v208_v11 = vld [vmem:[%s4219_s25 + $0x128] sm:$0xff] }
  0x2e   : > { %3720 = vmatmul.mubr.msk.bf16.gmra.mrb[12].mxu0 %vm282_vm1, %v4291_v38  ;;  %3587 = vmatprep.mubr.msk.bf16.mxu1 %vm282_vm1, %v4291_v38  ;;  %v4511_v60 = vpack.c.bf16 %v204_v58, %v203_v21  ;;  %v3396_v4 = vld [vmem:[%s4907_s1 + $0x10] sm:$0x3]  ;;  %v209_v20 = vld [vmem:[%s4219_s25 + $0x138] sm:$0xff]  ;;  %v213_v40 = vld [vmem:[%s4219_s25 + $0x168] sm:$0xff]  ;;  %v1102_v58 = vsel %vm331_vm0, %v4427_v55, 0 }
  0x2f   : > { %3741 = vmatprep.mubr.msk.bf16.mxu0 %vm282_vm1, %v4293_v39  ;;  %v206_v10 = vld [vmem:[%s4219_s25 + $0x110] sm:$0xff]  ;;  %v212_v35 = vld [vmem:[%s4219_s25 + $0x158] sm:$0xff] }
  0x30   : > { %v4531_v17 = vpack.c.bf16 %v206_v10, %v205_v9  ;;  %v709_v56 = vld [vmem:[%s4219_s25 + $0xa] sm:$0xff]  ;;  %v3297_v9 = vld [vmem:[%s4219_s25 + $0x1a0] sm:$0xff] }
  0x35   : > { %3588 = vmatmul.mubr.msk.bf16.gmra.mrb[16].mxu1 %vm282_vm1, %v4311_v48 }
  0x36   : > { %3742 = vmatmul.mubr.msk.bf16.vlgmr.msra.gmra.mrb[0].mxu0 %vm282_vm1, %v4313_v49  ;;  %3591 = vmatprep.mubr.msk.bf16.mxu1 %vm282_vm1, %v4315_v50 }
  0x37   : > { %3774 = vmatpush3.bf16.msra.mxu0 %v1985_v52  ;;  %3745 = vmatprep.mubr.msk.bf16.mxu0 %vm282_vm1, %v4317_v51  ;;  %v4418_v52 = vpack.c.bf16 %v188_v42, %v187_v41  ;;  %v199_v41 = vld [vmem:[%s4219_s25 + $0xc0] sm:$0xff]  ;;  %v200_v42 = vld [vmem:[%s4219_s25 + $0xc8] sm:$0xff] }
  0x38   : > { %4141 = vmatprep.subr.msk.bf16.mxu0 %vm331_vm0, %v4325_v53  ;;  %v207_v53 = vld [vmem:[%s4219_s25 + $0x120] sm:$0xff] }
  0x39   : > { %v4533_v18 = vpack.c.bf16 %v208_v11, %v207_v53  ;;  %v2573_v53 = vsel %vm331_vm0, %v3396_v4, 0 }
  0x3d   : > { %3592 = vmatmul.mubr.msk.bf16.gmra.mrb[20].mxu1 %vm282_vm1, %v4343_v62 }
  0x3e   : > { %3746 = vmatmul.mubr.msk.bf16.gmra.mrb[4].mxu0 %vm282_vm1, %v4345_v63  ;;  %3595 = vmatprep.mubr.msk.bf16.mxu1 %vm282_vm1, %v4347_v0 }
  0x3f   : > { %3749 = vmatprep.mubr.msk.bf16.mxu0 %vm282_vm1, %v4349_v2 }
  0x45   : > { %3596 = vmatmul.mubr.msk.bf16.gmra.mrb[24].mxu1 %vm282_vm1, %v4367_v12 }
  0x46   : > { %3750 = vmatmul.mubr.msk.bf16.gmra.mrb[8].mxu0 %vm282_vm1, %v4369_v13  ;;  %3599 = vmatprep.mubr.msk.bf16.mxu1 %vm282_vm1, %v4371_v14 }
  0x47   : > { %3753 = vmatprep.mubr.msk.bf16.mxu0 %vm282_vm1, %v4373_v16 }
  0x4d   : > { %3600 = vmatmul.mubr.msk.bf16.gmra.mrb[28].mxu1 %vm282_vm1, %v4391_v29 }
  0x4e   : > { %3754 = vmatmul.mubr.msk.bf16.gmra.mrb[12].mxu0 %vm282_vm1, %v4393_v30  ;;  %3605 = vmatprep.mubr.msk.bf16.mxu1 %vm282_vm1, %v215_v31  ;;  %v4475_v31 = vpack.c.bf16 %v3246_v23, %v3245_v22  ;;  %v210_v22 = vld [vmem:[%s4219_s25 + $0x140] sm:$0xff]  ;;  %v211_v23 = vld [vmem:[%s4219_s25 + $0x150] sm:$0xff] }
  0x4f   : > { %3757 = vmatprep.mubr.msk.bf16.mxu0 %vm282_vm1, %v4395_v34  ;;  %v4547_v36 = vpack.c.bf16 %v210_v22, %v209_v20  ;;  %v4549_v37 = vpack.c.bf16 %v212_v35, %v211_v23 }
  0x55   : > { %3606 = vmatmul.mubr.msk.bf16.vlgmr.msra.gmra.mrb[0].mxu1 %vm282_vm1, %v4412_v45 }
  0x56   : > { %3638 = vmatpush3.bf16.msra.mxu1 %v807_v47  ;;  %3758 = vmatmul.mubr.msk.bf16.gmra.mrb[16].mxu0 %vm282_vm1, %v4414_v46  ;;  %v4495_v47 = vpack.c.bf16 %v200_v42, %v199_v41  ;;  %v214_v41 = vld [vmem:[%s4219_s25 + $0x170] sm:$0xff]  ;;  %v708_v42 = vld [vmem:[%s4219_s25 + $0x2] sm:$0xff] }
  0x57   : > { %3609 = vmatprep.mubr.msk.bf16.mxu1 %vm282_vm1, %v4418_v52  ;;  %3761 = vmatprep.mubr.msk.bf16.mxu0 %vm282_vm1, %v4420_v54  ;;  %v4563_v57 = vpack.c.bf16 %v214_v41, %v213_v40  ;;  %v740_v21 = vpack.c.bf16 %v709_v56, %v708_v42 }
  0x58   : > { %4136 = vmatprep.subr.msk.bf16.mxu1 %vm331_vm0, %v4427_v55  ;;  %v3295_v55 = vld [vmem:[%s4219_s25 + $0x188] sm:$0xff] }
  0x5d   : > { %3610 = vmatmul.mubr.msk.bf16.gmra.mrb[4].mxu1 %vm282_vm1, %v4445_v5 }
  0x5e   : > { %3762 = vmatmul.mubr.msk.bf16.gmra.mrb[20].mxu0 %vm282_vm1, %v4447_v6  ;;  %3613 = vmatprep.mubr.msk.bf16.mxu1 %vm282_vm1, %v4449_v7 }
  0x5f   : > { %3765 = vmatprep.mubr.msk.bf16.mxu0 %vm282_vm1, %v4451_v8 }
  0x65   : > { %3614 = vmatmul.mubr.msk.bf16.gmra.mrb[8].mxu1 %vm282_vm1, %v4469_v24 }
  0x66   : > { %3766 = vmatmul.mubr.msk.bf16.gmra.mrb[24].mxu0 %vm282_vm1, %v4471_v25  ;;  %3617 = vmatprep.mubr.msk.bf16.mxu1 %vm282_vm1, %v4473_v28 }
  0x67   : > { %3769 = vmatprep.mubr.msk.bf16.mxu0 %vm282_vm1, %v4475_v31 }
  0x6d   : > { %3618 = vmatmul.mubr.msk.bf16.gmra.mrb[12].mxu1 %vm282_vm1, %v4491_v43 }
  0x6e   : > { %3770 = vmatmul.mubr.msk.bf16.gmra.mrb[28].mxu0 %vm282_vm1, %v4493_v44  ;;  %3621 = vmatprep.mubr.msk.bf16.mxu1 %vm282_vm1, %v4495_v47 }
  0x6f   : > { %3775 = vmatprep.mubr.msk.bf16.mxu0 %vm282_vm1, %v4418_v52 }
  0x75   : > { %3622 = vmatmul.mubr.msk.bf16.gmra.mrb[16].mxu1 %vm282_vm1, %v4509_v59 }
  0x76   : > { %3776 = vmatmul.mubr.msk.bf16.vlgmr.msra.gmra.mrb[0].mxu0 %vm282_vm1, %v4445_v5  ;;  %3625 = vmatprep.mubr.msk.bf16.mxu1 %vm282_vm1, %v4511_v60 }
  0x77   : > { %3808 = vmatpush3.bf16.msra.mxu0 %v2279_v61  ;;  %3779 = vmatprep.mubr.msk.bf16.mxu0 %vm282_vm1, %v4449_v7 }
  0x78   : > { %4142 = vmatprep.subr.msk.bf16.mxu0 %vm331_vm0, %v3396_v4 }
  0x7d   : > { %3626 = vmatmul.mubr.msk.bf16.gmra.mrb[20].mxu1 %vm282_vm1, %v4531_v17 }
  0x7e   : > { %3780 = vmatmul.mubr.msk.bf16.gmra.mrb[4].mxu0 %vm282_vm1, %v4469_v24  ;;  %3629 = vmatprep.mubr.msk.bf16.mxu1 %vm282_vm1, %v4533_v18 }
  0x7f   : > { %3783 = vmatprep.mubr.msk.bf16.mxu0 %vm282_vm1, %v4473_v28 }
  0x85   : > { %3630 = vmatmul.mubr.msk.bf16.gmra.mrb[24].mxu1 %vm282_vm1, %v4547_v36 }
  0x86   : > { %3784 = vmatmul.mubr.msk.bf16.gmra.mrb[8].mxu0 %vm282_vm1, %v4491_v43  ;;  %3633 = vmatprep.mubr.msk.bf16.mxu1 %vm282_vm1, %v4549_v37 }
  0x87   : > { %3787 = vmatprep.mubr.msk.bf16.mxu0 %vm282_vm1, %v4495_v47 }
  0x8d   : > { %3634 = vmatmul.mubr.msk.bf16.gmra.mrb[28].mxu1 %vm282_vm1, %v4563_v57 }
  0x8e   : > { %3788 = vmatmul.mubr.msk.bf16.gmra.mrb[12].mxu0 %vm282_vm1, %v4509_v59  ;;  %3639 = vmatprep.mubr.msk.bf16.mxu1 %vm282_vm1, %v740_v21 }
  0x8f   : > { %3791 = vmatprep.mubr.msk.bf16.mxu0 %vm282_vm1, %v4511_v60 }
  0x95   : > { %3640 = vmatmul.mubr.msk.bf16.vlgmr.msra.gmra.mrb[0].mxu1 %vm282_vm1, %v4293_v39  ;;  %v3294_v39 = vld [vmem:[%s4219_s25 + $0x180] sm:$0xff] }
  0x96   : > { %3672 = vmatpush3.bf16.msra.mxu1 %v1102_v58  ;;  %3792 = vmatmul.mubr.msk.bf16.gmra.mrb[16].mxu0 %vm282_vm1, %v4531_v17  ;;  %v4594_v61 = vpack.c.bf16 %v3295_v55, %v3294_v39 }
  0x97   : > { %3643 = vmatprep.mubr.msk.bf16.mxu1 %vm282_vm1, %v4313_v49  ;;  %3795 = vmatprep.mubr.msk.bf16.mxu0 %vm282_vm1, %v4533_v18 }
  0x98   : > { %4138 = vmatprep.subr.msk.bf16.mxu1 %vm331_vm0, %v4194_v1  ;;  %v3296_v1 = vld [vmem:[%s4219_s25 + $0x198] sm:$0xff] }
  0x99   : > { %v1933_v10 = vpack.c.bf16 %v3297_v9, %v3296_v1 }
  0x9d   : > { %3644 = vmatmul.mubr.msk.bf16.gmra.mrb[4].mxu1 %vm282_vm1, %v4317_v51 }
  0x9e   : > { %3796 = vmatmul.mubr.msk.bf16.gmra.mrb[20].mxu0 %vm282_vm1, %v4547_v36  ;;  %3647 = vmatprep.mubr.msk.bf16.mxu1 %vm282_vm1, %v4345_v63 }
  0x9f   : > { %3799 = vmatprep.mubr.msk.bf16.mxu0 %vm282_vm1, %v4549_v37 }
  0xa5   : > { %3648 = vmatmul.mubr.msk.bf16.gmra.mrb[8].mxu1 %vm282_vm1, %v4349_v2 }
  0xa6   : > { %3800 = vmatmul.mubr.msk.bf16.gmra.mrb[24].mxu0 %vm282_vm1, %v4563_v57  ;;  %3651 = vmatprep.mubr.msk.bf16.mxu1 %vm282_vm1, %v4369_v13 }
  0xa7   : > { %3803 = vmatprep.mubr.msk.bf16.mxu0 %vm282_vm1, %v4594_v61 }
  0xad   : > { %3652 = vmatmul.mubr.msk.bf16.gmra.mrb[12].mxu1 %vm282_vm1, %v4373_v16 }
  0xae   : > { %3804 = vmatmul.mubr.msk.bf16.gmra.mrb[28].mxu0 %vm282_vm1, %v1933_v10  ;;  %3655 = vmatprep.mubr.msk.bf16.mxu1 %vm282_vm1, %v4393_v30 }
  0xaf   : > { %3809 = vmatprep.mubr.msk.bf16.mxu0 %vm282_vm1, %v4228_v15  ;;  %v3344_v15 = vld [vmem:[%s4219_s25 + $0x189] sm:$0xff] }
  0xb5   : > { %3656 = vmatmul.mubr.msk.bf16.gmra.mrb[16].mxu1 %vm282_vm1, %v4395_v34 }
  0xb6   : > { %3810 = vmatmul.mubr.msk.bf16.vlgmr.msra.gmra.mrb[0].mxu0 %vm282_vm1, %v4234_v19  ;;  %3659 = vmatprep.mubr.msk.bf16.mxu1 %vm282_vm1, %v4414_v46 }
  0xb7   : > { %3842 = vmatpush3.bf16.msra.mxu0 %v2573_v53  ;;  %3813 = vmatprep.mubr.msk.bf16.mxu0 %vm282_vm1, %v4259_v26  ;;  %v3345_v26 = vld [vmem:[%s4219_s25 + $0x199] sm:$0xff] }
  0xbd   : > { %3660 = vmatmul.mubr.msk.bf16.gmra.mrb[20].mxu1 %vm282_vm1, %v4420_v54 }
  0xbe   : > { %3814 = vmatmul.mubr.msk.bf16.gmra.mrb[4].mxu0 %vm282_vm1, %v4261_v27  ;;  %3663 = vmatprep.mubr.msk.bf16.mxu1 %vm282_vm1, %v4447_v6  ;;  %v3346_v27 = vld [vmem:[%s4219_s25 + $0x1a1] sm:$0xff] }
  0xbf   : > { %3817 = vmatprep.mubr.msk.bf16.mxu0 %vm282_vm1, %v4275_v32  ;;  %v2227_v32 = vpack.c.bf16 %v3346_v27, %v3345_v26 }
  0xc5   : > { %3664 = vmatmul.mubr.msk.bf16.gmra.mrb[24].mxu1 %vm282_vm1, %v4451_v8 }
  0xc6   : > { %3818 = vmatmul.mubr.msk.bf16.gmra.mrb[8].mxu0 %vm282_vm1, %v4277_v33  ;;  %3667 = vmatprep.mubr.msk.bf16.mxu1 %vm282_vm1, %v4471_v25  ;;  %v3394_v33 = vld [vmem:[%s4219_s25 + $0x19a] sm:$0xff] }
  0xc7   : > { %3821 = vmatprep.mubr.msk.bf16.mxu0 %vm282_vm1, %v4291_v38  ;;  %v3395_v38 = vld [vmem:[%s4219_s25 + $0x1a2] sm:$0xff] }
  0xcd   : > { %3668 = vmatmul.mubr.msk.bf16.gmra.mrb[28].mxu1 %vm282_vm1, %v4475_v31 }
  0xce   : > { %3822 = vmatmul.mubr.msk.bf16.gmra.mrb[12].mxu0 %vm282_vm1, %v4311_v48  ;;  %3673 = vmatprep.mubr.msk.bf16.mxu1 %vm282_vm1, %v4412_v45 }
  0xcf   : > { %3825 = vmatprep.mubr.msk.bf16.mxu0 %vm282_vm1, %v4315_v50 }
  0xd5   : > { %3674 = vmatmul.mubr.msk.bf16.vlgmr.msra.gmra.mrb[0].mxu1 %vm282_vm1, %v4418_v52 }
  0xd6   : > { %3876 = vmatpush3.bf16.msra.mxu1 %v4202_v3  ;;  %3826 = vmatmul.mubr.msk.bf16.gmra.mrb[16].mxu0 %vm282_vm1, %v4343_v62  ;;  %v3343_v3 = vld [vmem:[%s4219_s25 + $0x181] sm:$0xff] }
  0xd7   : > { %3677 = vmatprep.mubr.msk.bf16.mxu1 %vm282_vm1, %v4445_v5  ;;  %3829 = vmatprep.mubr.msk.bf16.mxu0 %vm282_vm1, %v4347_v0  ;;  %v2226_v19 = vpack.c.bf16 %v3344_v15, %v3343_v3 }
  0xdd   : > { %3678 = vmatmul.mubr.msk.bf16.gmra.mrb[4].mxu1 %vm282_vm1, %v4449_v7 }
  0xde   : > { %3830 = vmatmul.mubr.msk.bf16.gmra.mrb[20].mxu0 %vm282_vm1, %v4367_v12  ;;  %3681 = vmatprep.mubr.msk.bf16.mxu1 %vm282_vm1, %v4469_v24 }
  0xdf   : > { %3833 = vmatprep.mubr.msk.bf16.mxu0 %vm282_vm1, %v4371_v14 }
  0xe5   : > { %3682 = vmatmul.mubr.msk.bf16.gmra.mrb[8].mxu1 %vm282_vm1, %v4473_v28 }
  0xe6   : > { %3834 = vmatmul.mubr.msk.bf16.gmra.mrb[24].mxu0 %vm282_vm1, %v4391_v29  ;;  %3685 = vmatprep.mubr.msk.bf16.mxu1 %vm282_vm1, %v4491_v43 }
  0xe7   : > { %3837 = vmatprep.mubr.msk.bf16.mxu0 %vm282_vm1, %v2226_v19 }
  0xed   : > { %3686 = vmatmul.mubr.msk.bf16.gmra.mrb[12].mxu1 %vm282_vm1, %v4495_v47 }
  0xee   : > { %3838 = vmatmul.mubr.msk.bf16.gmra.mrb[28].mxu0 %vm282_vm1, %v2227_v32  ;;  %3689 = vmatprep.mubr.msk.bf16.mxu1 %vm282_vm1, %v4509_v59 }
  0xef   : > { %3843 = vmatprep.mubr.msk.bf16.mxu0 %vm282_vm1, %v4313_v49 }
  0xf5   : > { %3690 = vmatmul.mubr.msk.bf16.gmra.mrb[16].mxu1 %vm282_vm1, %v4511_v60 }
  0xf6   : > { %3844 = vmatmul.mubr.msk.bf16.vlgmr.msra.gmra.mrb[0].mxu0 %vm282_vm1, %v4317_v51  ;;  %3693 = vmatprep.mubr.msk.bf16.mxu1 %vm282_vm1, %v4531_v17 }
  0xf7   : > { %3847 = vmatprep.mubr.msk.bf16.mxu0 %vm282_vm1, %v4345_v63 }
  0xfd   : > { %3694 = vmatmul.mubr.msk.bf16.gmra.mrb[20].mxu1 %vm282_vm1, %v4533_v18 }
  0xfe   : > { %3848 = vmatmul.mubr.msk.bf16.gmra.mrb[4].mxu0 %vm282_vm1, %v4349_v2  ;;  %3697 = vmatprep.mubr.msk.bf16.mxu1 %vm282_vm1, %v4547_v36 }
  0xff   : > { %3851 = vmatprep.mubr.msk.bf16.mxu0 %vm282_vm1, %v4369_v13 }
 0x105   : > { %3698 = vmatmul.mubr.msk.bf16.gmra.mrb[24].mxu1 %vm282_vm1, %v4549_v37 }
 0x106   : > { %3852 = vmatmul.mubr.msk.bf16.gmra.mrb[8].mxu0 %vm282_vm1, %v4373_v16  ;;  %3701 = vmatprep.mubr.msk.bf16.mxu1 %vm282_vm1, %v4563_v57 }
 0x107   : > { %3855 = vmatprep.mubr.msk.bf16.mxu0 %vm282_vm1, %v4393_v30 }
 0x10d   : > { %3702 = vmatmul.mubr.msk.bf16.gmra.mrb[28].mxu1 %vm282_vm1, %v4594_v61 }
 0x10e   : > { %3856 = vmatmul.mubr.msk.bf16.gmra.mrb[12].mxu0 %vm282_vm1, %v4395_v34  ;;  %3723 = vmatprep.mubr.msk.bf16.mxu1 %vm282_vm1, %v4311_v48  ;;  %v2521_v48 = vpack.c.bf16 %v3395_v38, %v3394_v33 }
 0x10f   : > { %3859 = vmatprep.mubr.msk.bf16.mxu0 %vm282_vm1, %v4414_v46 }
 0x115   : > { %3724 = vmatmul.mubr.msk.bf16.vlgmr.msra.gmra.mrb[16].mxu1 %vm282_vm1, %v4315_v50 }
 0x116   : > { %3860 = vmatmul.mubr.msk.bf16.gmra.mrb[16].mxu0 %vm282_vm1, %v4420_v54  ;;  %3727 = vmatprep.mubr.msk.bf16.mxu1 %vm282_vm1, %v4343_v62 }
 0x117   : > { %3863 = vmatprep.mubr.msk.bf16.mxu0 %vm282_vm1, %v4447_v6 }
 0x11d   : > { %3728 = vmatmul.mubr.msk.bf16.gmra.mrb[20].mxu1 %vm282_vm1, %v4347_v0 }
 0x11e   : > { %3864 = vmatmul.mubr.msk.bf16.gmra.mrb[20].mxu0 %vm282_vm1, %v4451_v8  ;;  %3731 = vmatprep.mubr.msk.bf16.mxu1 %vm282_vm1, %v4367_v12 }
 0x11f   : > { %3867 = vmatprep.mubr.msk.bf16.mxu0 %vm282_vm1, %v4471_v25 }
 0x125   : > { %3732 = vmatmul.mubr.msk.bf16.gmra.mrb[24].mxu1 %vm282_vm1, %v4371_v14 }
 0x126   : > { %3868 = vmatmul.mubr.msk.bf16.gmra.mrb[24].mxu0 %vm282_vm1, %v4475_v31  ;;  %3735 = vmatprep.mubr.msk.bf16.mxu1 %vm282_vm1, %v4391_v29 }
 0x127   : > { %3871 = vmatprep.mubr.msk.bf16.mxu0 %vm282_vm1, %v4493_v44 }
 0x12d   : > { %3736 = vmatmul.mubr.msk.bf16.gmra.mrb[28].mxu1 %vm282_vm1, %v2226_v19 }
 0x12e   : > { %3872 = vmatmul.mubr.msk.bf16.gmra.mrb[28].mxu0 %vm282_vm1, %v2521_v48 }
 0x1a8   : > { %v3675_v49 = vpop.f32.mrb[0].mxu1 }
 0x1a9   : > { %v1138_v50 = vpop.f32.mrb[1].mxu1 }
 0x1aa   : > { %v3676_v51 = vpop.f32.mrb[2].mxu1 }
 0x1ab   : > { %v1141_v62 = vpop.f32.mrb[3].mxu1 }
 0x1b0   : > { %v3679_v63 = vpop.f32.mrb[4].mxu1 }
 0x1b1   : > { %v1154_v0 = vpop.f32.mrb[5].mxu1 }
 0x1b2   : > { %v3680_v2 = vpop.f32.mrb[6].mxu1 }
 0x1b3   : > { %v1157_v12 = vpop.f32.mrb[7].mxu1 }
 0x1b8   : > { %v4741_v13 = vpop.f32.mrb[8].mxu1 }
 0x1b9   : > { %v4743_v14 = vpop.f32.mrb[9].mxu1 }
 0x1ba   : > { %v4745_v16 = vpop.f32.mrb[10].mxu1 }
 0x1bb   : > { %v4747_v29 = vpop.f32.mrb[11].mxu1 }
 0x1c0   : > { %v4749_v30 = vpop.f32.mrb[12].mxu1 }
 0x1c1   : > { %v4751_v34 = vpop.f32.mrb[13].mxu1 }
 0x1c2   : > { %v4753_v45 = vpop.f32.mrb[14].mxu1 }
 0x1c3   : > { %v4755_v46 = vpop.f32.mrb[15].mxu1 }
 0x1c9   : > { %v3845_v52 = vpop.f32.mrb[0].mxu0 }
 0x1ca   : > { %v3877_v54 = vadd.f32 %v3845_v52, %v3675_v49  ;;  %v2609_v5 = vpop.f32.mrb[1].mxu0 }
 0x1cb   : > { %v3878_v6 = vadd.f32 %v2609_v5, %v1138_v50  ;;  %v3846_v7 = vpop.f32.mrb[2].mxu0 }
 0x1cc   : > { %2771 = vst.msk [vmem:[%s4761_s14 + $0x10] sm:$0xff] %vm2768_vm2, %v3877_v54  ;;  %v3879_v8 = vadd.f32 %v3846_v7, %v3676_v51  ;;  %v2612_v24 = vpop.f32.mrb[3].mxu0  ;;  %v2874_v31 = vmul.f32 %v3877_v54, %v3877_v54  ;;  %v2804_v4 = vsel %vm2768_vm2, %v3877_v54, 0.0 }
 0x1cd   : > { %2769 = vst.msk [vmem:[%s4761_s14] sm:$0xff] %vm2768_vm2, %v3878_v6  ;;  %v2872_v25 = vmul.f32 %v3878_v6, %v3878_v6  ;;  %v3880_v28 = vadd.f32 %v2612_v24, %v1141_v62  ;;  %v2801_v43 = vsel %vm2768_vm2, %v3878_v6, 0.0 }
 0x1ce   : > { %2772 = vst.msk [vmem:[%s4761_s14 + $0x18] sm:$0xff] %vm2768_vm2, %v3879_v8  ;;  %v2875_v59 = vmul.f32 %v3879_v8, %v3879_v8  ;;  %v2907_v36 = vsel %vm2768_vm2, %v2874_v31, 0.0  ;;  %v2806_v37 = vsel %vm2768_vm2, %v3879_v8, 0.0 }
 0x1cf   : > { %2770 = vst.msk [vmem:[%s4761_s14 + $0x8] sm:$0xff] %vm2768_vm2, %v3880_v28  ;;  %v2802_v44 = vsel %vm2768_vm2, %v3880_v28, 0.0  ;;  %v2873_v47 = vmul.f32 %v3880_v28, %v3880_v28  ;;  %v2904_v11 = vsel %vm2768_vm2, %v2872_v25, 0.0 }
 0x1d0   : > { %v2803_v60 = vadd.f32 %v2802_v44, %v2801_v43  ;;  %v2909_v42 = vsel %vm2768_vm2, %v2875_v59, 0.0 }
 0x1d1   : > { %v2905_v17 = vsel %vm2768_vm2, %v2873_v47, 0.0  ;;  %v3849_v18 = vpop.f32.mrb[4].mxu0 }
 0x1d2   : > { %v2805_v20 = vadd.f32 %v2804_v4, %v2803_v60  ;;  %v2906_v22 = vadd.f32 %v2905_v17, %v2904_v11  ;;  %v3881_v23 = vadd.f32 %v3849_v18, %v3679_v63  ;;  %v2625_v35 = vpop.f32.mrb[5].mxu0 }
 0x1d3   : > { %v3882_v40 = vadd.f32 %v2625_v35, %v1154_v0  ;;  %v3850_v41 = vpop.f32.mrb[6].mxu0 }
 0x1d4   : > { %v2908_v56 = vadd.f32 %v2907_v36, %v2906_v22  ;;  %2775 = vst.msk [vmem:[%s4761_s14 + $0x30] sm:$0xff] %vm2768_vm2, %v3881_v23  ;;  %v2807_v57 = vadd.f32 %v2806_v37, %v2805_v20  ;;  %v2628_v21 = vpop.f32.mrb[7].mxu0  ;;  %v3883_v55 = vadd.f32 %v3850_v41, %v3680_v2  ;;  %v2878_v3 = vmul.f32 %v3881_v23, %v3881_v23 }
 0x1d5   : > { %2773 = vst.msk [vmem:[%s4761_s14 + $0x20] sm:$0xff] %vm2768_vm2, %v3882_v40  ;;  %v2808_v58 = vsel %vm2768_vm2, %v3882_v40, 0.0  ;;  %v2876_v39 = vmul.f32 %v3882_v40, %v3882_v40  ;;  %v3884_v61 = vadd.f32 %v2628_v21, %v1157_v12  ;;  %v2812_v27 = vsel %vm2768_vm2, %v3881_v23, 0.0 }
 0x1d6   : > { %v2809_v1 = vadd.f32 %v2808_v58, %v2807_v57  ;;  %v2910_v9 = vadd.f32 %v2909_v42, %v2908_v56  ;;  %2776 = vst.msk [vmem:[%s4761_s14 + $0x38] sm:$0xff] %vm2768_vm2, %v3883_v55  ;;  %v2879_v33 = vmul.f32 %v3883_v55, %v3883_v55  ;;  %v2814_v51 = vsel %vm2768_vm2, %v3883_v55, 0.0 }
 0x1d7   : > { %v2911_v10 = vsel %vm2768_vm2, %v2876_v39, 0.0  ;;  %2774 = vst.msk [vmem:[%s4761_s14 + $0x28] sm:$0xff] %vm2768_vm2, %v3884_v61  ;;  %v2810_v53 = vsel %vm2768_vm2, %v3884_v61, 0.0  ;;  %v2877_v26 = vmul.f32 %v3884_v61, %v3884_v61  ;;  %v2915_v2 = vsel %vm2768_vm2, %v2878_v3, 0.0 }
 0x1d8   : > { %v2912_v15 = vadd.f32 %v2911_v10, %v2910_v9  ;;  %v2811_v19 = vadd.f32 %v2810_v53, %v2809_v1 }
 0x1d9   : > { %v3853_v32 = vpop.f32.mrb[8].mxu0  ;;  %v2913_v48 = vsel %vm2768_vm2, %v2877_v26, 0.0 }
 0x1da   : > { %v2813_v38 = vadd.f32 %v2812_v27, %v2811_v19  ;;  %v3885_v49 = vadd.f32 %v3853_v32, %v4741_v13  ;;  %v2641_v50 = vpop.f32.mrb[9].mxu0  ;;  %v2914_v62 = vadd.f32 %v2913_v48, %v2912_v15 }
 0x1db   : > { %v3886_v63 = vadd.f32 %v2641_v50, %v4743_v14  ;;  %v3854_v0 = vpop.f32.mrb[10].mxu0  ;;  %v2917_v14 = vsel %vm2768_vm2, %v2879_v33, 0.0 }
 0x1dc   : > { %2779 = vst.msk [vmem:[%s4761_s14 + $0x50] sm:$0xff] %vm2768_vm2, %v3885_v49  ;;  %v2815_v12 = vadd.f32 %v2814_v51, %v2813_v38  ;;  %v3887_v52 = vadd.f32 %v3854_v0, %v4745_v16  ;;  %v2644_v54 = vpop.f32.mrb[11].mxu0  ;;  %v2916_v5 = vadd.f32 %v2915_v2, %v2914_v62  ;;  %v2882_v31 = vmul.f32 %v3885_v49, %v3885_v49 }
 0x1dd   : > { %2777 = vst.msk [vmem:[%s4761_s14 + $0x40] sm:$0xff] %vm2768_vm2, %v3886_v63  ;;  %v2816_v13 = vsel %vm2768_vm2, %v3886_v63, 0.0  ;;  %v2880_v6 = vmul.f32 %v3886_v63, %v3886_v63  ;;  %v3888_v7 = vadd.f32 %v2644_v54, %v4747_v29  ;;  %v2820_v44 = vsel %vm2768_vm2, %v3885_v49, 0.0 }
 0x1de   : > { %v2817_v8 = vadd.f32 %v2816_v13, %v2815_v12  ;;  %2780 = vst.msk [vmem:[%s4761_s14 + $0x58] sm:$0xff] %vm2768_vm2, %v3887_v52  ;;  %v2918_v24 = vadd.f32 %v2917_v14, %v2916_v5  ;;  %v2883_v60 = vmul.f32 %v3887_v52, %v3887_v52  ;;  %v2822_v18 = vsel %vm2768_vm2, %v3887_v52, 0.0 }
 0x1df   : > { %v2919_v25 = vsel %vm2768_vm2, %v2880_v6, 0.0  ;;  %2778 = vst.msk [vmem:[%s4761_s14 + $0x48] sm:$0xff] %vm2768_vm2, %v3888_v7  ;;  %v2818_v16 = vsel %vm2768_vm2, %v3888_v7, 0.0  ;;  %v2881_v28 = vmul.f32 %v3888_v7, %v3888_v7  ;;  %v2923_v35 = vsel %vm2768_vm2, %v2882_v31, 0.0 }
 0x1e0   : > { %v2819_v43 = vadd.f32 %v2818_v16, %v2817_v8  ;;  %v2920_v47 = vadd.f32 %v2919_v25, %v2918_v24 }
 0x1e1   : > { %v2921_v29 = vsel %vm2768_vm2, %v2881_v28, 0.0  ;;  %v3857_v59 = vpop.f32.mrb[12].mxu0 }
 0x1e2   : > { %v2821_v4 = vadd.f32 %v2820_v44, %v2819_v43  ;;  %v3889_v11 = vadd.f32 %v3857_v59, %v4749_v30  ;;  %v2657_v17 = vpop.f32.mrb[13].mxu0  ;;  %v2922_v20 = vadd.f32 %v2921_v29, %v2920_v47 }
 0x1e3   : > { %v3890_v22 = vadd.f32 %v2657_v17, %v4751_v34  ;;  %v3858_v23 = vpop.f32.mrb[14].mxu0  ;;  %v2925_v34 = vsel %vm2768_vm2, %v2883_v60, 0.0 }
 0x1e4   : > { %2783 = vst.msk [vmem:[%s4761_s14 + $0x70] sm:$0xff] %vm2768_vm2, %v3889_v11  ;;  %v2823_v36 = vadd.f32 %v2822_v18, %v2821_v4  ;;  %v3891_v37 = vadd.f32 %v3858_v23, %v4753_v45  ;;  %v2660_v40 = vpop.f32.mrb[15].mxu0  ;;  %v2924_v41 = vadd.f32 %v2923_v35, %v2922_v20  ;;  %v2886_v55 = vmul.f32 %v3889_v11, %v3889_v11 }
 0x1e5   : > { %2781 = vst.msk [vmem:[%s4761_s14 + $0x60] sm:$0xff] %vm2768_vm2, %v3890_v22  ;;  %v2824_v30 = vsel %vm2768_vm2, %v3890_v22, 0.0  ;;  %v2884_v42 = vmul.f32 %v3890_v22, %v3890_v22  ;;  %v3892_v56 = vadd.f32 %v2660_v40, %v4755_v46  ;;  %v2828_v9 = vsel %vm2768_vm2, %v3889_v11, 0.0 }
 0x1e6   : > { %v2825_v57 = vadd.f32 %v2824_v30, %v2823_v36  ;;  %2784 = vst.msk [vmem:[%s4761_s14 + $0x78] sm:$0xff] %vm2768_vm2, %v3891_v37  ;;  %v2926_v21 = vadd.f32 %v2925_v34, %v2924_v41  ;;  %v2887_v15 = vmul.f32 %v3891_v37, %v3891_v37  ;;  %v2830_v33 = vsel %vm2768_vm2, %v3891_v37, 0.0 }
 0x1e7   : > { %v2927_v58 = vsel %vm2768_vm2, %v2884_v42, 0.0  ;;  %2782 = vst.msk [vmem:[%s4761_s14 + $0x68] sm:$0xff] %vm2768_vm2, %v3892_v56  ;;  %v2826_v45 = vsel %vm2768_vm2, %v3892_v56, 0.0  ;;  %v2885_v39 = vmul.f32 %v3892_v56, %v3892_v56  ;;  %v2931_v51 = vsel %vm2768_vm2, %v2886_v55, 0.0 }
 0x1e8   : > { %v2827_v61 = vadd.f32 %v2826_v45, %v2825_v57  ;;  %v3725_v1 = vpop.f32.mrb[16].mxu1  ;;  %v2928_v46 = vadd.f32 %v2927_v58, %v2926_v21  ;;  %v2933_v5 = vsel %vm2768_vm2, %v2887_v15, 0.0 }
 0x1e9   : > { %v2929_v10 = vsel %vm2768_vm2, %v2885_v39, 0.0  ;;  %v3861_v53 = vpop.f32.mrb[16].mxu0  ;;  %v1496_v3 = vpop.f32.mrb[17].mxu1 }
 0x1ea   : > { %v2829_v19 = vadd.f32 %v2828_v9, %v2827_v61  ;;  %v3893_v26 = vadd.f32 %v3861_v53, %v3725_v1  ;;  %v2673_v27 = vpop.f32.mrb[17].mxu0  ;;  %v3726_v32 = vpop.f32.mrb[18].mxu1  ;;  %v2930_v38 = vadd.f32 %v2929_v10, %v2928_v46 }
 0x1eb   : > { %v3894_v48 = vadd.f32 %v2673_v27, %v1496_v3  ;;  %v3862_v49 = vpop.f32.mrb[18].mxu0  ;;  %v1499_v50 = vpop.f32.mrb[19].mxu1 }
 0x1ec   : > { %2787 = vst.msk [vmem:[%s4761_s14 + $0x90] sm:$0xff] %vm2768_vm2, %v3893_v26  ;;  %v2831_v62 = vadd.f32 %v2830_v33, %v2829_v19  ;;  %v3895_v63 = vadd.f32 %v3862_v49, %v3726_v32  ;;  %v2676_v0 = vpop.f32.mrb[19].mxu0  ;;  %v2932_v2 = vadd.f32 %v2931_v51, %v2930_v38  ;;  %v2890_v24 = vmul.f32 %v3893_v26, %v3893_v26 }
 0x1ed   : > { %2785 = vst.msk [vmem:[%s4761_s14 + $0x80] sm:$0xff] %vm2768_vm2, %v3894_v48  ;;  %v2832_v12 = vsel %vm2768_vm2, %v3894_v48, 0.0  ;;  %v2888_v52 = vmul.f32 %v3894_v48, %v3894_v48  ;;  %v3896_v54 = vadd.f32 %v2676_v0, %v1499_v50  ;;  %v2836_v28 = vsel %vm2768_vm2, %v3893_v26, 0.0 }
 0x1ee   : > { %v2833_v13 = vadd.f32 %v2832_v12, %v2831_v62  ;;  %2788 = vst.msk [vmem:[%s4761_s14 + $0x98] sm:$0xff] %vm2768_vm2, %v3895_v63  ;;  %v2934_v6 = vadd.f32 %v2933_v5, %v2932_v2  ;;  %v2891_v29 = vmul.f32 %v3895_v63, %v3895_v63  ;;  %v2838_v17 = vsel %vm2768_vm2, %v3895_v63, 0.0 }
 0x1ef   : > { %v2935_v7 = vsel %vm2768_vm2, %v2888_v52, 0.0  ;;  %2786 = vst.msk [vmem:[%s4761_s14 + $0x88] sm:$0xff] %vm2768_vm2, %v3896_v54  ;;  %v2834_v14 = vsel %vm2768_vm2, %v3896_v54, 0.0  ;;  %v2889_v8 = vmul.f32 %v3896_v54, %v3896_v54  ;;  %v2939_v35 = vsel %vm2768_vm2, %v2890_v24, 0.0 }
 0x1f0   : > { %v2835_v25 = vadd.f32 %v2834_v14, %v2833_v13  ;;  %v3729_v16 = vpop.f32.mrb[20].mxu1  ;;  %v2936_v31 = vadd.f32 %v2935_v7, %v2934_v6  ;;  %v2941_v34 = vsel %vm2768_vm2, %v2891_v29, 0.0 }
 0x1f1   : > { %v2937_v43 = vsel %vm2768_vm2, %v2889_v8, 0.0  ;;  %v3865_v44 = vpop.f32.mrb[20].mxu0  ;;  %v1512_v47 = vpop.f32.mrb[21].mxu1 }
 0x1f2   : > { %v2837_v59 = vadd.f32 %v2836_v28, %v2835_v25  ;;  %v3897_v60 = vadd.f32 %v3865_v44, %v3729_v16  ;;  %v2689_v4 = vpop.f32.mrb[21].mxu0  ;;  %v3730_v11 = vpop.f32.mrb[22].mxu1  ;;  %v2938_v18 = vadd.f32 %v2937_v43, %v2936_v31 }
 0x1f3   : > { %v3898_v20 = vadd.f32 %v2689_v4, %v1512_v47  ;;  %v3866_v22 = vpop.f32.mrb[22].mxu0  ;;  %v1515_v23 = vpop.f32.mrb[23].mxu1 }
 0x1f4   : > { %2791 = vst.msk [vmem:[%s4761_s14 + $0xb0] sm:$0xff] %vm2768_vm2, %v3897_v60  ;;  %v2839_v36 = vadd.f32 %v2838_v17, %v2837_v59  ;;  %v3899_v37 = vadd.f32 %v3866_v22, %v3730_v11  ;;  %v2692_v40 = vpop.f32.mrb[23].mxu0  ;;  %v2940_v41 = vadd.f32 %v2939_v35, %v2938_v18  ;;  %v2894_v55 = vmul.f32 %v3897_v60, %v3897_v60 }
 0x1f5   : > { %2789 = vst.msk [vmem:[%s4761_s14 + $0xa0] sm:$0xff] %vm2768_vm2, %v3898_v20  ;;  %v2840_v30 = vsel %vm2768_vm2, %v3898_v20, 0.0  ;;  %v2892_v42 = vmul.f32 %v3898_v20, %v3898_v20  ;;  %v3900_v56 = vadd.f32 %v2692_v40, %v1515_v23  ;;  %v2844_v9 = vsel %vm2768_vm2, %v3897_v60, 0.0 }
 0x1f6   : > { %v2841_v57 = vadd.f32 %v2840_v30, %v2839_v36  ;;  %2792 = vst.msk [vmem:[%s4761_s14 + $0xb8] sm:$0xff] %vm2768_vm2, %v3899_v37  ;;  %v2942_v21 = vadd.f32 %v2941_v34, %v2940_v41  ;;  %v2895_v15 = vmul.f32 %v3899_v37, %v3899_v37  ;;  %v2846_v33 = vsel %vm2768_vm2, %v3899_v37, 0.0 }
 0x1f7   : > { %v2943_v58 = vsel %vm2768_vm2, %v2892_v42, 0.0  ;;  %2790 = vst.msk [vmem:[%s4761_s14 + $0xa8] sm:$0xff] %vm2768_vm2, %v3900_v56  ;;  %v2842_v45 = vsel %vm2768_vm2, %v3900_v56, 0.0  ;;  %v2893_v39 = vmul.f32 %v3900_v56, %v3900_v56  ;;  %v2947_v51 = vsel %vm2768_vm2, %v2894_v55, 0.0 }
 0x1f8   : > { %v2843_v61 = vadd.f32 %v2842_v45, %v2841_v57  ;;  %v3733_v1 = vpop.f32.mrb[24].mxu1  ;;  %v2944_v46 = vadd.f32 %v2943_v58, %v2942_v21  ;;  %v2949_v5 = vsel %vm2768_vm2, %v2895_v15, 0.0 }
 0x1f9   : > { %v2945_v10 = vsel %vm2768_vm2, %v2893_v39, 0.0  ;;  %v3869_v53 = vpop.f32.mrb[24].mxu0  ;;  %v1528_v3 = vpop.f32.mrb[25].mxu1 }
 0x1fa   : > { %v2845_v19 = vadd.f32 %v2844_v9, %v2843_v61  ;;  %v3901_v26 = vadd.f32 %v3869_v53, %v3733_v1  ;;  %v2705_v27 = vpop.f32.mrb[25].mxu0  ;;  %v3734_v32 = vpop.f32.mrb[26].mxu1  ;;  %v2946_v38 = vadd.f32 %v2945_v10, %v2944_v46 }
 0x1fb   : > { %v3902_v48 = vadd.f32 %v2705_v27, %v1528_v3  ;;  %v3870_v49 = vpop.f32.mrb[26].mxu0  ;;  %v1531_v50 = vpop.f32.mrb[27].mxu1 }
 0x1fc   : > { %2795 = vst.msk [vmem:[%s4761_s14 + $0xd0] sm:$0xff] %vm2768_vm2, %v3901_v26  ;;  %v2847_v62 = vadd.f32 %v2846_v33, %v2845_v19  ;;  %v3903_v63 = vadd.f32 %v3870_v49, %v3734_v32  ;;  %v2708_v0 = vpop.f32.mrb[27].mxu0  ;;  %v2948_v2 = vadd.f32 %v2947_v51, %v2946_v38  ;;  %v2898_v24 = vmul.f32 %v3901_v26, %v3901_v26 }
 0x1fd   : > { %2793 = vst.msk [vmem:[%s4761_s14 + $0xc0] sm:$0xff] %vm2768_vm2, %v3902_v48  ;;  %v2848_v12 = vsel %vm2768_vm2, %v3902_v48, 0.0  ;;  %v2896_v52 = vmul.f32 %v3902_v48, %v3902_v48  ;;  %v3904_v54 = vadd.f32 %v2708_v0, %v1531_v50  ;;  %v2852_v28 = vsel %vm2768_vm2, %v3901_v26, 0.0 }
 0x1fe   : > { %v2849_v13 = vadd.f32 %v2848_v12, %v2847_v62  ;;  %2796 = vst.msk [vmem:[%s4761_s14 + $0xd8] sm:$0xff] %vm2768_vm2, %v3903_v63  ;;  %v2950_v6 = vadd.f32 %v2949_v5, %v2948_v2  ;;  %v2899_v29 = vmul.f32 %v3903_v63, %v3903_v63  ;;  %v2854_v17 = vsel %vm2768_vm2, %v3903_v63, 0.0 }
 0x1ff   : > { %v2951_v7 = vsel %vm2768_vm2, %v2896_v52, 0.0  ;;  %2794 = vst.msk [vmem:[%s4761_s14 + $0xc8] sm:$0xff] %vm2768_vm2, %v3904_v54  ;;  %v2850_v14 = vsel %vm2768_vm2, %v3904_v54, 0.0  ;;  %v2897_v8 = vmul.f32 %v3904_v54, %v3904_v54  ;;  %v2955_v35 = vsel %vm2768_vm2, %v2898_v24, 0.0 }
 0x200   : > { %v2851_v25 = vadd.f32 %v2850_v14, %v2849_v13  ;;  %v3737_v16 = vpop.f32.mrb[28].mxu1  ;;  %v2952_v31 = vadd.f32 %v2951_v7, %v2950_v6  ;;  %v2957_v57 = vsel %vm2768_vm2, %v2899_v29, 0.0 }
 0x201   : > { %v2953_v43 = vsel %vm2768_vm2, %v2897_v8, 0.0  ;;  %v3873_v44 = vpop.f32.mrb[28].mxu0  ;;  %v1544_v47 = vpop.f32.mrb[29].mxu1 }
 0x202   : > { %v2853_v59 = vadd.f32 %v2852_v28, %v2851_v25  ;;  %v3905_v60 = vadd.f32 %v3873_v44, %v3737_v16  ;;  %v2721_v4 = vpop.f32.mrb[29].mxu0  ;;  %v3738_v11 = vpop.f32.mrb[30].mxu1  ;;  %v2954_v18 = vadd.f32 %v2953_v43, %v2952_v31 }
 0x203   : > { %v3906_v20 = vadd.f32 %v2721_v4, %v1544_v47  ;;  %v3874_v22 = vpop.f32.mrb[30].mxu0  ;;  %v1547_v23 = vpop.f32.mrb[31].mxu1 }
 0x204   : > { %2799 = vst.msk [vmem:[%s4761_s14 + $0xf0] sm:$0xff] %vm2768_vm2, %v3905_v60  ;;  %v2902_v36 = vmul.f32 %v3905_v60, %v3905_v60  ;;  %v2855_v37 = vadd.f32 %v2854_v17, %v2853_v59  ;;  %v3907_v40 = vadd.f32 %v3874_v22, %v3738_v11  ;;  %v2724_v41 = vpop.f32.mrb[31].mxu0  ;;  %v2956_v30 = vadd.f32 %v2955_v35, %v2954_v18 }
 0x205   : > { %2797 = vst.msk [vmem:[%s4761_s14 + $0xe0] sm:$0xff] %vm2768_vm2, %v3906_v20  ;;  %v2856_v42 = vsel %vm2768_vm2, %v3906_v20, 0.0  ;;  %v2900_v56 = vmul.f32 %v3906_v20, %v3906_v20  ;;  %v3908_v34 = vadd.f32 %v2724_v41, %v1547_v23  ;;  %v2860_v10 = vsel %vm2768_vm2, %v3905_v60, 0.0 }
 0x206   : > { %v2963_v21 = vsel %vm2768_vm2, %v2902_v36, 0.0  ;;  %v2857_v58 = vadd.f32 %v2856_v42, %v2855_v37  ;;  %2800 = vst.msk [vmem:[%s4761_s14 + $0xf8] sm:$0xff] %vm2768_vm2, %v3907_v40  ;;  %v2903_v45 = vmul.f32 %v3907_v40, %v3907_v40  ;;  %v2958_v39 = vadd.f32 %v2957_v57, %v2956_v30 }
 0x207   : > { %v2959_v55 = vsel %vm2768_vm2, %v2900_v56, 0.0  ;;  %2798 = vst.msk [vmem:[%s4761_s14 + $0xe8] sm:$0xff] %vm2768_vm2, %v3908_v34  ;;  %v2858_v61 = vsel %vm2768_vm2, %v3908_v34, 0.0  ;;  %v2901_v1 = vmul.f32 %v3908_v34, %v3908_v34  ;;  %v2862_v19 = vsel %vm2768_vm2, %v3907_v40, 0.0 }
 0x208   : > { %v2965_v9 = vsel %vm2768_vm2, %v2903_v45, 0.0  ;;  %v2859_v46 = vadd.f32 %v2858_v61, %v2857_v58  ;;  %v2960_v53 = vadd.f32 %v2959_v55, %v2958_v39 }
 0x209   : > { %v2961_v3 = vsel %vm2768_vm2, %v2901_v1, 0.0 }
 0x20a   : > { %v2861_v15 = vadd.f32 %v2860_v10, %v2859_v46  ;;  %v2962_v26 = vadd.f32 %v2961_v3, %v2960_v53 }
 0x20c   : > { %v2863_v27 = vadd.f32 %v2862_v19, %v2861_v15  ;;  %v2964_v32 = vadd.f32 %v2963_v21, %v2962_v26 }
 0x20e   : > { %v2864_v33 = vrot.slane %v2863_v27, 4  ;;  %v2966_v38 = vadd.f32 %v2965_v9, %v2964_v32 }
 0x210   : > { %v2865_v48 = vadd.f32 %v2864_v33, %v2863_v27  ;;  %v2967_v49 = vrot.slane %v2966_v38, 4 }
 0x212   : > { %v2866_v50 = vrot.slane %v2865_v48, 2  ;;  %v2968_v51 = vadd.f32 %v2967_v49, %v2966_v38 }
 0x214   : > { %v2867_v62 = vadd.f32 %v2866_v50, %v2865_v48  ;;  %v2969_v63 = vrot.slane %v2968_v51, 2 }
 0x216   : > { %v2868_v0 = vrot.slane %v2867_v62, 1  ;;  %v2970_v2 = vadd.f32 %v2969_v63, %v2968_v51 }
 0x218   : > { %v2869_v12 = vadd.f32 %v2868_v0, %v2867_v62  ;;  %v2971_v52 = vrot.slane %v2970_v2, 1 }
 0x21a   : > { %2871 = vst.msk [vmem:[%s181_s18] sm:$0x1] %vm2870_vm3, %v2869_v12  ;;  %v2972_v54 = vadd.f32 %v2971_v52, %v2970_v2 }
 0x21c   : > { %2973 = vst.msk [vmem:[%s181_s18 + $0x1] sm:$0x1] %vm2870_vm3, %v2972_v54 }
 0x21d PF: > { %s14_s12 = sadd.s32 1, %s4158_s12  }
 0x21e   : > { %p11_p4 = scmp.ge.s32.totalorder %s14_s12, 4  }
 0x220   :  { %13 = sbr.rel (!%p11_p4) target bundleno = 1 (0x1), region = 80 }

// kernel: down_sample_forward.4
= control target key start
LH: loop header
LB: loop body
LE: loop exit
PB: predicated region body
PF: predicated region fallthrough
CT: control target
= control target key end

     0   :  { %s4238_s15 = smov 0   ;;  %s5057_s0 = inlined_call_operand.vmem [shape: f32[2,16,16,8], index: 0, kind: input, shape index: {}]   ;;  %s5058_s1 = inlined_call_operand.vmem [shape: f32[2,8], index: 1, kind: input, shape index: {}]   ;;  %s5059_s2 = inlined_call_operand.vmem [shape: bf16[9,8,8], index: 2, kind: input, shape index: {}]   ;;  %s5060_s3 = inlined_call_operand.vmem [shape: f32[2,16,16,8], index: 3, kind: output, shape index: {0}]   ;;  %s5061_s4 = inlined_call_operand.vmem [shape: f32[2,2,8], index: 4, kind: output, shape index: {1}]  }
   0x1 LB: > { %s3300_s16 = sadd.s32 4294967295, %s4210_s15   ;;  %p3304_p0 = scmp.ge.s32.totalorder %s4210_s15, 1  ;;  %s4210_s15 = sphi %s4238_s15, %s15_s15  }
   0x2   : > { %p165_p1 = scmp.lt.s32.totalorder %s4210_s15, 3 }
   0x4   : > { %p166_p2 = pnand %p3304_p0, %p165_p1 }
   0x5   : > { %v3312_v0 = vld [vmem:[%s5059_s2 + $0x4] sm:$0xf] (!%p166_p2)  ;;  %vm574_vm0 = vcmask (!%p166_p2), 1043456   ;;  %v4252_v1 = vld [vmem:[%s5059_s2 + $0x10] sm:$0xf] (!%p166_p2)  ;;  %vm348_vm1 = vcmask (!%p166_p2), 64512  }
   0x6   : > { %169 = sbr.rel (%p166_p2) target bundleno = 558 (0x22e), region = 32  ;;  %4185 = vmatprep.subr.msk.bf16.mxu1 (!%p166_p2), %vm574_vm0, %v3312_v0  ;;  %4189 = vmatprep.subr.msk.bf16.mxu0 (!%p166_p2), %vm574_vm0, %v4252_v1  ;;  %v576_v2 = vsel (!%p166_p2), %vm574_vm0, %v3312_v0, 0  ;;  %v4260_v3 = vsel (!%p166_p2), %vm574_vm0, %v4252_v1, 0  ;;  %vm351_vm2 = vcmask (!%p166_p2), 58368   ;;  %p4264_p3 = scmp.lt.s32.totalorder (!%p166_p2), %s3300_s16, 1  ;;  %v4212_v4 = vmov (!%p166_p2), 0.0  }
   0x7   : > { %3622 = vmatpush3.bf16.msra.mxu1 (!%p166_p2), %v576_v2  ;;  %3758 = vmatpush3.bf16.msra.mxu0 (!%p166_p2), %v4260_v3  ;;  %349 = vst.msk [vmem:[#allocation2] sm:$0xff] (!%p166_p2), %vm348_vm1, %v4212_v4  ;;  %350 = vst.msk [vmem:[#allocation2 + $0x8] sm:$0xff] (!%p166_p2), %vm348_vm1, %v4212_v4  ;;  %vm357_vm3 = vcmask (!%p166_p2), 57344   ;;  %v475_v5 = vld [vmem:[%s5059_s2] sm:$0xf] (!%p166_p2) }
   0x8   : > { %352 = vst.msk [vmem:[#allocation2 + $0x10] sm:$0x3] (!%p166_p2), %vm351_vm2, %v4212_v4  ;;  %356 = vst.msk [vmem:[#allocation2 + $0x1a8] sm:$0x3] (!%p166_p2), %vm351_vm2, %v4212_v4  ;;  %v3396_v6 = vld [vmem:[%s5059_s2 + $0x14] sm:$0xf] (!%p166_p2)  ;;  %4186 = vmatprep.subr.msk.bf16.mxu1 (!%p166_p2), %vm574_vm0, %v475_v5 }
   0x9   : > { %354 = vst.msk [vmem:[#allocation2 + $0x198] sm:$0xff] (!%p166_p2), %vm348_vm1, %v4212_v4  ;;  %355 = vst.msk [vmem:[#allocation2 + $0x1a0] sm:$0xff] (!%p166_p2), %vm348_vm1, %v4212_v4  ;;  %4191 = vmatprep.subr.msk.bf16.mxu0 (!%p166_p2), %vm574_vm0, %v3396_v6  ;;  %v4327_v7 = vld [vmem:[%s5058_s1] ss:$0 sm:$0xff] (!%p166_p2)  ;;  %v4339_v8 = vld [vmem:[%s5058_s1 + $0x1] ss:$0 sm:$0xff] (!%p166_p2) }
   0xa   : > { %358 = vst.msk [vmem:[#allocation2] sm:$0x1] (!%p166_p2), %vm357_vm3, %v4212_v4  ;;  %376 = vst.msk [vmem:[#allocation2 + $0x11] sm:$0x1] (!%p166_p2), %vm357_vm3, %v4212_v4  ;;  %v4347_v14 = vsel (!%p166_p2), %vm574_vm0, %v475_v5, 0  ;;  %v4355_v22 = vsel (!%p166_p2), %vm574_vm0, %v3396_v6, 0 }
   0xb   : > { %393 = vst.msk [vmem:[#allocation2 + $0x1a9] sm:$0x1] (!%p166_p2), %vm357_vm3, %v4212_v4  ;;  %359 = vst.msk [vmem:[#allocation2 + $0x18] sm:$0x1] (!%p166_p2), %vm357_vm3, %v4212_v4 }
   0xc   : > { %360 = vst.msk [vmem:[#allocation2 + $0x30] sm:$0x1] (!%p166_p2), %vm357_vm3, %v4212_v4  ;;  %361 = vst.msk [vmem:[#allocation2 + $0x48] sm:$0x1] (!%p166_p2), %vm357_vm3, %v4212_v4 }
   0xd   : > { %362 = vst.msk [vmem:[#allocation2 + $0x60] sm:$0x1] %vm357_vm3, %v4212_v4  ;;  %363 = vst.msk [vmem:[#allocation2 + $0x78] sm:$0x1] %vm357_vm3, %v4212_v4  ;;  %s5064_s16 = smov (!%p4264_p3, %s3300_s16), 1 }
   0xe   : > { %364 = vst.msk [vmem:[#allocation2 + $0x90] sm:$0x1] %vm357_vm3, %v4212_v4  ;;  %365 = vst.msk [vmem:[#allocation2 + $0xa8] sm:$0x1] %vm357_vm3, %v4212_v4  ;;  %s3466_s26 = sshll.u32 %s5064_s16, 8  ;;  %v476_v19 = vld [vmem:[#allocation2 + $0x1] sm:$0xff] }
   0xf   : > { %366 = vst.msk [vmem:[#allocation2 + $0xc0] sm:$0x1] %vm357_vm3, %v4212_v4  ;;  %367 = vst.msk [vmem:[#allocation2 + $0xd8] sm:$0x1] %vm357_vm3, %v4212_v4  ;;  %s4334_s5 = scalar_lea.vmem %s5057_s0, %s3466_s26  ;;  %v477_v20 = vld [vmem:[#allocation2 + $0x9] sm:$0xff]  ;;  %s4910_s22 = scalar_lea.vmem %s5060_s3, %s3466_s26 }
  0x10   : > { %368 = vst.msk [vmem:[#allocation2 + $0xf0] sm:$0x1] %vm357_vm3, %v4212_v4  ;;  %369 = vst.msk [vmem:[#allocation2 + $0x108] sm:$0x1] %vm357_vm3, %v4212_v4  ;;  %v212_v9 = vld [vmem:[%s4334_s5] sm:$0xff]  ;;  %v213_v10 = vld [vmem:[%s4334_s5 + $0x8] sm:$0xff]  ;;  %v508_v26 = vpack.c.bf16 %v477_v20, %v476_v19 }
  0x11   : > { %370 = vst.msk [vmem:[#allocation2 + $0x120] sm:$0x1] %vm357_vm3, %v4212_v4  ;;  %371 = vst.msk [vmem:[#allocation2 + $0x138] sm:$0x1] %vm357_vm3, %v4212_v4  ;;  %v214_v11 = vld [vmem:[%s4334_s5 + $0x10] sm:$0xff]  ;;  %v248_v12 = vmul.f32 %v4327_v7, %v212_v9  ;;  %v249_v13 = vmul.f32 %v4327_v7, %v213_v10  ;;  %v215_v15 = vld [vmem:[%s4334_s5 + $0x18] sm:$0xff] }
  0x12   : > { %372 = vst.msk [vmem:[#allocation2 + $0x150] sm:$0x1] %vm357_vm3, %v4212_v4  ;;  %373 = vst.msk [vmem:[#allocation2 + $0x168] sm:$0x1] %vm357_vm3, %v4212_v4  ;;  %v250_v16 = vmul.f32 %v4327_v7, %v214_v11  ;;  %v216_v17 = vld [vmem:[%s4334_s5 + $0x20] sm:$0xff]  ;;  %v217_v18 = vld [vmem:[%s4334_s5 + $0x28] sm:$0xff]  ;;  %v251_v21 = vmul.f32 %v4327_v7, %v215_v15  ;;  %3623 = vmatprep.mubr.msk.bf16.mxu1 %vm348_vm1, %v508_v26 }
  0x13   : > { %374 = vst.msk [vmem:[#allocation2 + $0x180] sm:$0x1] %vm357_vm3, %v4212_v4  ;;  %377 = vst.msk [vmem:[#allocation2 + $0x29] sm:$0x1] %vm357_vm3, %v4212_v4  ;;  %v252_v23 = vmul.f32 %v4327_v7, %v216_v17  ;;  %v253_v24 = vmul.f32 %v4327_v7, %v217_v18  ;;  %v218_v25 = vld [vmem:[%s4334_s5 + $0x30] sm:$0xff]  ;;  %v284_v27 = vadd.f32 %v4339_v8, %v248_v12  ;;  %v219_v30 = vld [vmem:[%s4334_s5 + $0x38] sm:$0xff] }
  0x14   : > { %378 = vst.msk [vmem:[#allocation2 + $0x41] sm:$0x1] %vm357_vm3, %v4212_v4  ;;  %379 = vst.msk [vmem:[#allocation2 + $0x59] sm:$0x1] %vm357_vm3, %v4212_v4  ;;  %v285_v28 = vadd.f32 %v4339_v8, %v249_v13  ;;  %v286_v29 = vadd.f32 %v4339_v8, %v250_v16  ;;  %v287_v31 = vadd.f32 %v4339_v8, %v251_v21  ;;  %v220_v35 = vld [vmem:[%s4334_s5 + $0x40] sm:$0xff]  ;;  %v221_v36 = vld [vmem:[%s4334_s5 + $0x48] sm:$0xff] }
  0x15   : > { %380 = vst.msk [vmem:[#allocation2 + $0x71] sm:$0x1] %vm357_vm3, %v4212_v4  ;;  %381 = vst.msk [vmem:[#allocation2 + $0x89] sm:$0x1] %vm357_vm3, %v4212_v4  ;;  %v288_v32 = vadd.f32 %v4339_v8, %v252_v23  ;;  %v289_v33 = vadd.f32 %v4339_v8, %v253_v24  ;;  %v254_v34 = vmul.f32 %v4327_v7, %v218_v25  ;;  %v222_v37 = vld [vmem:[%s4334_s5 + $0x50] sm:$0xff]  ;;  %v316_v38 = vmax.f32 %v284_v27, 0.0 }
  0x16   : > { %382 = vst.msk [vmem:[#allocation2 + $0xa1] sm:$0x1] %vm357_vm3, %v4212_v4  ;;  %383 = vst.msk [vmem:[#allocation2 + $0xb9] sm:$0x1] %vm357_vm3, %v4212_v4  ;;  %v317_v39 = vmax.f32 %v285_v28, 0.0  ;;  %v318_v40 = vmax.f32 %v286_v29, 0.0  ;;  %v255_v41 = vmul.f32 %v4327_v7, %v219_v30  ;;  %v256_v50 = vmul.f32 %v4327_v7, %v220_v35 }
  0x17   : > { %384 = vst.msk [vmem:[#allocation2 + $0xd1] sm:$0x1] %vm357_vm3, %v4212_v4  ;;  %385 = vst.msk [vmem:[#allocation2 + $0xe9] sm:$0x1] %vm357_vm3, %v4212_v4  ;;  %v223_v42 = vld [vmem:[%s4334_s5 + $0x58] sm:$0xff]  ;;  %v224_v43 = vld [vmem:[%s4334_s5 + $0x60] sm:$0xff]  ;;  %v290_v48 = vadd.f32 %v4339_v8, %v254_v34  ;;  %v257_v51 = vmul.f32 %v4327_v7, %v221_v36  ;;  %v258_v52 = vmul.f32 %v4327_v7, %v222_v37 }
  0x18   : > { %386 = vst.msk [vmem:[#allocation2 + $0x101] sm:$0x1] %vm357_vm3, %v4212_v4  ;;  %387 = vst.msk [vmem:[#allocation2 + $0x119] sm:$0x1] %vm357_vm3, %v4212_v4  ;;  %v225_v44 = vld [vmem:[%s4334_s5 + $0x68] sm:$0xff]  ;;  %v319_v45 = vmax.f32 %v287_v31, 0.0  ;;  %v291_v49 = vadd.f32 %v4339_v8, %v255_v41  ;;  %v259_v55 = vmul.f32 %v4327_v7, %v223_v42  ;;  %v260_v56 = vmul.f32 %v4327_v7, %v224_v43 }
  0x19   : > { %388 = vst.msk [vmem:[#allocation2 + $0x131] sm:$0x1] %vm357_vm3, %v4212_v4  ;;  %389 = vst.msk [vmem:[#allocation2 + $0x149] sm:$0x1] %vm357_vm3, %v4212_v4  ;;  %v320_v46 = vmax.f32 %v288_v32, 0.0  ;;  %v321_v47 = vmax.f32 %v289_v33, 0.0  ;;  %v261_v57 = vmul.f32 %v4327_v7, %v225_v44  ;;  %v292_v60 = vadd.f32 %v4339_v8, %v256_v50 }
  0x1a   : > { %390 = vst.msk [vmem:[#allocation2 + $0x161] sm:$0x1] %vm357_vm3, %v4212_v4  ;;  %391 = vst.msk [vmem:[#allocation2 + $0x179] sm:$0x1] %vm357_vm3, %v4212_v4  ;;  %v226_v53 = vld [vmem:[%s4334_s5 + $0x70] sm:$0xff]  ;;  %v322_v54 = vmax.f32 %v290_v48, 0.0  ;;  %v293_v61 = vadd.f32 %v4339_v8, %v257_v51  ;;  %v294_v62 = vadd.f32 %v4339_v8, %v258_v52  ;;  %v295_v63 = vadd.f32 %v4339_v8, %v259_v55 }
  0x1b   : > { %392 = vst.msk [vmem:[#allocation2 + $0x191] sm:$0x1] %vm357_vm3, %v4212_v4  ;;  %375 = vst.msk [vmem:[#allocation2 + $0x198] sm:$0x1] %vm357_vm3, %v4212_v4  ;;  %v227_v58 = vld [vmem:[%s4334_s5 + $0x78] sm:$0xff]  ;;  %v323_v59 = vmax.f32 %v291_v49, 0.0  ;;  %v296_v0 = vadd.f32 %v4339_v8, %v260_v56  ;;  %v297_v2 = vadd.f32 %v4339_v8, %v261_v57  ;;  %v262_v4 = vmul.f32 %v4327_v7, %v226_v53 }
  0x1c   : > { %395 = vst.msk [vmem:[#allocation2 + $0x19] sm:$0xff] %vm348_vm1, %v316_v38  ;;  %396 = vst.msk [vmem:[#allocation2 + $0x21] sm:$0xff] %vm348_vm1, %v317_v39  ;;  %v228_v5 = vld [vmem:[%s4334_s5 + $0x80] sm:$0xff]  ;;  %v229_v6 = vld [vmem:[%s4334_s5 + $0x88] sm:$0xff]  ;;  %v324_v10 = vmax.f32 %v292_v60, 0.0  ;;  %v325_v11 = vmax.f32 %v293_v61, 0.0  ;;  %v263_v13 = vmul.f32 %v4327_v7, %v227_v58 }
  0x1d   : > { %397 = vst.msk [vmem:[#allocation2 + $0x31] sm:$0xff] %vm348_vm1, %v318_v40  ;;  %398 = vst.msk [vmem:[#allocation2 + $0x39] sm:$0xff] %vm348_vm1, %v319_v45  ;;  %v230_v9 = vld [vmem:[%s4334_s5 + $0x90] sm:$0xff]  ;;  %v326_v12 = vmax.f32 %v294_v62, 0.0  ;;  %v231_v15 = vld [vmem:[%s4334_s5 + $0x98] sm:$0xff]  ;;  %v327_v18 = vmax.f32 %v295_v63, 0.0  ;;  %v298_v21 = vadd.f32 %v4339_v8, %v262_v4  ;;  %v264_v24 = vmul.f32 %v4327_v7, %v228_v5 }
  0x1e   : > { %399 = vst.msk [vmem:[#allocation2 + $0x49] sm:$0xff] %vm348_vm1, %v320_v46  ;;  %400 = vst.msk [vmem:[#allocation2 + $0x51] sm:$0xff] %vm348_vm1, %v321_v47  ;;  %v232_v16 = vld [vmem:[%s4334_s5 + $0xa0] sm:$0xff]  ;;  %v233_v17 = vld [vmem:[%s4334_s5 + $0xa8] sm:$0xff]  ;;  %v328_v19 = vmax.f32 %v296_v0, 0.0  ;;  %v329_v20 = vmax.f32 %v297_v2, 0.0  ;;  %v299_v23 = vadd.f32 %v4339_v8, %v263_v13  ;;  %v265_v25 = vmul.f32 %v4327_v7, %v229_v6 }
  0x1f   : > { %401 = vst.msk [vmem:[#allocation2 + $0x61] sm:$0xff] %vm348_vm1, %v322_v54  ;;  %402 = vst.msk [vmem:[#allocation2 + $0x69] sm:$0xff] %vm348_vm1, %v323_v59  ;;  %v266_v26 = vmul.f32 %v4327_v7, %v230_v9  ;;  %v330_v30 = vmax.f32 %v298_v21, 0.0  ;;  %v267_v31 = vmul.f32 %v4327_v7, %v231_v15  ;;  %v268_v32 = vmul.f32 %v4327_v7, %v232_v16  ;;  %v234_v45 = vld [vmem:[%s4334_s5 + $0xb0] sm:$0xff]  ;;  %v4438_v48 = vld [vmem:[%s5059_s2 + $0x18] sm:$0xf] }
  0x20   : > { %403 = vst.msk [vmem:[#allocation2 + $0x79] sm:$0xff] %vm348_vm1, %v324_v10  ;;  %404 = vst.msk [vmem:[#allocation2 + $0x81] sm:$0xff] %vm348_vm1, %v325_v11  ;;  %v269_v33 = vmul.f32 %v4327_v7, %v233_v17  ;;  %v331_v38 = vmax.f32 %v299_v23, 0.0  ;;  %v300_v39 = vadd.f32 %v4339_v8, %v264_v24  ;;  %v301_v40 = vadd.f32 %v4339_v8, %v265_v25  ;;  %v235_v50 = vld [vmem:[%s4334_s5 + $0xb8] sm:$0xff]  ;;  %v236_v51 = vld [vmem:[%s4334_s5 + $0xc0] sm:$0xff]  ;;  %s3309_s23 = sshll.u32 %s5064_s16, 1 }
  0x21   : > { %405 = vst.msk [vmem:[#allocation2 + $0x91] sm:$0xff] %vm348_vm1, %v326_v12  ;;  %406 = vst.msk [vmem:[#allocation2 + $0x99] sm:$0xff] %vm348_vm1, %v327_v18  ;;  %v302_v43 = vadd.f32 %v4339_v8, %v266_v26  ;;  %v303_v44 = vadd.f32 %v4339_v8, %v267_v31  ;;  %v304_v49 = vadd.f32 %v4339_v8, %v268_v32  ;;  %v237_v55 = vld [vmem:[%s4334_s5 + $0xc8] sm:$0xff]  ;;  %v238_v56 = vld [vmem:[%s4334_s5 + $0xd0] sm:$0xff]  ;;  %s208_s26 = scalar_lea.vmem %s5061_s4, %s3309_s23 }
  0x22   : > { %407 = vst.msk [vmem:[#allocation2 + $0xa9] sm:$0xff] %vm348_vm1, %v328_v19  ;;  %408 = vst.msk [vmem:[#allocation2 + $0xb1] sm:$0xff] %vm348_vm1, %v329_v20  ;;  %v332_v46 = vmax.f32 %v300_v39, 0.0  ;;  %v333_v47 = vmax.f32 %v301_v40, 0.0  ;;  %v305_v54 = vadd.f32 %v4339_v8, %v269_v33  ;;  %v4452_v57 = vld [vmem:[%s5059_s2 + $0x8] sm:$0xf]  ;;  %v270_v60 = vmul.f32 %v4327_v7, %v234_v45 }
  0x23   : > { %v478_v27 = vld [vmem:[#allocation2 + $0x19] sm:$0xff]  ;;  %v479_v28 = vld [vmem:[#allocation2 + $0x21] sm:$0xff]  ;;  %409 = vst.msk [vmem:[#allocation2 + $0xc1] sm:$0xff] %vm348_vm1, %v330_v30  ;;  %410 = vst.msk [vmem:[#allocation2 + $0xc9] sm:$0xff] %vm348_vm1, %v331_v38  ;;  %v334_v52 = vmax.f32 %v302_v43, 0.0  ;;  %v335_v53 = vmax.f32 %v303_v44, 0.0  ;;  %v271_v63 = vmul.f32 %v4327_v7, %v235_v50  ;;  %v272_v0 = vmul.f32 %v4327_v7, %v236_v51 }
  0x24   : > { %v1541_v29 = vld [vmem:[#allocation2 + $0x31] sm:$0xff]  ;;  %v509_v34 = vpack.c.bf16 %v479_v28, %v478_v27  ;;  %v1542_v35 = vld [vmem:[#allocation2 + $0x39] sm:$0xff]  ;;  %411 = vst.msk [vmem:[#allocation2 + $0xd9] sm:$0xff] %vm348_vm1, %v332_v46  ;;  %412 = vst.msk [vmem:[#allocation2 + $0xe1] sm:$0xff] %vm348_vm1, %v333_v47  ;;  %v336_v59 = vmax.f32 %v304_v49, 0.0  ;;  %v306_v4 = vadd.f32 %v4339_v8, %v270_v60  ;;  %v273_v5 = vmul.f32 %v4327_v7, %v237_v55 }
  0x25   : > { %v482_v36 = vld [vmem:[#allocation2 + $0x49] sm:$0xff]  ;;  %v483_v37 = vld [vmem:[#allocation2 + $0x51] sm:$0xff]  ;;  %v4424_v41 = vpack.c.bf16 %v1542_v35, %v1541_v29  ;;  %413 = vst.msk [vmem:[#allocation2 + $0xf1] sm:$0xff] %vm348_vm1, %v334_v52  ;;  %414 = vst.msk [vmem:[#allocation2 + $0xf9] sm:$0xff] %vm348_vm1, %v335_v53  ;;  %v274_v6 = vmul.f32 %v4327_v7, %v238_v56  ;;  %v307_v10 = vadd.f32 %v4339_v8, %v271_v63 }
  0x26   : > { %v4426_v42 = vpack.c.bf16 %v483_v37, %v482_v36  ;;  %3624 = vmatmul.mubr.msk.bf16.vlgmr.msra.gmra.mrb[0].mxu1 %vm348_vm1, %v509_v34  ;;  %3759 = vmatprep.mubr.msk.bf16.mxu0 %vm348_vm1, %v509_v34  ;;  %v1546_v58 = vld [vmem:[#allocation2 + $0x69] sm:$0xff]  ;;  %v239_v2 = vld [vmem:[%s4334_s5 + $0xd8] sm:$0xff]  ;;  %415 = vst.msk [vmem:[#allocation2 + $0x109] sm:$0xff] %vm348_vm1, %v336_v59  ;;  %v308_v11 = vadd.f32 %v4339_v8, %v272_v0  ;;  %v240_v12 = vld [vmem:[%s4334_s5 + $0xe0] sm:$0xff]  ;;  %v338_v15 = vmax.f32 %v306_v4, 0.0 }
  0x27   : > { %3656 = vmatpush3.bf16.msra.mxu1 %v4347_v14  ;;  %3760 = vmatmul.mubr.msk.bf16.vlgmr.msra.gmra.mrb[0].mxu0 %vm348_vm1, %v4424_v41  ;;  %v1545_v14 = vld [vmem:[#allocation2 + $0x61] sm:$0xff]  ;;  %v486_v61 = vld [vmem:[#allocation2 + $0x79] sm:$0xff]  ;;  %v309_v16 = vadd.f32 %v4339_v8, %v273_v5  ;;  %v275_v17 = vmul.f32 %v4327_v7, %v239_v2  ;;  %v339_v19 = vmax.f32 %v307_v10, 0.0  ;;  %v310_v21 = vadd.f32 %v4339_v8, %v274_v6  ;;  %v242_v28 = vld [vmem:[%s4334_s5 + $0xf0] sm:$0xff] }
  0x28   : > { %3792 = vmatpush3.bf16.msra.mxu0 %v4355_v22  ;;  %3627 = vmatprep.mubr.msk.bf16.mxu1 %vm348_vm1, %v4424_v41  ;;  %v487_v62 = vld [vmem:[#allocation2 + $0x81] sm:$0xff]  ;;  %v337_v22 = vmax.f32 %v305_v54, 0.0  ;;  %v4475_v9 = vpack.c.bf16 %v1546_v58, %v1545_v14  ;;  %v340_v20 = vmax.f32 %v308_v11, 0.0  ;;  %417 = vst.msk [vmem:[#allocation2 + $0x121] sm:$0xff] %vm348_vm1, %v338_v15  ;;  %v276_v25 = vmul.f32 %v4327_v7, %v240_v12  ;;  %v1549_v29 = vld [vmem:[#allocation2 + $0x91] sm:$0xff]  ;;  %v1550_v30 = vld [vmem:[#allocation2 + $0x99] sm:$0xff] }
  0x29   : > { %3763 = vmatprep.mubr.msk.bf16.mxu0 %vm348_vm1, %v4426_v42  ;;  %4192 = vmatprep.subr.msk.bf16.mxu0 %vm574_vm0, %v4438_v48  ;;  %v4481_v13 = vpack.c.bf16 %v487_v62, %v486_v61  ;;  %v241_v18 = vld [vmem:[%s4334_s5 + $0xe8] sm:$0xff]  ;;  %v341_v23 = vmax.f32 %v309_v16, 0.0  ;;  %v311_v24 = vadd.f32 %v4339_v8, %v275_v17  ;;  %418 = vst.msk [vmem:[#allocation2 + $0x129] sm:$0xff] %vm348_vm1, %v339_v19  ;;  %v342_v26 = vmax.f32 %v310_v21, 0.0  ;;  %v243_v33 = vld [vmem:[%s4334_s5 + $0xf8] sm:$0xff] }
  0x2a   : > { %4187 = vmatprep.subr.msk.bf16.mxu1 %vm574_vm0, %v4452_v57  ;;  %416 = vst.msk [vmem:[#allocation2 + $0x111] sm:$0xff] %vm348_vm1, %v337_v22  ;;  %419 = vst.msk [vmem:[#allocation2 + $0x139] sm:$0xff] %vm348_vm1, %v340_v20  ;;  %v277_v27 = vmul.f32 %v4327_v7, %v241_v18  ;;  %v312_v32 = vadd.f32 %v4339_v8, %v276_v25  ;;  %v490_v34 = vld [vmem:[#allocation2 + $0xa9] sm:$0xff]  ;;  %v491_v35 = vld [vmem:[#allocation2 + $0xb1] sm:$0xff]  ;;  %v278_v38 = vmul.f32 %v4327_v7, %v242_v28 }
  0x2b   : > { %420 = vst.msk [vmem:[#allocation2 + $0x141] sm:$0xff] %vm348_vm1, %v341_v23  ;;  %v343_v31 = vmax.f32 %v311_v24, 0.0  ;;  %421 = vst.msk [vmem:[#allocation2 + $0x151] sm:$0xff] %vm348_vm1, %v342_v26  ;;  %v4509_v39 = vpack.c.bf16 %v1550_v30, %v1549_v29  ;;  %v279_v43 = vmul.f32 %v4327_v7, %v243_v33  ;;  %v4512_v44 = vpack.c.bf16 %v491_v35, %v490_v34  ;;  %v1553_v49 = vld [vmem:[#allocation2 + $0xc1] sm:$0xff]  ;;  %v1554_v50 = vld [vmem:[#allocation2 + $0xc9] sm:$0xff] }
  0x2c   : > { %v313_v36 = vadd.f32 %v4339_v8, %v277_v27  ;;  %v344_v37 = vmax.f32 %v312_v32, 0.0  ;;  %v314_v45 = vadd.f32 %v4339_v8, %v278_v38  ;;  %v1833_v51 = vld [vmem:[#allocation2 + $0x1a] sm:$0xff]  ;;  %v4528_v52 = vpack.c.bf16 %v1554_v50, %v1553_v49  ;;  %v1835_v56 = vld [vmem:[#allocation2 + $0x32] sm:$0xff]  ;;  %v1837_v60 = vld [vmem:[#allocation2 + $0x4a] sm:$0xff] }
  0x2d   : > { %422 = vst.msk [vmem:[#allocation2 + $0x159] sm:$0xff] %vm348_vm1, %v343_v31  ;;  %v315_v46 = vadd.f32 %v4339_v8, %v279_v43  ;;  %v1834_v8 = vld [vmem:[#allocation2 + $0x22] sm:$0xff]  ;;  %v494_v54 = vld [vmem:[#allocation2 + $0xd9] sm:$0xff]  ;;  %v496_v58 = vld [vmem:[#allocation2 + $0xf1] sm:$0xff]  ;;  %v2227_v2 = vsel %vm574_vm0, %v4438_v48, 0 }
  0x2e   : > { %3628 = vmatmul.mubr.msk.bf16.gmra.mrb[4].mxu1 %vm348_vm1, %v4426_v42  ;;  %v345_v40 = vmax.f32 %v313_v36, 0.0  ;;  %423 = vst.msk [vmem:[#allocation2 + $0x169] sm:$0xff] %vm348_vm1, %v344_v37  ;;  %v346_v47 = vmax.f32 %v314_v45, 0.0  ;;  %v4530_v53 = vpack.c.bf16 %v1834_v8, %v1833_v51  ;;  %v495_v55 = vld [vmem:[#allocation2 + $0xe1] sm:$0xff]  ;;  %v497_v59 = vld [vmem:[#allocation2 + $0xf9] sm:$0xff]  ;;  %v498_v5 = vld [vmem:[#allocation2 + $0x109] sm:$0xff] }
  0x2f   : > { %3764 = vmatmul.mubr.msk.bf16.gmra.mrb[4].mxu0 %vm348_vm1, %v4475_v9  ;;  %3631 = vmatprep.mubr.msk.bf16.mxu1 %vm348_vm1, %v4475_v9  ;;  %v347_v7 = vmax.f32 %v315_v46, 0.0  ;;  %v1836_v14 = vld [vmem:[#allocation2 + $0x3a] sm:$0xff]  ;;  %v1838_v61 = vld [vmem:[#allocation2 + $0x52] sm:$0xff]  ;;  %v4540_v62 = vpack.c.bf16 %v495_v55, %v494_v54  ;;  %v4544_v63 = vpack.c.bf16 %v497_v59, %v496_v58  ;;  %v1839_v10 = vld [vmem:[#allocation2 + $0x62] sm:$0xff] }
  0x30   : > { %3767 = vmatprep.mubr.msk.bf16.mxu0 %vm348_vm1, %v4481_v13  ;;  %424 = vst.msk [vmem:[#allocation2 + $0x171] sm:$0xff] %vm348_vm1, %v345_v40  ;;  %425 = vst.msk [vmem:[#allocation2 + $0x181] sm:$0xff] %vm348_vm1, %v346_v47  ;;  %v4542_v22 = vpack.c.bf16 %v1836_v14, %v1835_v56  ;;  %v4546_v0 = vpack.c.bf16 %v1838_v61, %v1837_v60  ;;  %v4555_v4 = vld [vmem:[%s5059_s2 + $0x1c] sm:$0xf]  ;;  %v1840_v48 = vld [vmem:[#allocation2 + $0x6a] sm:$0xff]  ;;  %v1050_v61 = vsel %vm574_vm0, %v4452_v57, 0 }
  0x31   : > { %426 = vst.msk [vmem:[#allocation2 + $0x189] sm:$0xff] %vm348_vm1, %v347_v7  ;;  %v499_v6 = vld [vmem:[#allocation2 + $0x111] sm:$0xff]  ;;  %v500_v11 = vld [vmem:[#allocation2 + $0x121] sm:$0xff]  ;;  %v501_v12 = vld [vmem:[#allocation2 + $0x129] sm:$0xff]  ;;  %v4567_v18 = vpack.c.bf16 %v1840_v48, %v1839_v10 }
  0x32   : > { %v1841_v15 = vld [vmem:[#allocation2 + $0x7a] sm:$0xff]  ;;  %v1842_v16 = vld [vmem:[#allocation2 + $0x82] sm:$0xff]  ;;  %v4565_v17 = vpack.c.bf16 %v499_v6, %v498_v5  ;;  %v4569_v19 = vpack.c.bf16 %v501_v12, %v500_v11  ;;  %v1843_v24 = vld [vmem:[#allocation2 + $0x92] sm:$0xff] }
  0x33   : > { %v4571_v20 = vpack.c.bf16 %v1842_v16, %v1841_v15  ;;  %v502_v21 = vld [vmem:[#allocation2 + $0x139] sm:$0xff]  ;;  %v503_v23 = vld [vmem:[#allocation2 + $0x141] sm:$0xff]  ;;  %v504_v26 = vld [vmem:[#allocation2 + $0x151] sm:$0xff] }
  0x34   : > { %v1844_v25 = vld [vmem:[#allocation2 + $0x9a] sm:$0xff]  ;;  %v1845_v28 = vld [vmem:[#allocation2 + $0xaa] sm:$0xff]  ;;  %v1846_v29 = vld [vmem:[#allocation2 + $0xb2] sm:$0xff]  ;;  %v4581_v30 = vpack.c.bf16 %v503_v23, %v502_v21 }
  0x35   : > { %v505_v27 = vld [vmem:[#allocation2 + $0x159] sm:$0xff]  ;;  %v4583_v31 = vpack.c.bf16 %v1844_v25, %v1843_v24  ;;  %v4587_v33 = vpack.c.bf16 %v1846_v29, %v1845_v28  ;;  %v506_v34 = vld [vmem:[#allocation2 + $0x169] sm:$0xff] }
  0x36   : > { %3632 = vmatmul.mubr.msk.bf16.gmra.mrb[8].mxu1 %vm348_vm1, %v4481_v13  ;;  %v4585_v32 = vpack.c.bf16 %v505_v27, %v504_v26  ;;  %v427_v36 = vld [vmem:[#allocation2] sm:$0xff]  ;;  %v1848_v38 = vld [vmem:[#allocation2 + $0xca] sm:$0xff]  ;;  %v429_v50 = vld [vmem:[#allocation2 + $0x18] sm:$0xff] }
  0x37   : > { %3768 = vmatmul.mubr.msk.bf16.gmra.mrb[8].mxu0 %vm348_vm1, %v4509_v39  ;;  %3635 = vmatprep.mubr.msk.bf16.mxu1 %vm348_vm1, %v4509_v39  ;;  %v507_v35 = vld [vmem:[#allocation2 + $0x171] sm:$0xff]  ;;  %v1847_v37 = vld [vmem:[#allocation2 + $0xc2] sm:$0xff]  ;;  %v1849_v43 = vld [vmem:[#allocation2 + $0xda] sm:$0xff] }
  0x38   : > { %3771 = vmatprep.mubr.msk.bf16.mxu0 %vm348_vm1, %v4512_v44  ;;  %v428_v40 = vld [vmem:[#allocation2 + $0x8] sm:$0xff]  ;;  %v4597_v46 = vpack.c.bf16 %v507_v35, %v506_v34  ;;  %v4599_v47 = vpack.c.bf16 %v1848_v38, %v1847_v37  ;;  %v430_v51 = vld [vmem:[#allocation2 + $0x20] sm:$0xff]  ;;  %v1851_v8 = vld [vmem:[#allocation2 + $0xf2] sm:$0xff] }
  0x39   : > { %v1850_v45 = vld [vmem:[#allocation2 + $0xe2] sm:$0xff]  ;;  %v459_v7 = vpack.c.bf16 %v428_v40, %v427_v36  ;;  %v1852_v54 = vld [vmem:[#allocation2 + $0xfa] sm:$0xff]  ;;  %v431_v55 = vld [vmem:[#allocation2 + $0x30] sm:$0xff]  ;;  %v4610_v59 = vpack.c.bf16 %v430_v51, %v429_v50 }
  0x3a   : > { %v4601_v49 = vpack.c.bf16 %v1850_v45, %v1849_v43  ;;  %v432_v56 = vld [vmem:[#allocation2 + $0x38] sm:$0xff]  ;;  %v1853_v14 = vld [vmem:[#allocation2 + $0x10a] sm:$0xff]  ;;  %v4612_v60 = vpack.c.bf16 %v1852_v54, %v1851_v8  ;;  %v435_v11 = vld [vmem:[#allocation2 + $0x60] sm:$0xff] }
  0x3b   : > { %v1854_v58 = vld [vmem:[#allocation2 + $0x112] sm:$0xff]  ;;  %v4625_v6 = vld [vmem:[%s5059_s2 + $0xc] sm:$0xf]  ;;  %v1855_v57 = vld [vmem:[#allocation2 + $0x122] sm:$0xff] }
  0x3c   : > { %v4618_v5 = vpack.c.bf16 %v1854_v58, %v1853_v14  ;;  %v433_v10 = vld [vmem:[#allocation2 + $0x48] sm:$0xff]  ;;  %v434_v48 = vld [vmem:[#allocation2 + $0x50] sm:$0xff]  ;;  %v1857_v16 = vld [vmem:[#allocation2 + $0x13a] sm:$0xff] }
  0x3d   : > { %v1856_v12 = vld [vmem:[#allocation2 + $0x12a] sm:$0xff]  ;;  %v1858_v21 = vld [vmem:[#allocation2 + $0x142] sm:$0xff]  ;;  %v4635_v23 = vpack.c.bf16 %v434_v48, %v433_v10  ;;  %v437_v27 = vld [vmem:[#allocation2 + $0x78] sm:$0xff] }
  0x3e   : > { %3636 = vmatmul.mubr.msk.bf16.gmra.mrb[12].mxu1 %vm348_vm1, %v4512_v44  ;;  %v436_v15 = vld [vmem:[#allocation2 + $0x68] sm:$0xff]  ;;  %v4637_v24 = vpack.c.bf16 %v1856_v12, %v1855_v57  ;;  %v4641_v26 = vpack.c.bf16 %v1858_v21, %v1857_v16  ;;  %v438_v28 = vld [vmem:[#allocation2 + $0x80] sm:$0xff]  ;;  %v439_v29 = vld [vmem:[#allocation2 + $0x90] sm:$0xff]  ;;  %v2521_v16 = vsel %vm574_vm0, %v4555_v4, 0 }
  0x3f   : > { %3772 = vmatmul.mubr.msk.bf16.gmra.mrb[12].mxu0 %vm348_vm1, %v4528_v52  ;;  %3639 = vmatprep.mubr.msk.bf16.mxu1 %vm348_vm1, %v4528_v52  ;;  %v4639_v25 = vpack.c.bf16 %v436_v15, %v435_v11  ;;  %v1859_v34 = vld [vmem:[#allocation2 + $0x152] sm:$0xff]  ;;  %v1860_v35 = vld [vmem:[#allocation2 + $0x15a] sm:$0xff]  ;;  %v1861_v37 = vld [vmem:[#allocation2 + $0x16a] sm:$0xff]  ;;  %v4651_v40 = vpack.c.bf16 %v438_v28, %v437_v27 }
  0x40   : > { %3793 = vmatprep.mubr.msk.bf16.mxu0 %vm348_vm1, %v4530_v53  ;;  %v440_v36 = vld [vmem:[#allocation2 + $0x98] sm:$0xff]  ;;  %v4653_v43 = vpack.c.bf16 %v1860_v35, %v1859_v34  ;;  %v441_v50 = vld [vmem:[#allocation2 + $0xa8] sm:$0xff]  ;;  %v442_v51 = vld [vmem:[#allocation2 + $0xb0] sm:$0xff] }
  0x41   : > { %v1862_v38 = vld [vmem:[#allocation2 + $0x172] sm:$0xff]  ;;  %v4655_v45 = vpack.c.bf16 %v440_v36, %v439_v29  ;;  %v443_v8 = vld [vmem:[#allocation2 + $0xc0] sm:$0xff]  ;;  %v4667_v14 = vpack.c.bf16 %v442_v51, %v441_v50  ;;  %v449_v27 = vld [vmem:[#allocation2 + $0x108] sm:$0xff] }
  0x42   : > { %v1863_v54 = vld [vmem:[#allocation2 + $0x182] sm:$0xff]  ;;  %v445_v10 = vld [vmem:[#allocation2 + $0xd8] sm:$0xff]  ;;  %v447_v11 = vld [vmem:[#allocation2 + $0xf0] sm:$0xff] }
  0x43   : > { %v446_v48 = vld [vmem:[#allocation2 + $0xe0] sm:$0xff]  ;;  %v448_v57 = vld [vmem:[#allocation2 + $0xf8] sm:$0xff]  ;;  %v450_v28 = vld [vmem:[#allocation2 + $0x110] sm:$0xff] }
  0x44   : > { %v4681_v12 = vpack.c.bf16 %v446_v48, %v445_v10  ;;  %v4683_v15 = vpack.c.bf16 %v448_v57, %v447_v11  ;;  %v3447_v21 = vld [vmem:[%s5059_s2 + $0x20] sm:$0xf]  ;;  %v452_v29 = vld [vmem:[#allocation2 + $0x128] sm:$0xff]  ;;  %v4699_v34 = vpack.c.bf16 %v450_v28, %v449_v27  ;;  %v453_v36 = vld [vmem:[#allocation2 + $0x138] sm:$0xff]  ;;  %v1344_v57 = vsel %vm574_vm0, %v4625_v6, 0 }
  0x45   : > { %v456_v50 = vld [vmem:[#allocation2 + $0x158] sm:$0xff]  ;;  %v952_v10 = vld [vmem:[#allocation2 + $0xa] sm:$0xff]  ;;  %v2159_v27 = vld [vmem:[#allocation2 + $0x1a0] sm:$0xff] }
  0x46   : > { %3640 = vmatmul.mubr.msk.bf16.gmra.mrb[16].mxu1 %vm348_vm1, %v4540_v62 }
  0x47   : > { %3794 = vmatmul.mubr.msk.bf16.vlgmr.msra.gmra.mrb[0].mxu0 %vm348_vm1, %v4542_v22  ;;  %3643 = vmatprep.mubr.msk.bf16.mxu1 %vm348_vm1, %v4544_v63 }
  0x48   : > { %3826 = vmatpush3.bf16.msra.mxu0 %v2227_v2  ;;  %3797 = vmatprep.mubr.msk.bf16.mxu0 %vm348_vm1, %v4546_v0  ;;  %v4616_v2 = vpack.c.bf16 %v432_v56, %v431_v55  ;;  %v1864_v55 = vld [vmem:[#allocation2 + $0x18a] sm:$0xff] }
  0x49   : > { %4193 = vmatprep.subr.msk.bf16.mxu0 %vm574_vm0, %v4555_v4  ;;  %v444_v56 = vld [vmem:[#allocation2 + $0xc8] sm:$0xff]  ;;  %v4669_v58 = vpack.c.bf16 %v1864_v55, %v1863_v54  ;;  %v451_v4 = vld [vmem:[#allocation2 + $0x120] sm:$0xff]  ;;  %v458_v55 = vld [vmem:[#allocation2 + $0x170] sm:$0xff] }
  0x4a   : > { %v4701_v35 = vpack.c.bf16 %v452_v29, %v451_v4  ;;  %v457_v54 = vld [vmem:[#allocation2 + $0x168] sm:$0xff]  ;;  %v2815_v4 = vsel %vm574_vm0, %v3447_v21, 0 }
  0x4b   : > { %v4723_v48 = vpack.c.bf16 %v458_v55, %v457_v54 }
  0x4e   : > { %3644 = vmatmul.mubr.msk.bf16.gmra.mrb[20].mxu1 %vm348_vm1, %v4565_v17 }
  0x4f   : > { %3798 = vmatmul.mubr.msk.bf16.gmra.mrb[4].mxu0 %vm348_vm1, %v4567_v18  ;;  %3647 = vmatprep.mubr.msk.bf16.mxu1 %vm348_vm1, %v4569_v19 }
  0x50   : > { %3801 = vmatprep.mubr.msk.bf16.mxu0 %vm348_vm1, %v4571_v20 }
  0x56   : > { %3648 = vmatmul.mubr.msk.bf16.gmra.mrb[24].mxu1 %vm348_vm1, %v4581_v30 }
  0x57   : > { %3802 = vmatmul.mubr.msk.bf16.gmra.mrb[8].mxu0 %vm348_vm1, %v4583_v31  ;;  %3651 = vmatprep.mubr.msk.bf16.mxu1 %vm348_vm1, %v4585_v32 }
  0x58   : > { %3805 = vmatprep.mubr.msk.bf16.mxu0 %vm348_vm1, %v4587_v33 }
  0x5e   : > { %3652 = vmatmul.mubr.msk.bf16.gmra.mrb[28].mxu1 %vm348_vm1, %v4597_v46 }
  0x5f   : > { %3806 = vmatmul.mubr.msk.bf16.gmra.mrb[12].mxu0 %vm348_vm1, %v4599_v47  ;;  %3657 = vmatprep.mubr.msk.bf16.mxu1 %vm348_vm1, %v459_v7  ;;  %v4657_v7 = vpack.c.bf16 %v1862_v38, %v1861_v37  ;;  %v454_v37 = vld [vmem:[#allocation2 + $0x140] sm:$0xff]  ;;  %v455_v38 = vld [vmem:[#allocation2 + $0x150] sm:$0xff] }
  0x60   : > { %3809 = vmatprep.mubr.msk.bf16.mxu0 %vm348_vm1, %v4601_v49  ;;  %v4711_v51 = vpack.c.bf16 %v454_v37, %v453_v36 }
  0x66   : > { %3658 = vmatmul.mubr.msk.bf16.vlgmr.msra.gmra.mrb[0].mxu1 %vm348_vm1, %v4610_v59 }
  0x67   : > { %3690 = vmatpush3.bf16.msra.mxu1 %v1050_v61  ;;  %3810 = vmatmul.mubr.msk.bf16.gmra.mrb[16].mxu0 %vm348_vm1, %v4612_v60  ;;  %v4671_v61 = vpack.c.bf16 %v444_v56, %v443_v8  ;;  %v4713_v8 = vpack.c.bf16 %v456_v50, %v455_v38  ;;  %v951_v56 = vld [vmem:[#allocation2 + $0x2] sm:$0xff] }
  0x68   : > { %3661 = vmatprep.mubr.msk.bf16.mxu1 %vm348_vm1, %v4616_v2  ;;  %3813 = vmatprep.mubr.msk.bf16.mxu0 %vm348_vm1, %v4618_v5  ;;  %v983_v11 = vpack.c.bf16 %v952_v10, %v951_v56 }
  0x69   : > { %4188 = vmatprep.subr.msk.bf16.mxu1 %vm574_vm0, %v4625_v6  ;;  %v2157_v6 = vld [vmem:[#allocation2 + $0x188] sm:$0xff] }
  0x6e   : > { %3662 = vmatmul.mubr.msk.bf16.gmra.mrb[4].mxu1 %vm348_vm1, %v4635_v23 }
  0x6f   : > { %3814 = vmatmul.mubr.msk.bf16.gmra.mrb[20].mxu0 %vm348_vm1, %v4637_v24  ;;  %3665 = vmatprep.mubr.msk.bf16.mxu1 %vm348_vm1, %v4639_v25 }
  0x70   : > { %3817 = vmatprep.mubr.msk.bf16.mxu0 %vm348_vm1, %v4641_v26 }
  0x76   : > { %3666 = vmatmul.mubr.msk.bf16.gmra.mrb[8].mxu1 %vm348_vm1, %v4651_v40 }
  0x77   : > { %3818 = vmatmul.mubr.msk.bf16.gmra.mrb[24].mxu0 %vm348_vm1, %v4653_v43  ;;  %3669 = vmatprep.mubr.msk.bf16.mxu1 %vm348_vm1, %v4655_v45 }
  0x78   : > { %3821 = vmatprep.mubr.msk.bf16.mxu0 %vm348_vm1, %v4657_v7 }
  0x7e   : > { %3670 = vmatmul.mubr.msk.bf16.gmra.mrb[12].mxu1 %vm348_vm1, %v4667_v14 }
  0x7f   : > { %3822 = vmatmul.mubr.msk.bf16.gmra.mrb[28].mxu0 %vm348_vm1, %v4669_v58  ;;  %3673 = vmatprep.mubr.msk.bf16.mxu1 %vm348_vm1, %v4671_v61 }
  0x80   : > { %3827 = vmatprep.mubr.msk.bf16.mxu0 %vm348_vm1, %v4616_v2 }
  0x86   : > { %3674 = vmatmul.mubr.msk.bf16.gmra.mrb[16].mxu1 %vm348_vm1, %v4681_v12 }
  0x87   : > { %3828 = vmatmul.mubr.msk.bf16.vlgmr.msra.gmra.mrb[0].mxu0 %vm348_vm1, %v4635_v23  ;;  %3677 = vmatprep.mubr.msk.bf16.mxu1 %vm348_vm1, %v4683_v15 }
  0x88   : > { %3860 = vmatpush3.bf16.msra.mxu0 %v2521_v16  ;;  %3831 = vmatprep.mubr.msk.bf16.mxu0 %vm348_vm1, %v4639_v25 }
  0x89   : > { %4194 = vmatprep.subr.msk.bf16.mxu0 %vm574_vm0, %v3447_v21 }
  0x8e   : > { %3678 = vmatmul.mubr.msk.bf16.gmra.mrb[20].mxu1 %vm348_vm1, %v4699_v34 }
  0x8f   : > { %3832 = vmatmul.mubr.msk.bf16.gmra.mrb[4].mxu0 %vm348_vm1, %v4651_v40  ;;  %3681 = vmatprep.mubr.msk.bf16.mxu1 %vm348_vm1, %v4701_v35 }
  0x90   : > { %3835 = vmatprep.mubr.msk.bf16.mxu0 %vm348_vm1, %v4655_v45 }
  0x96   : > { %3682 = vmatmul.mubr.msk.bf16.gmra.mrb[24].mxu1 %vm348_vm1, %v4711_v51 }
  0x97   : > { %3836 = vmatmul.mubr.msk.bf16.gmra.mrb[8].mxu0 %vm348_vm1, %v4667_v14  ;;  %3685 = vmatprep.mubr.msk.bf16.mxu1 %vm348_vm1, %v4713_v8 }
  0x98   : > { %3839 = vmatprep.mubr.msk.bf16.mxu0 %vm348_vm1, %v4671_v61 }
  0x9e   : > { %3686 = vmatmul.mubr.msk.bf16.gmra.mrb[28].mxu1 %vm348_vm1, %v4723_v48 }
  0x9f   : > { %3840 = vmatmul.mubr.msk.bf16.gmra.mrb[12].mxu0 %vm348_vm1, %v4681_v12  ;;  %3691 = vmatprep.mubr.msk.bf16.mxu1 %vm348_vm1, %v983_v11 }
  0xa0   : > { %3843 = vmatprep.mubr.msk.bf16.mxu0 %vm348_vm1, %v4683_v15 }
  0xa6   : > { %3692 = vmatmul.mubr.msk.bf16.vlgmr.msra.gmra.mrb[0].mxu1 %vm348_vm1, %v4530_v53  ;;  %v2156_v53 = vld [vmem:[#allocation2 + $0x180] sm:$0xff] }
  0xa7   : > { %3724 = vmatpush3.bf16.msra.mxu1 %v1344_v57  ;;  %3844 = vmatmul.mubr.msk.bf16.gmra.mrb[16].mxu0 %vm348_vm1, %v4699_v34  ;;  %v4752_v16 = vpack.c.bf16 %v2157_v6, %v2156_v53 }
  0xa8   : > { %3695 = vmatprep.mubr.msk.bf16.mxu1 %vm348_vm1, %v4542_v22  ;;  %3847 = vmatprep.mubr.msk.bf16.mxu0 %vm348_vm1, %v4701_v35 }
  0xa9   : > { %4190 = vmatprep.subr.msk.bf16.mxu1 %vm574_vm0, %v4252_v1  ;;  %v2158_v1 = vld [vmem:[#allocation2 + $0x198] sm:$0xff] }
  0xaa   : > { %v2175_v28 = vpack.c.bf16 %v2159_v27, %v2158_v1 }
  0xae   : > { %3696 = vmatmul.mubr.msk.bf16.gmra.mrb[4].mxu1 %vm348_vm1, %v4546_v0 }
  0xaf   : > { %3848 = vmatmul.mubr.msk.bf16.gmra.mrb[20].mxu0 %vm348_vm1, %v4711_v51  ;;  %3699 = vmatprep.mubr.msk.bf16.mxu1 %vm348_vm1, %v4567_v18 }
  0xb0   : > { %3851 = vmatprep.mubr.msk.bf16.mxu0 %vm348_vm1, %v4713_v8 }
  0xb6   : > { %3700 = vmatmul.mubr.msk.bf16.gmra.mrb[8].mxu1 %vm348_vm1, %v4571_v20 }
  0xb7   : > { %3852 = vmatmul.mubr.msk.bf16.gmra.mrb[24].mxu0 %vm348_vm1, %v4723_v48  ;;  %3703 = vmatprep.mubr.msk.bf16.mxu1 %vm348_vm1, %v4583_v31 }
  0xb8   : > { %3855 = vmatprep.mubr.msk.bf16.mxu0 %vm348_vm1, %v4752_v16 }
  0xbe   : > { %3704 = vmatmul.mubr.msk.bf16.gmra.mrb[12].mxu1 %vm348_vm1, %v4587_v33 }
  0xbf   : > { %3856 = vmatmul.mubr.msk.bf16.gmra.mrb[28].mxu0 %vm348_vm1, %v2175_v28  ;;  %3707 = vmatprep.mubr.msk.bf16.mxu1 %vm348_vm1, %v4599_v47 }
  0xc0   : > { %3861 = vmatprep.mubr.msk.bf16.mxu0 %vm348_vm1, %v4424_v41  ;;  %v2451_v41 = vld [vmem:[#allocation2 + $0x189] sm:$0xff] }
  0xc6   : > { %3708 = vmatmul.mubr.msk.bf16.gmra.mrb[16].mxu1 %vm348_vm1, %v4601_v49 }
  0xc7   : > { %3862 = vmatmul.mubr.msk.bf16.vlgmr.msra.gmra.mrb[0].mxu0 %vm348_vm1, %v4426_v42  ;;  %3711 = vmatprep.mubr.msk.bf16.mxu1 %vm348_vm1, %v4612_v60 }
  0xc8   : > { %3894 = vmatpush3.bf16.msra.mxu0 %v2815_v4  ;;  %3865 = vmatprep.mubr.msk.bf16.mxu0 %vm348_vm1, %v4475_v9  ;;  %v2452_v9 = vld [vmem:[#allocation2 + $0x199] sm:$0xff] }
  0xce   : > { %3712 = vmatmul.mubr.msk.bf16.gmra.mrb[20].mxu1 %vm348_vm1, %v4618_v5 }
  0xcf   : > { %3866 = vmatmul.mubr.msk.bf16.gmra.mrb[4].mxu0 %vm348_vm1, %v4481_v13  ;;  %3715 = vmatprep.mubr.msk.bf16.mxu1 %vm348_vm1, %v4637_v24  ;;  %v2453_v13 = vld [vmem:[#allocation2 + $0x1a1] sm:$0xff] }
  0xd0   : > { %3869 = vmatprep.mubr.msk.bf16.mxu0 %vm348_vm1, %v4509_v39  ;;  %v2469_v39 = vpack.c.bf16 %v2453_v13, %v2452_v9 }
  0xd6   : > { %3716 = vmatmul.mubr.msk.bf16.gmra.mrb[24].mxu1 %vm348_vm1, %v4641_v26 }
  0xd7   : > { %3870 = vmatmul.mubr.msk.bf16.gmra.mrb[8].mxu0 %vm348_vm1, %v4512_v44  ;;  %3719 = vmatprep.mubr.msk.bf16.mxu1 %vm348_vm1, %v4653_v43  ;;  %v1555_v44 = vld [vmem:[#allocation2 + $0xd9] sm:$0xff] }
  0xd8   : > { %3873 = vmatprep.mubr.msk.bf16.mxu0 %vm348_vm1, %v4528_v52  ;;  %v1556_v52 = vld [vmem:[#allocation2 + $0xe1] sm:$0xff] }
  0xde   : > { %3720 = vmatmul.mubr.msk.bf16.gmra.mrb[28].mxu1 %vm348_vm1, %v4657_v7 }
  0xdf   : > { %3874 = vmatmul.mubr.msk.bf16.gmra.mrb[12].mxu0 %vm348_vm1, %v4540_v62  ;;  %3725 = vmatprep.mubr.msk.bf16.mxu1 %vm348_vm1, %v4610_v59  ;;  %v1579_v62 = vpack.c.bf16 %v1556_v52, %v1555_v44 }
  0xe0   : > { %3877 = vmatprep.mubr.msk.bf16.mxu0 %vm348_vm1, %v4544_v63  ;;  %v1558_v63 = vld [vmem:[#allocation2 + $0xf9] sm:$0xff] }
  0xe6   : > { %3726 = vmatmul.mubr.msk.bf16.vlgmr.msra.gmra.mrb[0].mxu1 %vm348_vm1, %v4616_v2 }
  0xe7   : > { %3928 = vmatpush3.bf16.msra.mxu1 %v4260_v3  ;;  %3878 = vmatmul.mubr.msk.bf16.gmra.mrb[16].mxu0 %vm348_vm1, %v4565_v17  ;;  %v2450_v3 = vld [vmem:[#allocation2 + $0x181] sm:$0xff] }
  0xe8   : > { %3729 = vmatprep.mubr.msk.bf16.mxu1 %vm348_vm1, %v4635_v23  ;;  %3881 = vmatprep.mubr.msk.bf16.mxu0 %vm348_vm1, %v4569_v19  ;;  %v2468_v42 = vpack.c.bf16 %v2451_v41, %v2450_v3 }
  0xee   : > { %3730 = vmatmul.mubr.msk.bf16.gmra.mrb[4].mxu1 %vm348_vm1, %v4639_v25 }
  0xef   : > { %3882 = vmatmul.mubr.msk.bf16.gmra.mrb[20].mxu0 %vm348_vm1, %v4581_v30  ;;  %3733 = vmatprep.mubr.msk.bf16.mxu1 %vm348_vm1, %v4651_v40 }
  0xf0   : > { %3885 = vmatprep.mubr.msk.bf16.mxu0 %vm348_vm1, %v4585_v32 }
  0xf6   : > { %3734 = vmatmul.mubr.msk.bf16.gmra.mrb[8].mxu1 %vm348_vm1, %v4655_v45 }
  0xf7   : > { %3886 = vmatmul.mubr.msk.bf16.gmra.mrb[24].mxu0 %vm348_vm1, %v4597_v46  ;;  %3737 = vmatprep.mubr.msk.bf16.mxu1 %vm348_vm1, %v4667_v14 }
  0xf8   : > { %3889 = vmatprep.mubr.msk.bf16.mxu0 %vm348_vm1, %v2468_v42 }
  0xfe   : > { %3738 = vmatmul.mubr.msk.bf16.gmra.mrb[12].mxu1 %vm348_vm1, %v4671_v61 }
  0xff   : > { %3890 = vmatmul.mubr.msk.bf16.gmra.mrb[28].mxu0 %vm348_vm1, %v2469_v39  ;;  %3741 = vmatprep.mubr.msk.bf16.mxu1 %vm348_vm1, %v4681_v12 }
 0x100   : > { %3895 = vmatprep.mubr.msk.bf16.mxu0 %vm348_vm1, %v4542_v22  ;;  %v1557_v22 = vld [vmem:[#allocation2 + $0xf1] sm:$0xff] }
 0x106   : > { %3742 = vmatmul.mubr.msk.bf16.gmra.mrb[16].mxu1 %vm348_vm1, %v4683_v15 }
 0x107   : > { %3896 = vmatmul.mubr.msk.bf16.vlgmr.msra.gmra.mrb[0].mxu0 %vm348_vm1, %v4546_v0  ;;  %3745 = vmatprep.mubr.msk.bf16.mxu1 %vm348_vm1, %v4699_v34  ;;  %v1580_v0 = vpack.c.bf16 %v1558_v63, %v1557_v22 }
 0x108   : > { %3899 = vmatprep.mubr.msk.bf16.mxu0 %vm348_vm1, %v4567_v18  ;;  %v2747_v18 = vld [vmem:[#allocation2 + $0x1a2] sm:$0xff] }
 0x10e   : > { %3746 = vmatmul.mubr.msk.bf16.gmra.mrb[20].mxu1 %vm348_vm1, %v4701_v35 }
 0x10f   : > { %3900 = vmatmul.mubr.msk.bf16.gmra.mrb[4].mxu0 %vm348_vm1, %v4571_v20  ;;  %3749 = vmatprep.mubr.msk.bf16.mxu1 %vm348_vm1, %v4711_v51 }
 0x110   : > { %3903 = vmatprep.mubr.msk.bf16.mxu0 %vm348_vm1, %v4583_v31 }
 0x116   : > { %3750 = vmatmul.mubr.msk.bf16.gmra.mrb[24].mxu1 %vm348_vm1, %v4713_v8 }
 0x117   : > { %3904 = vmatmul.mubr.msk.bf16.gmra.mrb[8].mxu0 %vm348_vm1, %v4587_v33  ;;  %3753 = vmatprep.mubr.msk.bf16.mxu1 %vm348_vm1, %v4723_v48 }
 0x118   : > { %3907 = vmatprep.mubr.msk.bf16.mxu0 %vm348_vm1, %v4599_v47 }
 0x11e   : > { %3754 = vmatmul.mubr.msk.bf16.gmra.mrb[28].mxu1 %vm348_vm1, %v4752_v16 }
 0x11f   : > { %3908 = vmatmul.mubr.msk.bf16.gmra.mrb[12].mxu0 %vm348_vm1, %v4601_v49  ;;  %3775 = vmatprep.mubr.msk.bf16.mxu1 %vm348_vm1, %v1579_v62 }
 0x120   : > { %3911 = vmatprep.mubr.msk.bf16.mxu0 %vm348_vm1, %v4612_v60 }
 0x126   : > { %3776 = vmatmul.mubr.msk.bf16.vlgmr.msra.gmra.mrb[16].mxu1 %vm348_vm1, %v1580_v0 }
 0x127   : > { %3912 = vmatmul.mubr.msk.bf16.gmra.mrb[16].mxu0 %vm348_vm1, %v4618_v5  ;;  %3779 = vmatprep.mubr.msk.bf16.mxu1 %vm348_vm1, %v4565_v17  ;;  %v2746_v17 = vld [vmem:[#allocation2 + $0x19a] sm:$0xff] }
 0x128   : > { %3915 = vmatprep.mubr.msk.bf16.mxu0 %vm348_vm1, %v4637_v24 }
 0x12e   : > { %3780 = vmatmul.mubr.msk.bf16.gmra.mrb[20].mxu1 %vm348_vm1, %v4569_v19  ;;  %v2763_v19 = vpack.c.bf16 %v2747_v18, %v2746_v17 }
 0x12f   : > { %3916 = vmatmul.mubr.msk.bf16.gmra.mrb[20].mxu0 %vm348_vm1, %v4641_v26  ;;  %3783 = vmatprep.mubr.msk.bf16.mxu1 %vm348_vm1, %v4581_v30 }
 0x130   : > { %3919 = vmatprep.mubr.msk.bf16.mxu0 %vm348_vm1, %v4653_v43 }
 0x136   : > { %3784 = vmatmul.mubr.msk.bf16.gmra.mrb[24].mxu1 %vm348_vm1, %v4585_v32 }
 0x137   : > { %3920 = vmatmul.mubr.msk.bf16.gmra.mrb[24].mxu0 %vm348_vm1, %v4657_v7  ;;  %3787 = vmatprep.mubr.msk.bf16.mxu1 %vm348_vm1, %v4597_v46 }
 0x138   : > { %3923 = vmatprep.mubr.msk.bf16.mxu0 %vm348_vm1, %v4669_v58 }
 0x13e   : > { %3788 = vmatmul.mubr.msk.bf16.gmra.mrb[28].mxu1 %vm348_vm1, %v2468_v42 }
 0x13f   : > { %3924 = vmatmul.mubr.msk.bf16.gmra.mrb[28].mxu0 %vm348_vm1, %v2763_v19 }
 0x1b9   : > { %v3727_v20 = vpop.f32.mrb[0].mxu1 }
 0x1ba   : > { %v1380_v30 = vpop.f32.mrb[1].mxu1 }
 0x1bb   : > { %v3728_v31 = vpop.f32.mrb[2].mxu1 }
 0x1bc   : > { %v1383_v32 = vpop.f32.mrb[3].mxu1 }
 0x1c1   : > { %v3731_v33 = vpop.f32.mrb[4].mxu1 }
 0x1c2   : > { %v1396_v47 = vpop.f32.mrb[5].mxu1 }
 0x1c3   : > { %v3732_v49 = vpop.f32.mrb[6].mxu1 }
 0x1c4   : > { %v1399_v59 = vpop.f32.mrb[7].mxu1 }
 0x1c9   : > { %v4889_v46 = vpop.f32.mrb[8].mxu1 }
 0x1ca   : > { %v4891_v60 = vpop.f32.mrb[9].mxu1 }
 0x1cb   : > { %v4893_v2 = vpop.f32.mrb[10].mxu1 }
 0x1cc   : > { %v4895_v5 = vpop.f32.mrb[11].mxu1 }
 0x1d1   : > { %v4897_v23 = vpop.f32.mrb[12].mxu1 }
 0x1d2   : > { %v4899_v24 = vpop.f32.mrb[13].mxu1 }
 0x1d3   : > { %v4901_v25 = vpop.f32.mrb[14].mxu1 }
 0x1d4   : > { %v4903_v26 = vpop.f32.mrb[15].mxu1 }
 0x1da   : > { %v3897_v40 = vpop.f32.mrb[0].mxu0 }
 0x1db   : > { %v3929_v43 = vadd.f32 %v3897_v40, %v3727_v20  ;;  %v2851_v45 = vpop.f32.mrb[1].mxu0 }
 0x1dc   : > { %v3930_v7 = vadd.f32 %v2851_v45, %v1380_v30  ;;  %v3898_v14 = vpop.f32.mrb[2].mxu0 }
 0x1dd   : > { %3012 = vst.msk [vmem:[%s4910_s22 + $0x10] sm:$0xff] %vm348_vm1, %v3929_v43  ;;  %v3931_v58 = vadd.f32 %v3898_v14, %v3728_v31  ;;  %v2854_v61 = vpop.f32.mrb[3].mxu0  ;;  %v3114_v21 = vmul.f32 %v3929_v43, %v3929_v43  ;;  %v3045_v38 = vsel %vm348_vm1, %v3929_v43, 0.0 }
 0x1de   : > { %3010 = vst.msk [vmem:[%s4910_s22] sm:$0xff] %vm348_vm1, %v3930_v7  ;;  %v3112_v12 = vmul.f32 %v3930_v7, %v3930_v7  ;;  %v3932_v15 = vadd.f32 %v2854_v61, %v1383_v32  ;;  %v3042_v29 = vsel %vm348_vm1, %v3930_v7, 0.0 }
 0x1df   : > { %3013 = vst.msk [vmem:[%s4910_s22 + $0x18] sm:$0xff] %vm348_vm1, %v3931_v58  ;;  %v3115_v36 = vmul.f32 %v3931_v58, %v3931_v58  ;;  %v3147_v48 = vsel %vm348_vm1, %v3114_v21, 0.0  ;;  %v3047_v11 = vsel %vm348_vm1, %v3931_v58, 0.0 }
 0x1e0   : > { %3011 = vst.msk [vmem:[%s4910_s22 + $0x8] sm:$0xff] %vm348_vm1, %v3932_v15  ;;  %v3043_v34 = vsel %vm348_vm1, %v3932_v15, 0.0  ;;  %v3113_v35 = vmul.f32 %v3932_v15, %v3932_v15  ;;  %v3144_v50 = vsel %vm348_vm1, %v3112_v12, 0.0 }
 0x1e1   : > { %v3044_v37 = vadd.f32 %v3043_v34, %v3042_v29  ;;  %v3149_v6 = vsel %vm348_vm1, %v3115_v36, 0.0 }
 0x1e2   : > { %v3145_v51 = vsel %vm348_vm1, %v3113_v35, 0.0  ;;  %v3901_v8 = vpop.f32.mrb[4].mxu0 }
 0x1e3   : > { %v3046_v54 = vadd.f32 %v3045_v38, %v3044_v37  ;;  %v3146_v55 = vadd.f32 %v3145_v51, %v3144_v50  ;;  %v3933_v56 = vadd.f32 %v3901_v8, %v3731_v33  ;;  %v2867_v10 = vpop.f32.mrb[5].mxu0 }
 0x1e4   : > { %v3934_v57 = vadd.f32 %v2867_v10, %v1396_v47  ;;  %v3902_v53 = vpop.f32.mrb[6].mxu0 }
 0x1e5   : > { %v3148_v16 = vadd.f32 %v3147_v48, %v3146_v55  ;;  %3016 = vst.msk [vmem:[%s4910_s22 + $0x30] sm:$0xff] %vm348_vm1, %v3933_v56  ;;  %v3048_v1 = vadd.f32 %v3047_v11, %v3046_v54  ;;  %v2870_v27 = vpop.f32.mrb[7].mxu0  ;;  %v3935_v3 = vadd.f32 %v3902_v53, %v3732_v49  ;;  %v3118_v44 = vmul.f32 %v3933_v56, %v3933_v56 }
 0x1e6   : > { %3014 = vst.msk [vmem:[%s4910_s22 + $0x20] sm:$0xff] %vm348_vm1, %v3934_v57  ;;  %v3049_v28 = vsel %vm348_vm1, %v3934_v57, 0.0  ;;  %v3116_v4 = vmul.f32 %v3934_v57, %v3934_v57  ;;  %v3936_v41 = vadd.f32 %v2870_v27, %v1399_v59  ;;  %v3053_v63 = vsel %vm348_vm1, %v3933_v56, 0.0 }
 0x1e7   : > { %v3050_v42 = vadd.f32 %v3049_v28, %v3048_v1  ;;  %v3150_v9 = vadd.f32 %v3149_v6, %v3148_v16  ;;  %3017 = vst.msk [vmem:[%s4910_s22 + $0x38] sm:$0xff] %vm348_vm1, %v3935_v3  ;;  %v3119_v17 = vmul.f32 %v3935_v3, %v3935_v3  ;;  %v3055_v31 = vsel %vm348_vm1, %v3935_v3, 0.0 }
 0x1e8   : > { %v3151_v13 = vsel %vm348_vm1, %v3116_v4, 0.0  ;;  %3015 = vst.msk [vmem:[%s4910_s22 + $0x28] sm:$0xff] %vm348_vm1, %v3936_v41  ;;  %v3051_v39 = vsel %vm348_vm1, %v3936_v41, 0.0  ;;  %v3117_v22 = vmul.f32 %v3936_v41, %v3936_v41  ;;  %v3155_v49 = vsel %vm348_vm1, %v3118_v44, 0.0 }
 0x1e9   : > { %v3152_v52 = vadd.f32 %v3151_v13, %v3150_v9  ;;  %v3052_v62 = vadd.f32 %v3051_v39, %v3050_v42 }
 0x1ea   : > { %v3905_v0 = vpop.f32.mrb[8].mxu0  ;;  %v3153_v19 = vsel %vm348_vm1, %v3117_v22, 0.0 }
 0x1eb   : > { %v3054_v18 = vadd.f32 %v3053_v63, %v3052_v62  ;;  %v3937_v20 = vadd.f32 %v3905_v0, %v4889_v46  ;;  %v2883_v30 = vpop.f32.mrb[9].mxu0  ;;  %v3154_v32 = vadd.f32 %v3153_v19, %v3152_v52 }
 0x1ec   : > { %v3938_v33 = vadd.f32 %v2883_v30, %v4891_v60  ;;  %v3906_v47 = vpop.f32.mrb[10].mxu0  ;;  %v3157_v60 = vsel %vm348_vm1, %v3119_v17, 0.0 }
 0x1ed   : > { %3020 = vst.msk [vmem:[%s4910_s22 + $0x50] sm:$0xff] %vm348_vm1, %v3937_v20  ;;  %v3056_v59 = vadd.f32 %v3055_v31, %v3054_v18  ;;  %v3939_v40 = vadd.f32 %v3906_v47, %v4893_v2  ;;  %v2886_v43 = vpop.f32.mrb[11].mxu0  ;;  %v3156_v45 = vadd.f32 %v3155_v49, %v3154_v32  ;;  %v3122_v21 = vmul.f32 %v3937_v20, %v3937_v20 }
 0x1ee   : > { %3018 = vst.msk [vmem:[%s4910_s22 + $0x40] sm:$0xff] %vm348_vm1, %v3938_v33  ;;  %v3057_v46 = vsel %vm348_vm1, %v3938_v33, 0.0  ;;  %v3120_v7 = vmul.f32 %v3938_v33, %v3938_v33  ;;  %v3940_v14 = vadd.f32 %v2886_v43, %v4895_v5  ;;  %v3061_v34 = vsel %vm348_vm1, %v3937_v20, 0.0 }
 0x1ef   : > { %v3058_v58 = vadd.f32 %v3057_v46, %v3056_v59  ;;  %3021 = vst.msk [vmem:[%s4910_s22 + $0x58] sm:$0xff] %vm348_vm1, %v3939_v40  ;;  %v3158_v61 = vadd.f32 %v3157_v60, %v3156_v45  ;;  %v3123_v37 = vmul.f32 %v3939_v40, %v3939_v40  ;;  %v3063_v8 = vsel %vm348_vm1, %v3939_v40, 0.0 }
 0x1f0   : > { %v3159_v12 = vsel %vm348_vm1, %v3120_v7, 0.0  ;;  %3019 = vst.msk [vmem:[%s4910_s22 + $0x48] sm:$0xff] %vm348_vm1, %v3940_v14  ;;  %v3059_v2 = vsel %vm348_vm1, %v3940_v14, 0.0  ;;  %v3121_v15 = vmul.f32 %v3940_v14, %v3940_v14  ;;  %v3163_v10 = vsel %vm348_vm1, %v3122_v21, 0.0 }
 0x1f1   : > { %v3060_v29 = vadd.f32 %v3059_v2, %v3058_v58  ;;  %v3160_v35 = vadd.f32 %v3159_v12, %v3158_v61 }
 0x1f2   : > { %v3161_v5 = vsel %vm348_vm1, %v3121_v15, 0.0  ;;  %v3909_v36 = vpop.f32.mrb[12].mxu0 }
 0x1f3   : > { %v3062_v38 = vadd.f32 %v3061_v34, %v3060_v29  ;;  %v3941_v50 = vadd.f32 %v3909_v36, %v4897_v23  ;;  %v2899_v51 = vpop.f32.mrb[13].mxu0  ;;  %v3162_v54 = vadd.f32 %v3161_v5, %v3160_v35 }
 0x1f4   : > { %v3942_v55 = vadd.f32 %v2899_v51, %v4899_v24  ;;  %v3910_v56 = vpop.f32.mrb[14].mxu0  ;;  %v3165_v24 = vsel %vm348_vm1, %v3123_v37, 0.0 }
 0x1f5   : > { %3024 = vst.msk [vmem:[%s4910_s22 + $0x70] sm:$0xff] %vm348_vm1, %v3941_v50  ;;  %v3064_v48 = vadd.f32 %v3063_v8, %v3062_v38  ;;  %v3943_v11 = vadd.f32 %v3910_v56, %v4901_v25  ;;  %v2902_v57 = vpop.f32.mrb[15].mxu0  ;;  %v3164_v53 = vadd.f32 %v3163_v10, %v3162_v54  ;;  %v3126_v3 = vmul.f32 %v3941_v50, %v3941_v50 }
 0x1f6   : > { %3022 = vst.msk [vmem:[%s4910_s22 + $0x60] sm:$0xff] %vm348_vm1, %v3942_v55  ;;  %v3065_v23 = vsel %vm348_vm1, %v3942_v55, 0.0  ;;  %v3124_v6 = vmul.f32 %v3942_v55, %v3942_v55  ;;  %v3944_v16 = vadd.f32 %v2902_v57, %v4903_v26  ;;  %v3069_v9 = vsel %vm348_vm1, %v3941_v50, 0.0 }
 0x1f7   : > { %v3066_v1 = vadd.f32 %v3065_v23, %v3064_v48  ;;  %3025 = vst.msk [vmem:[%s4910_s22 + $0x78] sm:$0xff] %vm348_vm1, %v3943_v11  ;;  %v3166_v27 = vadd.f32 %v3165_v24, %v3164_v53  ;;  %v3127_v52 = vmul.f32 %v3943_v11, %v3943_v11  ;;  %v3071_v17 = vsel %vm348_vm1, %v3943_v11, 0.0 }
 0x1f8   : > { %v3167_v28 = vsel %vm348_vm1, %v3124_v6, 0.0  ;;  %3023 = vst.msk [vmem:[%s4910_s22 + $0x68] sm:$0xff] %vm348_vm1, %v3944_v16  ;;  %v3067_v25 = vsel %vm348_vm1, %v3944_v16, 0.0  ;;  %v3125_v4 = vmul.f32 %v3944_v16, %v3944_v16  ;;  %v3171_v31 = vsel %vm348_vm1, %v3126_v3, 0.0 }
 0x1f9   : > { %v3068_v41 = vadd.f32 %v3067_v25, %v3066_v1  ;;  %v3777_v42 = vpop.f32.mrb[16].mxu1  ;;  %v3168_v26 = vadd.f32 %v3167_v28, %v3166_v27  ;;  %v3173_v45 = vsel %vm348_vm1, %v3127_v52, 0.0 }
 0x1fa   : > { %v3169_v13 = vsel %vm348_vm1, %v3125_v4, 0.0  ;;  %v1738_v39 = vpop.f32.mrb[17].mxu1  ;;  %v3913_v44 = vpop.f32.mrb[16].mxu0 }
 0x1fb   : > { %v3070_v62 = vadd.f32 %v3069_v9, %v3068_v41  ;;  %v3945_v22 = vadd.f32 %v3913_v44, %v3777_v42  ;;  %v3778_v63 = vpop.f32.mrb[18].mxu1  ;;  %v2915_v0 = vpop.f32.mrb[17].mxu0  ;;  %v3170_v18 = vadd.f32 %v3169_v13, %v3168_v26 }
 0x1fc   : > { %v3946_v19 = vadd.f32 %v2915_v0, %v1738_v39  ;;  %v1741_v20 = vpop.f32.mrb[19].mxu1  ;;  %v3914_v30 = vpop.f32.mrb[18].mxu0 }
 0x1fd   : > { %3028 = vst.msk [vmem:[%s4910_s22 + $0x90] sm:$0xff] %vm348_vm1, %v3945_v22  ;;  %v3072_v32 = vadd.f32 %v3071_v17, %v3070_v62  ;;  %v3947_v33 = vadd.f32 %v3914_v30, %v3778_v63  ;;  %v2918_v47 = vpop.f32.mrb[19].mxu0  ;;  %v3172_v49 = vadd.f32 %v3171_v31, %v3170_v18  ;;  %v3130_v61 = vmul.f32 %v3945_v22, %v3945_v22 }
 0x1fe   : > { %3026 = vst.msk [vmem:[%s4910_s22 + $0x80] sm:$0xff] %vm348_vm1, %v3946_v19  ;;  %v3073_v59 = vsel %vm348_vm1, %v3946_v19, 0.0  ;;  %v3128_v40 = vmul.f32 %v3946_v19, %v3946_v19  ;;  %v3948_v43 = vadd.f32 %v2918_v47, %v1741_v20  ;;  %v3077_v15 = vsel %vm348_vm1, %v3945_v22, 0.0 }
 0x1ff   : > { %v3074_v46 = vadd.f32 %v3073_v59, %v3072_v32  ;;  %3029 = vst.msk [vmem:[%s4910_s22 + $0x98] sm:$0xff] %vm348_vm1, %v3947_v33  ;;  %v3174_v7 = vadd.f32 %v3173_v45, %v3172_v49  ;;  %v3131_v5 = vmul.f32 %v3947_v33, %v3947_v33  ;;  %v3079_v51 = vsel %vm348_vm1, %v3947_v33, 0.0 }
 0x200   : > { %v3175_v14 = vsel %vm348_vm1, %v3128_v40, 0.0  ;;  %3027 = vst.msk [vmem:[%s4910_s22 + $0x88] sm:$0xff] %vm348_vm1, %v3948_v43  ;;  %v3075_v60 = vsel %vm348_vm1, %v3948_v43, 0.0  ;;  %v3129_v58 = vmul.f32 %v3948_v43, %v3948_v43  ;;  %v3179_v10 = vsel %vm348_vm1, %v3130_v61, 0.0 }
 0x201   : > { %v3076_v12 = vadd.f32 %v3075_v60, %v3074_v46  ;;  %v3781_v2 = vpop.f32.mrb[20].mxu1  ;;  %v3176_v21 = vadd.f32 %v3175_v14, %v3174_v7  ;;  %v3181_v24 = vsel %vm348_vm1, %v3131_v5, 0.0 }
 0x202   : > { %v3177_v29 = vsel %vm348_vm1, %v3129_v58, 0.0  ;;  %v1754_v34 = vpop.f32.mrb[21].mxu1  ;;  %v3917_v35 = vpop.f32.mrb[20].mxu0 }
 0x203   : > { %v3078_v36 = vadd.f32 %v3077_v15, %v3076_v12  ;;  %v3949_v37 = vadd.f32 %v3917_v35, %v3781_v2  ;;  %v3782_v38 = vpop.f32.mrb[22].mxu1  ;;  %v2931_v50 = vpop.f32.mrb[21].mxu0  ;;  %v3178_v8 = vadd.f32 %v3177_v29, %v3176_v21 }
 0x204   : > { %v3950_v54 = vadd.f32 %v2931_v50, %v1754_v34  ;;  %v1757_v55 = vpop.f32.mrb[23].mxu1  ;;  %v3918_v56 = vpop.f32.mrb[22].mxu0 }
 0x205   : > { %3032 = vst.msk [vmem:[%s4910_s22 + $0xb0] sm:$0xff] %vm348_vm1, %v3949_v37  ;;  %v3080_v48 = vadd.f32 %v3079_v51, %v3078_v36  ;;  %v3951_v11 = vadd.f32 %v3918_v56, %v3782_v38  ;;  %v2934_v57 = vpop.f32.mrb[23].mxu0  ;;  %v3180_v53 = vadd.f32 %v3179_v10, %v3178_v8  ;;  %v3134_v3 = vmul.f32 %v3949_v37, %v3949_v37 }
 0x206   : > { %3030 = vst.msk [vmem:[%s4910_s22 + $0xa0] sm:$0xff] %vm348_vm1, %v3950_v54  ;;  %v3081_v23 = vsel %vm348_vm1, %v3950_v54, 0.0  ;;  %v3132_v6 = vmul.f32 %v3950_v54, %v3950_v54  ;;  %v3952_v16 = vadd.f32 %v2934_v57, %v1757_v55  ;;  %v3085_v9 = vsel %vm348_vm1, %v3949_v37, 0.0 }
 0x207   : > { %v3082_v1 = vadd.f32 %v3081_v23, %v3080_v48  ;;  %3033 = vst.msk [vmem:[%s4910_s22 + $0xb8] sm:$0xff] %vm348_vm1, %v3951_v11  ;;  %v3182_v27 = vadd.f32 %v3181_v24, %v3180_v53  ;;  %v3135_v52 = vmul.f32 %v3951_v11, %v3951_v11  ;;  %v3087_v17 = vsel %vm348_vm1, %v3951_v11, 0.0 }
 0x208   : > { %v3183_v28 = vsel %vm348_vm1, %v3132_v6, 0.0  ;;  %3031 = vst.msk [vmem:[%s4910_s22 + $0xa8] sm:$0xff] %vm348_vm1, %v3952_v16  ;;  %v3083_v25 = vsel %vm348_vm1, %v3952_v16, 0.0  ;;  %v3133_v4 = vmul.f32 %v3952_v16, %v3952_v16  ;;  %v3187_v31 = vsel %vm348_vm1, %v3134_v3, 0.0 }
 0x209   : > { %v3084_v41 = vadd.f32 %v3083_v25, %v3082_v1  ;;  %v3785_v42 = vpop.f32.mrb[24].mxu1  ;;  %v3184_v26 = vadd.f32 %v3183_v28, %v3182_v27  ;;  %v3189_v45 = vsel %vm348_vm1, %v3135_v52, 0.0 }
 0x20a   : > { %v3185_v13 = vsel %vm348_vm1, %v3133_v4, 0.0  ;;  %v1770_v39 = vpop.f32.mrb[25].mxu1  ;;  %v3921_v44 = vpop.f32.mrb[24].mxu0 }
 0x20b   : > { %v3086_v62 = vadd.f32 %v3085_v9, %v3084_v41  ;;  %v3953_v22 = vadd.f32 %v3921_v44, %v3785_v42  ;;  %v3786_v63 = vpop.f32.mrb[26].mxu1  ;;  %v2947_v0 = vpop.f32.mrb[25].mxu0  ;;  %v3186_v18 = vadd.f32 %v3185_v13, %v3184_v26 }
 0x20c   : > { %v3954_v19 = vadd.f32 %v2947_v0, %v1770_v39  ;;  %v1773_v20 = vpop.f32.mrb[27].mxu1  ;;  %v3922_v30 = vpop.f32.mrb[26].mxu0 }
 0x20d   : > { %3036 = vst.msk [vmem:[%s4910_s22 + $0xd0] sm:$0xff] %vm348_vm1, %v3953_v22  ;;  %v3088_v32 = vadd.f32 %v3087_v17, %v3086_v62  ;;  %v3955_v33 = vadd.f32 %v3922_v30, %v3786_v63  ;;  %v2950_v47 = vpop.f32.mrb[27].mxu0  ;;  %v3188_v49 = vadd.f32 %v3187_v31, %v3186_v18  ;;  %v3138_v61 = vmul.f32 %v3953_v22, %v3953_v22 }
 0x20e   : > { %3034 = vst.msk [vmem:[%s4910_s22 + $0xc0] sm:$0xff] %vm348_vm1, %v3954_v19  ;;  %v3089_v59 = vsel %vm348_vm1, %v3954_v19, 0.0  ;;  %v3136_v40 = vmul.f32 %v3954_v19, %v3954_v19  ;;  %v3956_v43 = vadd.f32 %v2950_v47, %v1773_v20  ;;  %v3093_v15 = vsel %vm348_vm1, %v3953_v22, 0.0 }
 0x20f   : > { %v3090_v46 = vadd.f32 %v3089_v59, %v3088_v32  ;;  %3037 = vst.msk [vmem:[%s4910_s22 + $0xd8] sm:$0xff] %vm348_vm1, %v3955_v33  ;;  %v3190_v7 = vadd.f32 %v3189_v45, %v3188_v49  ;;  %v3139_v5 = vmul.f32 %v3955_v33, %v3955_v33  ;;  %v3095_v51 = vsel %vm348_vm1, %v3955_v33, 0.0 }
 0x210   : > { %v3191_v14 = vsel %vm348_vm1, %v3136_v40, 0.0  ;;  %3035 = vst.msk [vmem:[%s4910_s22 + $0xc8] sm:$0xff] %vm348_vm1, %v3956_v43  ;;  %v3091_v60 = vsel %vm348_vm1, %v3956_v43, 0.0  ;;  %v3137_v58 = vmul.f32 %v3956_v43, %v3956_v43  ;;  %v3195_v10 = vsel %vm348_vm1, %v3138_v61, 0.0 }
 0x211   : > { %v3092_v12 = vadd.f32 %v3091_v60, %v3090_v46  ;;  %v3789_v2 = vpop.f32.mrb[28].mxu1  ;;  %v3192_v21 = vadd.f32 %v3191_v14, %v3190_v7  ;;  %v3197_v24 = vsel %vm348_vm1, %v3139_v5, 0.0 }
 0x212   : > { %v3193_v29 = vsel %vm348_vm1, %v3137_v58, 0.0  ;;  %v1786_v34 = vpop.f32.mrb[29].mxu1  ;;  %v3925_v35 = vpop.f32.mrb[28].mxu0 }
 0x213   : > { %v3094_v36 = vadd.f32 %v3093_v15, %v3092_v12  ;;  %v3957_v37 = vadd.f32 %v3925_v35, %v3789_v2  ;;  %v3790_v38 = vpop.f32.mrb[30].mxu1  ;;  %v2963_v50 = vpop.f32.mrb[29].mxu0  ;;  %v3194_v8 = vadd.f32 %v3193_v29, %v3192_v21 }
 0x214   : > { %v3958_v54 = vadd.f32 %v2963_v50, %v1786_v34  ;;  %v1789_v55 = vpop.f32.mrb[31].mxu1  ;;  %v3926_v56 = vpop.f32.mrb[30].mxu0 }
 0x215   : > { %3040 = vst.msk [vmem:[%s4910_s22 + $0xf0] sm:$0xff] %vm348_vm1, %v3957_v37  ;;  %v3096_v48 = vadd.f32 %v3095_v51, %v3094_v36  ;;  %v3959_v11 = vadd.f32 %v3926_v56, %v3790_v38  ;;  %v2966_v57 = vpop.f32.mrb[31].mxu0  ;;  %v3196_v53 = vadd.f32 %v3195_v10, %v3194_v8  ;;  %v3142_v3 = vmul.f32 %v3957_v37, %v3957_v37 }
 0x216   : > { %3038 = vst.msk [vmem:[%s4910_s22 + $0xe0] sm:$0xff] %vm348_vm1, %v3958_v54  ;;  %v3097_v23 = vsel %vm348_vm1, %v3958_v54, 0.0  ;;  %v3140_v6 = vmul.f32 %v3958_v54, %v3958_v54  ;;  %v3960_v16 = vadd.f32 %v2966_v57, %v1789_v55  ;;  %v3101_v42 = vsel %vm348_vm1, %v3957_v37, 0.0 }
 0x217   : > { %v3098_v1 = vadd.f32 %v3097_v23, %v3096_v48  ;;  %3041 = vst.msk [vmem:[%s4910_s22 + $0xf8] sm:$0xff] %vm348_vm1, %v3959_v11  ;;  %v3198_v27 = vadd.f32 %v3197_v24, %v3196_v53  ;;  %v3143_v13 = vmul.f32 %v3959_v11, %v3959_v11  ;;  %v3103_v44 = vsel %vm348_vm1, %v3959_v11, 0.0 }
 0x218   : > { %v3199_v28 = vsel %vm348_vm1, %v3140_v6, 0.0  ;;  %3039 = vst.msk [vmem:[%s4910_s22 + $0xe8] sm:$0xff] %vm348_vm1, %v3960_v16  ;;  %v3099_v25 = vsel %vm348_vm1, %v3960_v16, 0.0  ;;  %v3141_v4 = vmul.f32 %v3960_v16, %v3960_v16  ;;  %v3203_v62 = vsel %vm348_vm1, %v3142_v3, 0.0 }
 0x219   : > { %v3100_v41 = vadd.f32 %v3099_v25, %v3098_v1  ;;  %v3200_v9 = vadd.f32 %v3199_v28, %v3198_v27  ;;  %v3205_v0 = vsel %vm348_vm1, %v3143_v13, 0.0 }
 0x21a   : > { %v3201_v26 = vsel %vm348_vm1, %v3141_v4, 0.0 }
 0x21b   : > { %v3102_v39 = vadd.f32 %v3101_v42, %v3100_v41  ;;  %v3202_v52 = vadd.f32 %v3201_v26, %v3200_v9 }
 0x21d   : > { %v3104_v22 = vadd.f32 %v3103_v44, %v3102_v39  ;;  %v3204_v63 = vadd.f32 %v3203_v62, %v3202_v52 }
 0x21f   : > { %v3105_v17 = vrot.slane %v3104_v22, 4  ;;  %v3206_v18 = vadd.f32 %v3205_v0, %v3204_v63 }
 0x221   : > { %v3106_v19 = vadd.f32 %v3105_v17, %v3104_v22  ;;  %v3207_v20 = vrot.slane %v3206_v18, 4 }
 0x223   : > { %v3107_v30 = vrot.slane %v3106_v19, 2  ;;  %v3208_v31 = vadd.f32 %v3207_v20, %v3206_v18 }
 0x225   : > { %v3108_v32 = vadd.f32 %v3107_v30, %v3106_v19  ;;  %v3209_v33 = vrot.slane %v3208_v31, 2 }
 0x227   : > { %v3109_v47 = vrot.slane %v3108_v32, 1  ;;  %v3210_v49 = vadd.f32 %v3209_v33, %v3208_v31 }
 0x229   : > { %v3110_v59 = vadd.f32 %v3109_v47, %v3108_v32  ;;  %v3211_v40 = vrot.slane %v3210_v49, 1 }
 0x22b   : > { %3111 = vst.msk [vmem:[%s208_s26] sm:$0x1] %vm357_vm3, %v3110_v59  ;;  %v3212_v43 = vadd.f32 %v3211_v40, %v3210_v49 }
 0x22d   : > { %3213 = vst.msk [vmem:[%s208_s26 + $0x1] sm:$0x1] %vm357_vm3, %v3212_v43 }
 0x22e PF: > { %s15_s15 = sadd.s32 1, %s4210_s15  }
 0x22f   : > { %p12_p4 = scmp.ge.s32.totalorder %s15_s15, 4  }
 0x231   :  { %14 = sbr.rel (!%p12_p4) target bundleno = 1 (0x1), region = 85 }

</bundles_post_ra>
